<compile_context>
chip_gen: v7x
topology: tpu7x:2x2x1
jax: 0.10.0
libtpu: 0.0.40
codegen_flags: <defaults>
</compile_context>

<pallas_src>
import jax
import jax.numpy as jnp
from jax.experimental import pallas as pl
from jax.experimental.pallas import tpu as pltpu


KSIZE = 13
PAD = 6
LANE_TARGET = 128   # target lane width  (nb * W)
ROW_TARGET = 128    # target matmul M    (gb * H)


def spatial_attention_kernel(w1_ref, b_ref, kv_ref, x_ref, o_ref):
    # w1_ref : (C,)            SMEM  1x1-conv weights
    # b_ref  : (3,)            SMEM  biases [b1, b2, b3]
    # kv_ref : (2, 13*L, L)    VMEM  bf16 stacked column-weight matrices
    # x_ref  : (gb, C, H, L)   VMEM  gb lane-packed batch groups (L = nb*W)
    # o_ref  : (gb, H, L)      VMEM
    GB, C, H, L = x_ref.shape

    # ---- conv1 (1x1, C -> 1) + ReLU  (f32 VPU) ---------------------------
    # TODO(synk): for large C, use a (1,C)@(C, gb*H*L) MXU contraction.
    w1 = [w1_ref[c] for c in range(C)]          # hoist SMEM scalar reads
    acc = jnp.full((GB, H, L), b_ref[0], dtype=jnp.float32)
    for c in range(C):
        acc = acc + x_ref[:, c, :, :] * w1[c]
    y = jnp.maximum(acc, 0.0)

    # ---- fused 13x13 conv: one bf16 MXU matmul per conv ------------------
    def conv13(y3, kvs_bf16, bias):
        # y3: (GB, H, L) f32 ; kvs_bf16: (13L, L) bf16
        zpad = jnp.zeros((GB, PAD, L), dtype=jnp.float32)
        ypad = jnp.concatenate([zpad, y3, zpad], axis=1)          # (GB, H+12, L)
        # ystack[g, h, i*L + l] = y3[g, h + i - PAD, l]  (0 outside [0, H))
        ystack = jnp.concatenate(
            [ypad[:, i:i + H, :] for i in range(KSIZE)], axis=2)  # (GB, H, 13L)
        lhs = ystack.reshape(GB * H, KSIZE * L).astype(jnp.bfloat16)
        out = jnp.dot(lhs, kvs_bf16, preferred_element_type=jnp.float32) + bias
        return out.reshape(GB, H, L)

    # conv13_1 + ReLU (f32)
    y = jnp.maximum(conv13(y, kv_ref[0], b_ref[1]), 0.0)
    # conv13_2 + Sigmoid; the divide goes to the EUP (approx reciprocal).
    z = conv13(y, kv_ref[1], b_ref[2])
    o_ref[...] = pl.reciprocal(1.0 + jnp.exp(-z), approx=True)


def _make_stacked_col_weights(w13, W, nb, pad=PAD):
    """Build the (13*nb*W, nb*W) stacked, block-diagonal, banded column matrix.

    Kv[i*L + n*W + ws, m*W + wd] = w13[i, ws - wd + pad]  if n == m and the tap
                                                           index is in [0, 13)
                                 = 0                       otherwise
    so that  ystack @ Kv  (with ystack[:, i*L + l] = row-shifted Y by i-pad)
    reproduces the zero-padded 13x13 cross-correlation per packed image.
    """
    ksize = w13.shape[-1]
    ws = jnp.arange(W)[:, None]           # source column (contraction index)
    wd = jnp.arange(W)[None, :]           # destination column
    j = ws - wd + pad                     # tap column index
    valid = (j >= 0) & (j < ksize)
    jc = jnp.clip(j, 0, ksize - 1)
    kt = w13[:, jc] * valid[None].astype(w13.dtype)        # (13, W, W)
    eye = jnp.eye(nb, dtype=w13.dtype)
    ktbd = jnp.einsum('iab,nm->inamb', kt, eye)            # (13, nb, W, nb, W)
    L = nb * W
    return ktbd.reshape(ksize * L, L)


def _choose_packing(N, H, W):
    """Pick (nb images per lane group, gb groups per step, grid steps)."""
    nb = max(1, LANE_TARGET // W) if W <= LANE_TARGET else 1
    g_lane = -(-N // nb)                          # lane-packed groups needed
    gb = max(1, min(max(1, ROW_TARGET // H), g_lane))
    grid = -(-g_lane // gb)
    # v7x: keep >= 2 parallel grid steps when there is more than one group of
    # work so the second TensorCore is not idle (harmless on v5e/v6e).
    if grid == 1 and gb > 1:
        gb = -(-g_lane // 2)
        grid = -(-g_lane // gb)
    return nb, gb, grid


def spatial_attention(x, w1, b1, w13_1, b2, w13_2, b3):
    """x: (N, C, H, W) float32 -> (N, 1, H, W) float32."""
    N, C, H, W = x.shape
    x = x.astype(jnp.float32)

    nb, gb, grid = _choose_packing(N, H, W)
    total_groups = grid * gb
    n_pad = total_groups * nb
    L = nb * W

    # Lane packing: nb images side by side -> lane dim L; pad batch to fill.
    xg = jnp.pad(x, ((0, n_pad - N), (0, 0), (0, 0), (0, 0)))
    xg = xg.reshape(total_groups, nb, C, H, W)
    xg = xg.transpose(0, 2, 3, 1, 4).reshape(total_groups, C, H, L)  # lane = n*W + w

    # Stacked, block-diagonal, banded column-weight matrices; bf16 MXU operands.
    kv = jnp.stack(
        [_make_stacked_col_weights(w13_1.astype(jnp.float32), W, nb),
         _make_stacked_col_weights(w13_2.astype(jnp.float32), W, nb)],
        axis=0).astype(jnp.bfloat16)                                 # (2, 13L, L)

    w1_flat = w1.reshape(C).astype(jnp.float32)
    biases = jnp.array([b1, b2, b3], dtype=jnp.float32)

    def call(kv_single_buffered):
        kv_kwargs = (
            dict(pipeline_mode=pl.Buffered(1)) if kv_single_buffered else {})
        return pl.pallas_call(
            spatial_attention_kernel,
            out_shape=jax.ShapeDtypeStruct((total_groups, H, L), jnp.float32),
            grid=(grid,),
            in_specs=[
                pl.BlockSpec(memory_space=pltpu.MemorySpace.SMEM),      # w1
                pl.BlockSpec(memory_space=pltpu.MemorySpace.SMEM),      # biases
                pl.BlockSpec((2, KSIZE * L, L), lambda g: (0, 0, 0),    # kv
                             **kv_kwargs),
                pl.BlockSpec((gb, C, H, L), lambda g: (g, 0, 0, 0)),    # x groups
            ],
            out_specs=pl.BlockSpec((gb, H, L), lambda g: (g, 0, 0)),
            compiler_params=pltpu.CompilerParams(
                dimension_semantics=("parallel",),
                vmem_limit_bytes=32 * 1024 * 1024),
        )(w1_flat, biases, kv, xg)

    try:
        # Grid-invariant kv: single-buffer (halves its VMEM footprint, never
        # re-DMA'd across grid steps).
        out_packed = call(kv_single_buffered=True)
    except Exception:
        # TODO(synk): drop this fallback once pl.Buffered(1) is guaranteed by
        # the deployed jax version; default double-buffering is also correct.
        out_packed = call(kv_single_buffered=False)

    # Unpack lanes back to (N, 1, H, W); padded images are discarded.
    out = out_packed.reshape(total_groups, H, nb, W).transpose(0, 2, 1, 3)
    out = out.reshape(n_pad, 1, H, W)
    return out[:N]


def _reference(x, w1, b1, w13_1, b2, w13_2, b3):
    C = x.shape[1]
    dn = ("NCHW", "OIHW", "NCHW")
    hp = jax.lax.Precision.HIGHEST
    y = jax.lax.conv_general_dilated(
        x, w1.reshape(1, C, 1, 1), (1, 1), "VALID",
        dimension_numbers=dn, precision=hp) + b1
    y = jnp.maximum(y, 0.0)
    y = jax.lax.conv_general_dilated(
        y, w13_1.reshape(1, 1, KSIZE, KSIZE), (1, 1),
        [(PAD, PAD), (PAD, PAD)], dimension_numbers=dn, precision=hp) + b2
    y = jnp.maximum(y, 0.0)
    y = jax.lax.conv_general_dilated(
        y, w13_2.reshape(1, 1, KSIZE, KSIZE), (1, 1),
        [(PAD, PAD), (PAD, PAD)], dimension_numbers=dn, precision=hp) + b3
    return jax.nn.sigmoid(y)


if __name__ == "__main__":
    # W=16 packs 8 images into a full 128-lane tile; N=30 exercises lane
    # packing, group folding, a multi-step parallel grid, and the padded
    # (discarded) partial last group.
    N, C, H, W = 30, 4, 16, 16

    key = jax.random.PRNGKey(0)
    kx, k1, k2, k3, kb = jax.random.split(key, 5)

    # Deterministic synthetic parameters (shapes follow the nn.Module __init__).
    x = jax.random.normal(kx, (N, C, H, W), dtype=jnp.float32)
    w1 = jax.random.normal(k1, (C,), dtype=jnp.float32) * 0.5        # conv1: (1,C,1,1)
    w13_1 = jax.random.normal(k2, (KSIZE, KSIZE), dtype=jnp.float32) * 0.05
    w13_2 = jax.random.normal(k3, (KSIZE, KSIZE), dtype=jnp.float32) * 0.05
    b = jax.random.normal(kb, (3,), dtype=jnp.float32) * 0.1
    b1, b2, b3 = float(b[0]), float(b[1]), float(b[2])

    out = spatial_attention(x, w1, b1, w13_1, b2, w13_2, b3)
    out = jax.block_until_ready(out)

    ref = _reference(x, w1, b1, w13_1, b2, w13_2, b3)
    assert out.shape == (N, 1, H, W), out.shape
    max_err = float(jnp.max(jnp.abs(out - ref)))
    assert jnp.allclose(out, ref, atol=2e-3, rtol=2e-3), max_err

    print("KERNEL_OK")
</pallas_src>

<mosaic_0001>
module attributes {stable_mosaic.version = 11 : i64} {
  func.func @spatial_attention_kernel(%arg0: i32, %arg1: memref<4xf32, #tpu.memory_space<smem>>, %arg2: memref<3xf32, #tpu.memory_space<smem>>, %arg3: memref<2x1664x128xbf16, #tpu.memory_space<vmem>>, %arg4: memref<2x4x16x128xf32, #tpu.memory_space<vmem>>, %arg5: memref<2x16x128xf32, #tpu.memory_space<vmem>>) attributes {dimension_semantics = [#tpu.dimension_semantics<parallel>], iteration_bounds = array<i64: 2>, scalar_prefetch = 0 : i64, scratch_operands = 0 : i64, tpu.core_type = #tpu.core_type<tc>, window_params = [{transform_indices = @transform_0, window_bounds = array<i64: 4>}, {transform_indices = @transform_1, window_bounds = array<i64: 3>}, {pipeline_mode = #tpu.pipeline_mode<synchronous>, transform_indices = @transform_2, window_bounds = array<i64: 2, 1664, 128>}, {transform_indices = @transform_3, window_bounds = array<i64: 2, 4, 16, 128>}, {transform_indices = @transform_4, window_bounds = array<i64: 2, 16, 128>}]} {
    %c0 = arith.constant 0 : index
    %0 = memref.load %arg1[%c0] : memref<4xf32, #tpu.memory_space<smem>>
    %c1 = arith.constant 1 : index
    %1 = memref.load %arg1[%c1] : memref<4xf32, #tpu.memory_space<smem>>
    %c2 = arith.constant 2 : index
    %2 = memref.load %arg1[%c2] : memref<4xf32, #tpu.memory_space<smem>>
    %c3 = arith.constant 3 : index
    %3 = memref.load %arg1[%c3] : memref<4xf32, #tpu.memory_space<smem>>
    %c0_0 = arith.constant 0 : index
    %4 = memref.load %arg2[%c0_0] : memref<3xf32, #tpu.memory_space<smem>>
    %5 = vector.broadcast %4 : f32 to vector<2x16x128xf32>
    %c0_1 = arith.constant 0 : index
    %c0_2 = arith.constant 0 : index
    %c0_3 = arith.constant 0 : index
    %c0_4 = arith.constant 0 : index
    %6 = vector.load %arg4[%c0_1, %c0_2, %c0_3, %c0_4] : memref<2x4x16x128xf32, #tpu.memory_space<vmem>>, vector<2x1x16x128xf32>
    %7 = vector.shape_cast %6 : vector<2x1x16x128xf32> to vector<2x16x128xf32>
    %8 = vector.broadcast %0 : f32 to vector<2x16x128xf32>
    %9 = arith.mulf %7, %8 : vector<2x16x128xf32>
    %10 = arith.addf %5, %9 : vector<2x16x128xf32>
    %c0_5 = arith.constant 0 : index
    %c1_6 = arith.constant 1 : index
    %c0_7 = arith.constant 0 : index
    %c0_8 = arith.constant 0 : index
    %11 = vector.load %arg4[%c0_5, %c1_6, %c0_7, %c0_8] : memref<2x4x16x128xf32, #tpu.memory_space<vmem>>, vector<2x1x16x128xf32>
    %12 = vector.shape_cast %11 : vector<2x1x16x128xf32> to vector<2x16x128xf32>
    %13 = vector.broadcast %1 : f32 to vector<2x16x128xf32>
    %14 = arith.mulf %12, %13 : vector<2x16x128xf32>
    %15 = arith.addf %10, %14 : vector<2x16x128xf32>
    %c0_9 = arith.constant 0 : index
    %c2_10 = arith.constant 2 : index
    %c0_11 = arith.constant 0 : index
    %c0_12 = arith.constant 0 : index
    %16 = vector.load %arg4[%c0_9, %c2_10, %c0_11, %c0_12] : memref<2x4x16x128xf32, #tpu.memory_space<vmem>>, vector<2x1x16x128xf32>
    %17 = vector.shape_cast %16 : vector<2x1x16x128xf32> to vector<2x16x128xf32>
    %18 = vector.broadcast %2 : f32 to vector<2x16x128xf32>
    %19 = arith.mulf %17, %18 : vector<2x16x128xf32>
    %20 = arith.addf %15, %19 : vector<2x16x128xf32>
    %c0_13 = arith.constant 0 : index
    %c3_14 = arith.constant 3 : index
    %c0_15 = arith.constant 0 : index
    %c0_16 = arith.constant 0 : index
    %21 = vector.load %arg4[%c0_13, %c3_14, %c0_15, %c0_16] : memref<2x4x16x128xf32, #tpu.memory_space<vmem>>, vector<2x1x16x128xf32>
    %22 = vector.shape_cast %21 : vector<2x1x16x128xf32> to vector<2x16x128xf32>
    %23 = vector.broadcast %3 : f32 to vector<2x16x128xf32>
    %24 = arith.mulf %22, %23 : vector<2x16x128xf32>
    %25 = arith.addf %20, %24 : vector<2x16x128xf32>
    %cst = arith.constant 0.000000e+00 : f32
    %26 = vector.broadcast %cst : f32 to vector<2x16x128xf32>
    %27 = arith.maximumf %25, %26 : vector<2x16x128xf32>
    %c0_17 = arith.constant 0 : index
    %c0_18 = arith.constant 0 : index
    %c0_19 = arith.constant 0 : index
    %28 = vector.load %arg3[%c0_17, %c0_18, %c0_19] : memref<2x1664x128xbf16, #tpu.memory_space<vmem>>, vector<1x1664x128xbf16>
    %29 = vector.shape_cast %28 : vector<1x1664x128xbf16> to vector<1664x128xbf16>
    %c1_20 = arith.constant 1 : index
    %30 = memref.load %arg2[%c1_20] : memref<3xf32, #tpu.memory_space<smem>>
    %cst_21 = arith.constant 0.000000e+00 : f32
    %31 = vector.broadcast %cst_21 : f32 to vector<2x6x128xf32>
    %32 = tpu.concatenate %31, %27, %31 in 1 : vector<2x6x128xf32>, vector<2x16x128xf32>, vector<2x6x128xf32> -> vector<2x28x128xf32>
    %33 = vector.extract_strided_slice %32 {offsets = [0, 0, 0], sizes = [2, 16, 128], strides = [1, 1, 1]} : vector<2x28x128xf32> to vector<2x16x128xf32>
    %34 = vector.extract_strided_slice %32 {offsets = [0, 1, 0], sizes = [2, 16, 128], strides = [1, 1, 1]} : vector<2x28x128xf32> to vector<2x16x128xf32>
    %35 = vector.extract_strided_slice %32 {offsets = [0, 2, 0], sizes = [2, 16, 128], strides = [1, 1, 1]} : vector<2x28x128xf32> to vector<2x16x128xf32>
    %36 = vector.extract_strided_slice %32 {offsets = [0, 3, 0], sizes = [2, 16, 128], strides = [1, 1, 1]} : vector<2x28x128xf32> to vector<2x16x128xf32>
    %37 = vector.extract_strided_slice %32 {offsets = [0, 4, 0], sizes = [2, 16, 128], strides = [1, 1, 1]} : vector<2x28x128xf32> to vector<2x16x128xf32>
    %38 = vector.extract_strided_slice %32 {offsets = [0, 5, 0], sizes = [2, 16, 128], strides = [1, 1, 1]} : vector<2x28x128xf32> to vector<2x16x128xf32>
    %39 = vector.extract_strided_slice %32 {offsets = [0, 6, 0], sizes = [2, 16, 128], strides = [1, 1, 1]} : vector<2x28x128xf32> to vector<2x16x128xf32>
    %40 = vector.extract_strided_slice %32 {offsets = [0, 7, 0], sizes = [2, 16, 128], strides = [1, 1, 1]} : vector<2x28x128xf32> to vector<2x16x128xf32>
    %41 = vector.extract_strided_slice %32 {offsets = [0, 8, 0], sizes = [2, 16, 128], strides = [1, 1, 1]} : vector<2x28x128xf32> to vector<2x16x128xf32>
    %42 = vector.extract_strided_slice %32 {offsets = [0, 9, 0], sizes = [2, 16, 128], strides = [1, 1, 1]} : vector<2x28x128xf32> to vector<2x16x128xf32>
    %43 = vector.extract_strided_slice %32 {offsets = [0, 10, 0], sizes = [2, 16, 128], strides = [1, 1, 1]} : vector<2x28x128xf32> to vector<2x16x128xf32>
    %44 = vector.extract_strided_slice %32 {offsets = [0, 11, 0], sizes = [2, 16, 128], strides = [1, 1, 1]} : vector<2x28x128xf32> to vector<2x16x128xf32>
    %45 = vector.extract_strided_slice %32 {offsets = [0, 12, 0], sizes = [2, 16, 128], strides = [1, 1, 1]} : vector<2x28x128xf32> to vector<2x16x128xf32>
    %46 = tpu.concatenate %33, %34, %35, %36, %37, %38, %39, %40, %41, %42, %43, %44, %45 in 2 : vector<2x16x128xf32>, vector<2x16x128xf32>, vector<2x16x128xf32>, vector<2x16x128xf32>, vector<2x16x128xf32>, vector<2x16x128xf32>, vector<2x16x128xf32>, vector<2x16x128xf32>, vector<2x16x128xf32>, vector<2x16x128xf32>, vector<2x16x128xf32>, vector<2x16x128xf32>, vector<2x16x128xf32> -> vector<2x16x1664xf32>
    %47 = vector.shape_cast %46 : vector<2x16x1664xf32> to vector<32x1664xf32>
    %48 = arith.truncf %47 : vector<32x1664xf32> to vector<32x1664xbf16>
    %cst_22 = arith.constant dense<0.000000e+00> : vector<32x128xf32>
    %49 = tpu.matmul %48, %29, %cst_22 {dimension_numbers = #tpu.dot_dimension_numbers<[1], [0], [0], [1], [0, 0, 1, 1], [], []>} : vector<32x1664xbf16>, vector<1664x128xbf16>, vector<32x128xf32> -> vector<32x128xf32>
    %50 = vector.broadcast %30 : f32 to vector<32x128xf32>
    %51 = arith.addf %49, %50 : vector<32x128xf32>
    %52 = vector.shape_cast %51 : vector<32x128xf32> to vector<2x16x128xf32>
    %cst_23 = arith.constant 0.000000e+00 : f32
    %53 = vector.broadcast %cst_23 : f32 to vector<2x16x128xf32>
    %54 = arith.maximumf %52, %53 : vector<2x16x128xf32>
    %c1_24 = arith.constant 1 : index
    %c0_25 = arith.constant 0 : index
    %c0_26 = arith.constant 0 : index
    %55 = vector.load %arg3[%c1_24, %c0_25, %c0_26] : memref<2x1664x128xbf16, #tpu.memory_space<vmem>>, vector<1x1664x128xbf16>
    %56 = vector.shape_cast %55 : vector<1x1664x128xbf16> to vector<1664x128xbf16>
    %c2_27 = arith.constant 2 : index
    %57 = memref.load %arg2[%c2_27] : memref<3xf32, #tpu.memory_space<smem>>
    %cst_28 = arith.constant 0.000000e+00 : f32
    %58 = vector.broadcast %cst_28 : f32 to vector<2x6x128xf32>
    %59 = tpu.concatenate %58, %54, %58 in 1 : vector<2x6x128xf32>, vector<2x16x128xf32>, vector<2x6x128xf32> -> vector<2x28x128xf32>
    %60 = vector.extract_strided_slice %59 {offsets = [0, 0, 0], sizes = [2, 16, 128], strides = [1, 1, 1]} : vector<2x28x128xf32> to vector<2x16x128xf32>
    %61 = vector.extract_strided_slice %59 {offsets = [0, 1, 0], sizes = [2, 16, 128], strides = [1, 1, 1]} : vector<2x28x128xf32> to vector<2x16x128xf32>
    %62 = vector.extract_strided_slice %59 {offsets = [0, 2, 0], sizes = [2, 16, 128], strides = [1, 1, 1]} : vector<2x28x128xf32> to vector<2x16x128xf32>
    %63 = vector.extract_strided_slice %59 {offsets = [0, 3, 0], sizes = [2, 16, 128], strides = [1, 1, 1]} : vector<2x28x128xf32> to vector<2x16x128xf32>
    %64 = vector.extract_strided_slice %59 {offsets = [0, 4, 0], sizes = [2, 16, 128], strides = [1, 1, 1]} : vector<2x28x128xf32> to vector<2x16x128xf32>
    %65 = vector.extract_strided_slice %59 {offsets = [0, 5, 0], sizes = [2, 16, 128], strides = [1, 1, 1]} : vector<2x28x128xf32> to vector<2x16x128xf32>
    %66 = vector.extract_strided_slice %59 {offsets = [0, 6, 0], sizes = [2, 16, 128], strides = [1, 1, 1]} : vector<2x28x128xf32> to vector<2x16x128xf32>
    %67 = vector.extract_strided_slice %59 {offsets = [0, 7, 0], sizes = [2, 16, 128], strides = [1, 1, 1]} : vector<2x28x128xf32> to vector<2x16x128xf32>
    %68 = vector.extract_strided_slice %59 {offsets = [0, 8, 0], sizes = [2, 16, 128], strides = [1, 1, 1]} : vector<2x28x128xf32> to vector<2x16x128xf32>
    %69 = vector.extract_strided_slice %59 {offsets = [0, 9, 0], sizes = [2, 16, 128], strides = [1, 1, 1]} : vector<2x28x128xf32> to vector<2x16x128xf32>
    %70 = vector.extract_strided_slice %59 {offsets = [0, 10, 0], sizes = [2, 16, 128], strides = [1, 1, 1]} : vector<2x28x128xf32> to vector<2x16x128xf32>
    %71 = vector.extract_strided_slice %59 {offsets = [0, 11, 0], sizes = [2, 16, 128], strides = [1, 1, 1]} : vector<2x28x128xf32> to vector<2x16x128xf32>
    %72 = vector.extract_strided_slice %59 {offsets = [0, 12, 0], sizes = [2, 16, 128], strides = [1, 1, 1]} : vector<2x28x128xf32> to vector<2x16x128xf32>
    %73 = tpu.concatenate %60, %61, %62, %63, %64, %65, %66, %67, %68, %69, %70, %71, %72 in 2 : vector<2x16x128xf32>, vector<2x16x128xf32>, vector<2x16x128xf32>, vector<2x16x128xf32>, vector<2x16x128xf32>, vector<2x16x128xf32>, vector<2x16x128xf32>, vector<2x16x128xf32>, vector<2x16x128xf32>, vector<2x16x128xf32>, vector<2x16x128xf32>, vector<2x16x128xf32>, vector<2x16x128xf32> -> vector<2x16x1664xf32>
    %74 = vector.shape_cast %73 : vector<2x16x1664xf32> to vector<32x1664xf32>
    %75 = arith.truncf %74 : vector<32x1664xf32> to vector<32x1664xbf16>
    %cst_29 = arith.constant dense<0.000000e+00> : vector<32x128xf32>
    %76 = tpu.matmul %75, %56, %cst_29 {dimension_numbers = #tpu.dot_dimension_numbers<[1], [0], [0], [1], [0, 0, 1, 1], [], []>} : vector<32x1664xbf16>, vector<1664x128xbf16>, vector<32x128xf32> -> vector<32x128xf32>
    %77 = vector.broadcast %57 : f32 to vector<32x128xf32>
    %78 = arith.addf %76, %77 : vector<32x128xf32>
    %79 = vector.shape_cast %78 : vector<32x128xf32> to vector<2x16x128xf32>
    %cst_30 = arith.constant 0.000000e+00 : f32
    %80 = vector.broadcast %cst_30 : f32 to vector<2x16x128xf32>
    %81 = arith.subf %80, %79 : vector<2x16x128xf32>
    %82 = math.exp %81 : vector<2x16x128xf32>
    %cst_31 = arith.constant 1.000000e+00 : f32
    %83 = vector.broadcast %cst_31 : f32 to vector<2x16x128xf32>
    %84 = arith.addf %83, %82 : vector<2x16x128xf32>
    %85 = tpu.reciprocal %84 {approx = true} : vector<2x16x128xf32> -> vector<2x16x128xf32>
    %c0_32 = arith.constant 0 : index
    %c0_33 = arith.constant 0 : index
    %c0_34 = arith.constant 0 : index
    %86 = vector.load %arg5[%c0_32, %c0_33, %c0_34] : memref<2x16x128xf32, #tpu.memory_space<vmem>>, vector<2x16x128xf32>
    tpu.vector_store %arg5[%c0_32, %c0_33, %c0_34], %85 {strides = array<i32>} : memref<2x16x128xf32, #tpu.memory_space<vmem>>, vector<2x16x128xf32>,
    return
  }
  func.func @transform_0(%arg0: i32) -> i32 {
    %c0_i32 = arith.constant 0 : i32
    %c0_i32_0 = arith.constant 0 : i32
    return %c0_i32 : i32
  }
  func.func @transform_1(%arg0: i32) -> i32 {
    %c0_i32 = arith.constant 0 : i32
    %c0_i32_0 = arith.constant 0 : i32
    return %c0_i32 : i32
  }
  func.func @transform_2(%arg0: i32) -> (i32, i32, i32) {
    %c0_i32 = arith.constant 0 : i32
    %c0_i32_0 = arith.constant 0 : i32
    %c0_i32_1 = arith.constant 0 : i32
    %c0_i32_2 = arith.constant 0 : i32
    return %c0_i32, %c0_i32_0, %c0_i32_1 : i32, i32, i32
  }
  func.func @transform_3(%arg0: i32) -> (i32, i32, i32, i32) {
    %c0_i32 = arith.constant 0 : i32
    %c0_i32_0 = arith.constant 0 : i32
    %c0_i32_1 = arith.constant 0 : i32
    %c0_i32_2 = arith.constant 0 : i32
    return %arg0, %c0_i32, %c0_i32_0, %c0_i32_1 : i32, i32, i32, i32
  }
  func.func @transform_4(%arg0: i32) -> (i32, i32, i32) {
    %c0_i32 = arith.constant 0 : i32
    %c0_i32_0 = arith.constant 0 : i32
    %c0_i32_1 = arith.constant 0 : i32
    return %arg0, %c0_i32, %c0_i32_0 : i32, i32, i32
  }
}

module attributes {stable_mosaic.version = 11 : i64} {
  func.func @spatial_attention_kernel(%arg0: i32, %arg1: memref<4xf32, #tpu.memory_space<smem>>, %arg2: memref<3xf32, #tpu.memory_space<smem>>, %arg3: memref<2x1664x128xbf16, #tpu.memory_space<vmem>>, %arg4: memref<2x4x16x128xf32, #tpu.memory_space<vmem>>, %arg5: memref<2x16x128xf32, #tpu.memory_space<vmem>>) attributes {dimension_semantics = [#tpu.dimension_semantics<parallel>], iteration_bounds = array<i64: 2>, scalar_prefetch = 0 : i64, scratch_operands = 0 : i64, tpu.core_type = #tpu.core_type<tc>, window_params = [{transform_indices = @transform_0, window_bounds = array<i64: 4>}, {transform_indices = @transform_1, window_bounds = array<i64: 3>}, {pipeline_mode = #tpu.pipeline_mode<synchronous>, transform_indices = @transform_2, window_bounds = array<i64: 2, 1664, 128>}, {transform_indices = @transform_3, window_bounds = array<i64: 2, 4, 16, 128>}, {transform_indices = @transform_4, window_bounds = array<i64: 2, 16, 128>}]} {
    %c0 = arith.constant 0 : index
    %0 = memref.load %arg1[%c0] : memref<4xf32, #tpu.memory_space<smem>>
    %c1 = arith.constant 1 : index
    %1 = memref.load %arg1[%c1] : memref<4xf32, #tpu.memory_space<smem>>
    %c2 = arith.constant 2 : index
    %2 = memref.load %arg1[%c2] : memref<4xf32, #tpu.memory_space<smem>>
    %c3 = arith.constant 3 : index
    %3 = memref.load %arg1[%c3] : memref<4xf32, #tpu.memory_space<smem>>
    %c0_0 = arith.constant 0 : index
    %4 = memref.load %arg2[%c0_0] : memref<3xf32, #tpu.memory_space<smem>>
    %5 = vector.broadcast %4 : f32 to vector<2x16x128xf32>
    %c0_1 = arith.constant 0 : index
    %c0_2 = arith.constant 0 : index
    %c0_3 = arith.constant 0 : index
    %c0_4 = arith.constant 0 : index
    %6 = vector.load %arg4[%c0_1, %c0_2, %c0_3, %c0_4] : memref<2x4x16x128xf32, #tpu.memory_space<vmem>>, vector<2x1x16x128xf32>
    %7 = vector.shape_cast %6 : vector<2x1x16x128xf32> to vector<2x16x128xf32>
    %8 = vector.broadcast %0 : f32 to vector<2x16x128xf32>
    %9 = arith.mulf %7, %8 : vector<2x16x128xf32>
    %10 = arith.addf %5, %9 : vector<2x16x128xf32>
    %c0_5 = arith.constant 0 : index
    %c1_6 = arith.constant 1 : index
    %c0_7 = arith.constant 0 : index
    %c0_8 = arith.constant 0 : index
    %11 = vector.load %arg4[%c0_5, %c1_6, %c0_7, %c0_8] : memref<2x4x16x128xf32, #tpu.memory_space<vmem>>, vector<2x1x16x128xf32>
    %12 = vector.shape_cast %11 : vector<2x1x16x128xf32> to vector<2x16x128xf32>
    %13 = vector.broadcast %1 : f32 to vector<2x16x128xf32>
    %14 = arith.mulf %12, %13 : vector<2x16x128xf32>
    %15 = arith.addf %10, %14 : vector<2x16x128xf32>
    %c0_9 = arith.constant 0 : index
    %c2_10 = arith.constant 2 : index
    %c0_11 = arith.constant 0 : index
    %c0_12 = arith.constant 0 : index
    %16 = vector.load %arg4[%c0_9, %c2_10, %c0_11, %c0_12] : memref<2x4x16x128xf32, #tpu.memory_space<vmem>>, vector<2x1x16x128xf32>
    %17 = vector.shape_cast %16 : vector<2x1x16x128xf32> to vector<2x16x128xf32>
    %18 = vector.broadcast %2 : f32 to vector<2x16x128xf32>
    %19 = arith.mulf %17, %18 : vector<2x16x128xf32>
    %20 = arith.addf %15, %19 : vector<2x16x128xf32>
    %c0_13 = arith.constant 0 : index
    %c3_14 = arith.constant 3 : index
    %c0_15 = arith.constant 0 : index
    %c0_16 = arith.constant 0 : index
    %21 = vector.load %arg4[%c0_13, %c3_14, %c0_15, %c0_16] : memref<2x4x16x128xf32, #tpu.memory_space<vmem>>, vector<2x1x16x128xf32>
    %22 = vector.shape_cast %21 : vector<2x1x16x128xf32> to vector<2x16x128xf32>
    %23 = vector.broadcast %3 : f32 to vector<2x16x128xf32>
    %24 = arith.mulf %22, %23 : vector<2x16x128xf32>
    %25 = arith.addf %20, %24 : vector<2x16x128xf32>
    %cst = arith.constant 0.000000e+00 : f32
    %26 = vector.broadcast %cst : f32 to vector<2x16x128xf32>
    %27 = arith.maximumf %25, %26 : vector<2x16x128xf32>
    %c0_17 = arith.constant 0 : index
    %c0_18 = arith.constant 0 : index
    %c0_19 = arith.constant 0 : index
    %28 = vector.load %arg3[%c0_17, %c0_18, %c0_19] : memref<2x1664x128xbf16, #tpu.memory_space<vmem>>, vector<1x1664x128xbf16>
    %29 = vector.shape_cast %28 : vector<1x1664x128xbf16> to vector<1664x128xbf16>
    %c1_20 = arith.constant 1 : index
    %30 = memref.load %arg2[%c1_20] : memref<3xf32, #tpu.memory_space<smem>>
    %cst_21 = arith.constant 0.000000e+00 : f32
    %31 = vector.broadcast %cst_21 : f32 to vector<2x6x128xf32>
    %32 = tpu.concatenate %31, %27, %31 in 1 : vector<2x6x128xf32>, vector<2x16x128xf32>, vector<2x6x128xf32> -> vector<2x28x128xf32>
    %33 = vector.extract_strided_slice %32 {offsets = [0, 0, 0], sizes = [2, 16, 128], strides = [1, 1, 1]} : vector<2x28x128xf32> to vector<2x16x128xf32>
    %34 = vector.extract_strided_slice %32 {offsets = [0, 1, 0], sizes = [2, 16, 128], strides = [1, 1, 1]} : vector<2x28x128xf32> to vector<2x16x128xf32>
    %35 = vector.extract_strided_slice %32 {offsets = [0, 2, 0], sizes = [2, 16, 128], strides = [1, 1, 1]} : vector<2x28x128xf32> to vector<2x16x128xf32>
    %36 = vector.extract_strided_slice %32 {offsets = [0, 3, 0], sizes = [2, 16, 128], strides = [1, 1, 1]} : vector<2x28x128xf32> to vector<2x16x128xf32>
    %37 = vector.extract_strided_slice %32 {offsets = [0, 4, 0], sizes = [2, 16, 128], strides = [1, 1, 1]} : vector<2x28x128xf32> to vector<2x16x128xf32>
    %38 = vector.extract_strided_slice %32 {offsets = [0, 5, 0], sizes = [2, 16, 128], strides = [1, 1, 1]} : vector<2x28x128xf32> to vector<2x16x128xf32>
    %39 = vector.extract_strided_slice %32 {offsets = [0, 6, 0], sizes = [2, 16, 128], strides = [1, 1, 1]} : vector<2x28x128xf32> to vector<2x16x128xf32>
    %40 = vector.extract_strided_slice %32 {offsets = [0, 7, 0], sizes = [2, 16, 128], strides = [1, 1, 1]} : vector<2x28x128xf32> to vector<2x16x128xf32>
    %41 = vector.extract_strided_slice %32 {offsets = [0, 8, 0], sizes = [2, 16, 128], strides = [1, 1, 1]} : vector<2x28x128xf32> to vector<2x16x128xf32>
    %42 = vector.extract_strided_slice %32 {offsets = [0, 9, 0], sizes = [2, 16, 128], strides = [1, 1, 1]} : vector<2x28x128xf32> to vector<2x16x128xf32>
    %43 = vector.extract_strided_slice %32 {offsets = [0, 10, 0], sizes = [2, 16, 128], strides = [1, 1, 1]} : vector<2x28x128xf32> to vector<2x16x128xf32>
    %44 = vector.extract_strided_slice %32 {offsets = [0, 11, 0], sizes = [2, 16, 128], strides = [1, 1, 1]} : vector<2x28x128xf32> to vector<2x16x128xf32>
    %45 = vector.extract_strided_slice %32 {offsets = [0, 12, 0], sizes = [2, 16, 128], strides = [1, 1, 1]} : vector<2x28x128xf32> to vector<2x16x128xf32>
    %46 = tpu.concatenate %33, %34, %35, %36, %37, %38, %39, %40, %41, %42, %43, %44, %45 in 2 : vector<2x16x128xf32>, vector<2x16x128xf32>, vector<2x16x128xf32>, vector<2x16x128xf32>, vector<2x16x128xf32>, vector<2x16x128xf32>, vector<2x16x128xf32>, vector<2x16x128xf32>, vector<2x16x128xf32>, vector<2x16x128xf32>, vector<2x16x128xf32>, vector<2x16x128xf32>, vector<2x16x128xf32> -> vector<2x16x1664xf32>
    %47 = vector.shape_cast %46 : vector<2x16x1664xf32> to vector<32x1664xf32>
    %48 = arith.truncf %47 : vector<32x1664xf32> to vector<32x1664xbf16>
    %cst_22 = arith.constant dense<0.000000e+00> : vector<32x128xf32>
    %49 = tpu.matmul %48, %29, %cst_22 {dimension_numbers = #tpu.dot_dimension_numbers<[1], [0], [0], [1], [0, 0, 1, 1], [], []>} : vector<32x1664xbf16>, vector<1664x128xbf16>, vector<32x128xf32> -> vector<32x128xf32>
    %50 = vector.broadcast %30 : f32 to vector<32x128xf32>
    %51 = arith.addf %49, %50 : vector<32x128xf32>
    %52 = vector.shape_cast %51 : vector<32x128xf32> to vector<2x16x128xf32>
    %cst_23 = arith.constant 0.000000e+00 : f32
    %53 = vector.broadcast %cst_23 : f32 to vector<2x16x128xf32>
    %54 = arith.maximumf %52, %53 : vector<2x16x128xf32>
    %c1_24 = arith.constant 1 : index
    %c0_25 = arith.constant 0 : index
    %c0_26 = arith.constant 0 : index
    %55 = vector.load %arg3[%c1_24, %c0_25, %c0_26] : memref<2x1664x128xbf16, #tpu.memory_space<vmem>>, vector<1x1664x128xbf16>
    %56 = vector.shape_cast %55 : vector<1x1664x128xbf16> to vector<1664x128xbf16>
    %c2_27 = arith.constant 2 : index
    %57 = memref.load %arg2[%c2_27] : memref<3xf32, #tpu.memory_space<smem>>
    %cst_28 = arith.constant 0.000000e+00 : f32
    %58 = vector.broadcast %cst_28 : f32 to vector<2x6x128xf32>
    %59 = tpu.concatenate %58, %54, %58 in 1 : vector<2x6x128xf32>, vector<2x16x128xf32>, vector<2x6x128xf32> -> vector<2x28x128xf32>
    %60 = vector.extract_strided_slice %59 {offsets = [0, 0, 0], sizes = [2, 16, 128], strides = [1, 1, 1]} : vector<2x28x128xf32> to vector<2x16x128xf32>
    %61 = vector.extract_strided_slice %59 {offsets = [0, 1, 0], sizes = [2, 16, 128], strides = [1, 1, 1]} : vector<2x28x128xf32> to vector<2x16x128xf32>
    %62 = vector.extract_strided_slice %59 {offsets = [0, 2, 0], sizes = [2, 16, 128], strides = [1, 1, 1]} : vector<2x28x128xf32> to vector<2x16x128xf32>
    %63 = vector.extract_strided_slice %59 {offsets = [0, 3, 0], sizes = [2, 16, 128], strides = [1, 1, 1]} : vector<2x28x128xf32> to vector<2x16x128xf32>
    %64 = vector.extract_strided_slice %59 {offsets = [0, 4, 0], sizes = [2, 16, 128], strides = [1, 1, 1]} : vector<2x28x128xf32> to vector<2x16x128xf32>
    %65 = vector.extract_strided_slice %59 {offsets = [0, 5, 0], sizes = [2, 16, 128], strides = [1, 1, 1]} : vector<2x28x128xf32> to vector<2x16x128xf32>
    %66 = vector.extract_strided_slice %59 {offsets = [0, 6, 0], sizes = [2, 16, 128], strides = [1, 1, 1]} : vector<2x28x128xf32> to vector<2x16x128xf32>
    %67 = vector.extract_strided_slice %59 {offsets = [0, 7, 0], sizes = [2, 16, 128], strides = [1, 1, 1]} : vector<2x28x128xf32> to vector<2x16x128xf32>
    %68 = vector.extract_strided_slice %59 {offsets = [0, 8, 0], sizes = [2, 16, 128], strides = [1, 1, 1]} : vector<2x28x128xf32> to vector<2x16x128xf32>
    %69 = vector.extract_strided_slice %59 {offsets = [0, 9, 0], sizes = [2, 16, 128], strides = [1, 1, 1]} : vector<2x28x128xf32> to vector<2x16x128xf32>
    %70 = vector.extract_strided_slice %59 {offsets = [0, 10, 0], sizes = [2, 16, 128], strides = [1, 1, 1]} : vector<2x28x128xf32> to vector<2x16x128xf32>
    %71 = vector.extract_strided_slice %59 {offsets = [0, 11, 0], sizes = [2, 16, 128], strides = [1, 1, 1]} : vector<2x28x128xf32> to vector<2x16x128xf32>
    %72 = vector.extract_strided_slice %59 {offsets = [0, 12, 0], sizes = [2, 16, 128], strides = [1, 1, 1]} : vector<2x28x128xf32> to vector<2x16x128xf32>
    %73 = tpu.concatenate %60, %61, %62, %63, %64, %65, %66, %67, %68, %69, %70, %71, %72 in 2 : vector<2x16x128xf32>, vector<2x16x128xf32>, vector<2x16x128xf32>, vector<2x16x128xf32>, vector<2x16x128xf32>, vector<2x16x128xf32>, vector<2x16x128xf32>, vector<2x16x128xf32>, vector<2x16x128xf32>, vector<2x16x128xf32>, vector<2x16x128xf32>, vector<2x16x128xf32>, vector<2x16x128xf32> -> vector<2x16x1664xf32>
    %74 = vector.shape_cast %73 : vector<2x16x1664xf32> to vector<32x1664xf32>
    %75 = arith.truncf %74 : vector<32x1664xf32> to vector<32x1664xbf16>
    %cst_29 = arith.constant dense<0.000000e+00> : vector<32x128xf32>
    %76 = tpu.matmul %75, %56, %cst_29 {dimension_numbers = #tpu.dot_dimension_numbers<[1], [0], [0], [1], [0, 0, 1, 1], [], []>} : vector<32x1664xbf16>, vector<1664x128xbf16>, vector<32x128xf32> -> vector<32x128xf32>
    %77 = vector.broadcast %57 : f32 to vector<32x128xf32>
    %78 = arith.addf %76, %77 : vector<32x128xf32>
    %79 = vector.shape_cast %78 : vector<32x128xf32> to vector<2x16x128xf32>
    %cst_30 = arith.constant 0.000000e+00 : f32
    %80 = vector.broadcast %cst_30 : f32 to vector<2x16x128xf32>
    %81 = arith.subf %80, %79 : vector<2x16x128xf32>
    %82 = math.exp %81 : vector<2x16x128xf32>
    %cst_31 = arith.constant 1.000000e+00 : f32
    %83 = vector.broadcast %cst_31 : f32 to vector<2x16x128xf32>
    %84 = arith.addf %83, %82 : vector<2x16x128xf32>
    %85 = tpu.reciprocal %84 {approx = true} : vector<2x16x128xf32> -> vector<2x16x128xf32>
    %c0_32 = arith.constant 0 : index
    %c0_33 = arith.constant 0 : index
    %c0_34 = arith.constant 0 : index
    %86 = vector.load %arg5[%c0_32, %c0_33, %c0_34] : memref<2x16x128xf32, #tpu.memory_space<vmem>>, vector<2x16x128xf32>
    tpu.vector_store %arg5[%c0_32, %c0_33, %c0_34], %85 {strides = array<i32>} : memref<2x16x128xf32, #tpu.memory_space<vmem>>, vector<2x16x128xf32>,
    return
  }
  func.func @transform_0(%arg0: i32) -> i32 {
    %c0_i32 = arith.constant 0 : i32
    %c0_i32_0 = arith.constant 0 : i32
    return %c0_i32 : i32
  }
  func.func @transform_1(%arg0: i32) -> i32 {
    %c0_i32 = arith.constant 0 : i32
    %c0_i32_0 = arith.constant 0 : i32
    return %c0_i32 : i32
  }
  func.func @transform_2(%arg0: i32) -> (i32, i32, i32) {
    %c0_i32 = arith.constant 0 : i32
    %c0_i32_0 = arith.constant 0 : i32
    %c0_i32_1 = arith.constant 0 : i32
    %c0_i32_2 = arith.constant 0 : i32
    return %c0_i32, %c0_i32_0, %c0_i32_1 : i32, i32, i32
  }
  func.func @transform_3(%arg0: i32) -> (i32, i32, i32, i32) {
    %c0_i32 = arith.constant 0 : i32
    %c0_i32_0 = arith.constant 0 : i32
    %c0_i32_1 = arith.constant 0 : i32
    %c0_i32_2 = arith.constant 0 : i32
    return %arg0, %c0_i32, %c0_i32_0, %c0_i32_1 : i32, i32, i32, i32
  }
  func.func @transform_4(%arg0: i32) -> (i32, i32, i32) {
    %c0_i32 = arith.constant 0 : i32
    %c0_i32_0 = arith.constant 0 : i32
    %c0_i32_1 = arith.constant 0 : i32
    return %arg0, %c0_i32, %c0_i32_0 : i32, i32, i32
  }
}

</mosaic_0001>

<bundles_post_ra>
// kernel: tpu_custom_call.1
= control target key start
LH: loop header
LB: loop body
LE: loop exit
PB: predicated region body
PF: predicated region fallthrough
CT: control target
= control target key end

     0   :  { %9 = vsyncpa [#allocation5], 0  ;;  %s5154_s0 = inlined_call_operand.hbm [shape: f32[4], index: 0, kind: input, shape index: {}]   ;;  %s5155_s1 = inlined_call_operand.vmem [shape: f32[3], index: 1, kind: input, shape index: {}]   ;;  %s5156_s2 = inlined_call_operand.hbm [shape: bf16[2,1664,128], index: 2, kind: input, shape index: {}]   ;;  %s5157_s3 = inlined_call_operand.hbm [shape: f32[4,4,16,128], index: 3, kind: input, shape index: {}]   ;;  %s5158_s4 = inlined_call_operand.hbm [shape: f32[4,16,128], index: 4, kind: output, shape index: {}]  }
   0x1   :  { %10 = vsyncpa [#allocation6], 0 }
   0x2   :  { %11 = vsyncpa [#allocation3], 0 }
   0x3   :  { %12 = vsyncpa [#allocation10], 0 }
   0x4   :  { %14 = vsyncpa [#allocation10 + $0x1], 0 }
   0x5   :  { %15 = vsyncpa [#allocation4], 0 }
   0x6   :  { %17 = vsyncpa [#allocation4 + $0x1], 0  ;;  %s4360_s15 = smov 0   ;;  %s4362_s16 = smov 0  }
   0x7   :  { %s4364_s17 = smov 0   ;;  %s4366_s18 = smov 0  }
   0x8 LB: > { %s4381_s19 = sadd.s32 4294967295, %s4320_s18   ;;  %s3172_s20 = sadd.s32 4294967294, %s4320_s18   ;;  %s4320_s18 = sphi %s4366_s18, %s5186_s18   ;;  %s4316_s17 = sphi %s4364_s17, %s5185_s17   ;;  %s4312_s16 = sphi %s4362_s16, %s5184_s16   ;;  %s4308_s15 = sphi %s4360_s15, %s5183_s15  }
   0x9   : > { %p106_p0 = scmp.ne.s32.totalorder %s4312_s16, %s4308_s15  ;;  %p5159_p1 = scmp.eq.s32.totalorder %s4381_s19, 0 }
   0xa   : > { %p136_p3 = scmp.eq.s32.totalorder %s3172_s20, 1  ;;  %p3173_p5 = scmp.ge.s32.totalorder %s4320_s18, 1 }
   0xb   : > { %p4390_p4 = por %p5159_p1, %p106_p0  ;;  %p143_p7 = scmp.lt.s32.totalorder %s4320_s18, 3 }
   0xc   : > { %p4395_p6 = por %p136_p3, %p106_p0  ;;  %s165_s26 = sshll.u32 %s5155_s1, 4  ;;  %s166_s26 = int_to_ptr.vmem [resolvable:$true] %s165_s26 }
   0xd   : > { %s5162_s21 = scalar_select %p4390_p4, 1, 0 }
   0xe   : > { %s5163_s22 = scalar_select %p4395_p6, 1, 0 }
   0xf   : > { %p4400_p8 = pnand %p3173_p5, %p143_p7  ;;  %s4322_s28 = smov [#allocation8]  }
  0x10   : > { %s175_s29 = sshll.u32 %s4322_s28, 4  ;;  %s4156_s6 = scalar_lea.hbm %s5154_s0, 16  ;;  %s4416_s29 = int_to_ptr.vmem [resolvable:$true] %s175_s29 }
  0x11   : > { %p3863_p10 = pneg %p4400_p8  ;;  %p4157_p12 = scmp.ne.s32.totalorder %s5154_s0, %s4156_s6 }
  0x12   : > { %p4163_p5 = scmp.lt.u32.totalorder %s4156_s6, %s5154_s0 }
  0x13   : > { %p4412_p11 = pnand %p3863_p10, %p5159_p1 }
  0x15   : > { %p4158_p13 = pneg %p4412_p11 }
  0x17   : > { %p4159_p0 = pnand %p4158_p13, %p4157_p12 }
  0x19   : > { %p4160_p3 = pneg %p4159_p0 }
  0x1b   : > { %p4165_p7 = pnand %p4163_p5, %p4160_p3 }
  0x1d   : > { %4168 = shalt.err (!%p4165_p7)
}
  0x1e   : > { %s4323_s11 = smov [#allocation2]   ;;  %s4169_s14 = scalar_lea.vmem %s166_s26, 16 }
  0x1f   : > { %3866 = dma.hbm_to_smem (!%p4412_p11), %s5154_s0, 16, %s4323_s11, [#allocation5]  }
  0x20   : > { %p4170_p10 = scmp.ne.s32.totalorder %s166_s26, %s4169_s14  ;;  %p4177_p9 = scmp.lt.s32.totalorder %s166_s26, %s166_s26 }
  0x21   : > { %p4178_p1 = scmp.lt.s32.totalorder %s4169_s14, %s4169_s14 }
  0x22   : > { %p4172_p12 = pnand %p4170_p10, %p4158_p13 }
  0x23   : > { %p4179_p2 = por %p4178_p1, %p4177_p9 }
  0x24   : > { %p4173_p0 = pneg %p4172_p12 }
  0x26   : > { %p4180_p6 = pnand %p4179_p2, %p4173_p0 }
  0x28   : > { %4183 = shalt.err (!%p4180_p6)
}
  0x29   : > { %s4324_s20 = smov [#allocation7]   ;;  %s4184_s28 = scalar_lea.hbm %s5156_s2, 26624 }
  0x2a   : > { %3869 = dma.vmem_to_smem (!%p4412_p11), %s166_s26, 16, %s4324_s20, [#allocation6]  }
  0x2b   : > { %p4185_p3 = scmp.ne.s32.totalorder %s5156_s2, %s4184_s28  ;;  %p4191_p1 = scmp.lt.u32.totalorder %s4184_s28, %s5156_s2 }
  0x2d   : > { %p4187_p5 = pnand %p4185_p3, %p4158_p13 }
  0x2f   : > { %p4188_p7 = pneg %p4187_p5 }
  0x31   : > { %p4193_p2 = pnand %p4191_p1, %p4188_p7 }
  0x33   : > { %4196 = shalt.err (!%p4193_p2)
}
  0x34   : > { %s4197_s26 = scalar_lea.vmem %s4416_s29, 26624  ;;  %p4205_p12 = scmp.lt.s32.totalorder %s4416_s29, %s4416_s29 }
  0x35   : > { %p4198_p6 = scmp.ne.s32.totalorder %s4416_s29, %s4197_s26  ;;  %p4206_p0 = scmp.lt.s32.totalorder %s4197_s26, %s4197_s26 }
  0x37   : > { %p4200_p9 = pnand %p4198_p6, %p4158_p13  ;;  %p4207_p3 = por %p4206_p0, %p4205_p12 }
  0x39   : > { %p4201_p10 = pneg %p4200_p9 }
  0x3b   : > { %p4208_p5 = pnand %p4207_p3, %p4201_p10 }
  0x3d   : > { %4211 = shalt.err (!%p4208_p5)
}
  0x3e   : > { %s4325_s8 = smov 64   ;;  %s4326_s9 = smov 4  }
  0x3f   : > { %3872 = dma.hbm_to_vmem [thread:$0]  (!%p4412_p11), %s5156_s2, 26624, %s4416_s29, [#allocation3], %s4325_s8, %s4325_s8, %s4326_s9  }
  0x40   : > { %s4468_s12 = sadd.s32 1, %s4320_s18   ;;  %s93_s14 = sadd.s32 1, %s4316_s17 }
  0x41   : > { %s90_s13 = ssub.s32 %s4320_s18, %s4468_s12  ;;  %p100_p7 = scmp.ne.s32.totalorder %s4316_s17, %s4312_s16 }
  0x42   : > { %p91_p13 = scmp.eq.s32.totalorder %s90_s13, 0  ;;  %p101_p1 = scmp.eq.s32.totalorder %s4320_s18, 0 }
  0x43   : > { %p3884_p2 = scmp.lt.s32.totalorder %s4320_s18, 2  ;;  %p5166_p9 = scmp.eq.s32.totalorder %s4381_s19, 1 }
  0x44   : > { %s4478_s20 = scalar_select %p91_p13, %s4316_s17, %s93_s14  }
  0x45   : > { %p102_p6 = por %p101_p1, %p100_p7  ;;  %p4482_p10 = por %p5166_p9, %p100_p7 }
  0x46   : > { %s189_s27 = sand.u32 1, %s4316_s17   ;;  %s3448_s25 = sshll.u32 %s4320_s18, 11 }
  0x47   : > { %s5167_s24 = scalar_select %p4482_p10, 1, 0 }
  0x48   : > { %s3178_s29 = sshll.u32 %s189_s27, 7  ;;  %s4491_s5 = scalar_lea.hbm %s5157_s3, %s3448_s25 }
  0x49   : > { %s193_s6 = scalar_lea.vmem [#allocation9], %s3178_s29  ;;  %p4493_p11 = pnand %p3884_p2, %p102_p6 }
  0x4a   : > { %s201_s7 = sshll.u32 %s193_s6, 4  ;;  %s4499_s8 = scalar_lea.sflag [#allocation10], %s189_s27  ;;  %s4497_s7 = int_to_ptr.vmem [resolvable:$true] %s201_s7 }
  0x4b   : > { %s4212_s9 = scalar_lea.hbm %s4491_s5, 2048  ;;  %p4214_p0 = pneg %p4493_p11 }
  0x4c   : > { %p4213_p12 = scmp.ne.s32.totalorder %s4491_s5, %s4212_s9  ;;  %s4217_s13 = scalar_lea.hbm %s5157_s3, 4096 }
  0x4d   : > { %p4218_p13 = scmp.lt.u32.totalorder %s4491_s5, %s5157_s3  ;;  %p4219_p7 = scmp.lt.u32.totalorder %s4217_s13, %s4212_s9 }
  0x4e   : > { %p4215_p3 = pnand %p4214_p0, %p4213_p12  ;;  %p4221_p2 = scmp.lt.u32.totalorder %s4212_s9, %s4491_s5 }
  0x4f   : > { %p4220_p1 = por %p4219_p7, %p4218_p13 }
  0x50   : > { %p4216_p5 = pneg %p4215_p3 }
  0x51   : > { %p4222_p6 = por %p4221_p2, %p4220_p1 }
  0x53   : > { %p4223_p9 = pnand %p4222_p6, %p4216_p5 }
  0x55   : > { %4226 = shalt.err (!%p4223_p9)
}
  0x56   : > { %s4227_s27 = scalar_lea.vmem %s4497_s7, 2048  ;;  %s4327_s29 = smov [#allocation9]  }
  0x57   : > { %p4228_p12 = scmp.ne.s32.totalorder %s4497_s7, %s4227_s27  ;;  %s4232_s28 = sshll.u32 %s4327_s29, 4  ;;  %s4233_s28 = int_to_ptr.vmem [resolvable:$false] %s4232_s28 }
  0x58   : > { %s4234_s30 = scalar_lea.vmem %s4233_s28, 4096  ;;  %p4235_p4 = scmp.lt.s32.totalorder %s4497_s7, %s4233_s28 }
  0x59   : > { %p4230_p3 = pnand %p4228_p12, %p4214_p0  ;;  %p4236_p13 = scmp.lt.s32.totalorder %s4234_s30, %s4227_s27 }
  0x5b   : > { %p4231_p10 = pneg %p4230_p3  ;;  %p4237_p7 = por %p4236_p13, %p4235_p4 }
  0x5d   : > { %p4238_p1 = pnand %p4237_p7, %p4231_p10 }
  0x5f   : > { %4241 = shalt.err (!%p4238_p1)
}
  0x60   : > { %s4328_s6 = smov 128   ;;  %s4329_s9 = smov 8  }
  0x61   : > { %3876 = dma.hbm_to_vmem [thread:$0]  (!%p4493_p11), %s4491_s5, 2048, %s4497_s7, %s4499_s8, %s4328_s6, %s4328_s6, %s4329_s9  }
  0x62   : > { %213 = sbr.rel (%p4400_p8) target bundleno = 833 (0x341), region = 36  ;;  %p5169_p0 = scmp.eq.s32.totalorder (!%p4400_p8), %s4381_s19, 0 }
  0x69   : > { %4287 = dma.done.wait (%p5169_p0), [#allocation5], 16   ;;  %p5170_p5 = pmov %p5169_p0 }
  0x6a   : > { %p5171_p4 = pmov %p5169_p0 }
  0x6b   : > { %4289 = vsyncadd (%p5170_p5), [#allocation5], 4294967280 }
  0x6c   : > { %4291 = dma.done.wait (%p5171_p4), [#allocation6], 16   ;;  %p5172_p10 = pmov %p5169_p0 }
  0x6d   : > { %p5173_p2 = pmov %p5169_p0 }
  0x6e   : > { %4293 = vsyncadd (%p5172_p10), [#allocation6], 4294967280 }
  0x6f   : > { %4295 = dma.done.wait (%p5173_p2), [#allocation3], 26624   ;;  %p5174_p11 = pmov %p5169_p0 }
  0x70   : > { %s4542_s23 = sand.u32 1, %s4312_s16   ;;  %p5175_p8 = scmp.ne.s32.totalorder %s5162_s21, 0 }
  0x71   : > { %4297 = vsyncadd (%p5174_p11), [#allocation3], 4294940672  ;;  %s3186_s5 = sshll.u32 %s4542_s23, 7  ;;  %s228_s7 = scalar_lea.sflag [#allocation10], %s4542_s23 }
  0x72   : > { %s4546_s26 = scalar_lea.vmem [#allocation9], %s3186_s5 }
  0x73   : > { %4299 = dma.done.wait (%p5175_p8), %s228_s7, 2048  }
  0x74   : > { %4301 = vsyncadd (%p5175_p8), %s228_s7, 4294965248 }
  0x75   : > { %236 = sfence }
  0x76   : > { %v3932_v0 = vld [vmem:[#allocation8 + $0x40] sm:$0xff]   ;;  %v3936_v4 = vld [vmem:[#allocation8 + $0x48] sm:$0xff]   ;;  %v3940_v8 = vld [vmem:[#allocation8 + $0x50] sm:$0xff]   ;;  %s260_s21 = sld [smem:[#allocation2]]  ;;  %s3188_s8 = sld [smem:[#allocation2 + $0x1]]  ;;  %vm538_vm0 = vcmask 1045504  }
  0x77   : > { %v3933_v1 = vld [vmem:[#allocation8] sm:$0xff]   ;;  %3451 = vmatprep.subr.bf16.mxu0 %v3932_v0  ;;  %v3937_v5 = vld [vmem:[#allocation8 + $0x8] sm:$0xff]   ;;  %v3941_v9 = vld [vmem:[#allocation8 + $0x10] sm:$0xff]   ;;  %s3189_s10 = sld [smem:[#allocation2 + $0x2]]  ;;  %s3190_s11 = sld [smem:[#allocation2 + $0x3]]  ;;  %vm559_vm1 = vcmask 1046528  }
  0x78   : > { %v3934_v2 = vld [vmem:[#allocation8 + $0xc0] sm:$0xff]   ;;  %3452 = vmatpush3.bf16.msra.mxu0 %v3933_v1  ;;  %v3938_v6 = vld [vmem:[#allocation8 + $0xc8] sm:$0xff]   ;;  %v3942_v10 = vld [vmem:[#allocation8 + $0xd0] sm:$0xff]   ;;  %s264_s13 = sld [smem:[#allocation7]]  ;;  %vm588_vm3 = vcmask 1044480   ;;  %vm4331_vm4 = vmmov 1  }
  0x79   : > { %v3935_v3 = vld [vmem:[#allocation8 + $0x80] sm:$0xff]   ;;  %3479 = vmatprep.subr.bf16.mxu1 %v3934_v2  ;;  %3453 = vmatprep.subr.bf16.mxu0 %v3936_v4  ;;  %v3939_v7 = vld [vmem:[#allocation8 + $0x88] sm:$0xff]   ;;  %v3943_v11 = vld [vmem:[#allocation8 + $0x90] sm:$0xff]   ;;  %vm618_vm6 = vcmask 1042432   ;;  %vm648_vm7 = vcmask 1040384   ;;  %vm603_vm8 = vcmask 1043456  }
  0x7a   : > { %3480 = vmatpush3.bf16.msra.mxu1 %v3935_v3  ;;  %v3944_v12 = vld [vmem:[#allocation8 + $0x58] sm:$0xff]   ;;  %v3948_v16 = vld [vmem:[#allocation8 + $0x60] sm:$0xff]   ;;  %v3952_v20 = vld [vmem:[#allocation8 + $0x68] sm:$0xff]   ;;  %vm633_vm9 = vcmask 1041408   ;;  %s3203_s14 = sld [smem:[#allocation7 + $0x1]]  ;;  %s3322_s25 = sld [smem:[#allocation7 + $0x2]] }
  0x7b   : > { %3481 = vmatprep.subr.bf16.mxu1 %v3938_v6  ;;  %v3945_v13 = vld [vmem:[#allocation8 + $0x18] sm:$0xff]   ;;  %v3949_v17 = vld [vmem:[#allocation8 + $0x20] sm:$0xff]   ;;  %v3953_v21 = vld [vmem:[#allocation8 + $0x28] sm:$0xff]   ;;  %s3187_s27 = sshll.u32 %s4542_s23, 5  ;;  %s3450_s29 = sshll.u32 %s4381_s19, 9 }
  0x7c   : > { %3454 = vmatpush3.bf16.msra.mxu0 %v3937_v5  ;;  %v3946_v14 = vld [vmem:[#allocation8 + $0xd8] sm:$0xff]   ;;  %v3950_v18 = vld [vmem:[#allocation8 + $0xe0] sm:$0xff]   ;;  %v3954_v22 = vld [vmem:[#allocation8 + $0xe8] sm:$0xff]   ;;  %v4558_v39 = vstv %s260_s21  ;;  %v4560_v40 = vstv %s3188_s8  ;;  %s256_s28 = scalar_lea.vmem [#allocation11], %s3187_s27  ;;  %s5108_s5 = scalar_lea.hbm %s5158_s4, %s3450_s29 }
  0x7d   : > { %3455 = vmatprep.subr.bf16.mxu0 %v3940_v8  ;;  %v3947_v15 = vld [vmem:[#allocation8 + $0x98] sm:$0xff]   ;;  %v3951_v19 = vld [vmem:[#allocation8 + $0xa0] sm:$0xff]   ;;  %v3955_v23 = vld [vmem:[#allocation8 + $0xa8] sm:$0xff]   ;;  %v4569_v48 = vstv %s3189_s10  ;;  %v4572_v50 = vstv %s3190_s11  ;;  %s3063_s30 = sshll.u32 %s256_s28, 4  ;;  %s3049_s19 = scalar_lea.sflag [#allocation4], %s4542_s23  ;;  %s5110_s30 = int_to_ptr.vmem [resolvable:$true] %s3063_s30 }
  0x7e   : > { %3482 = vmatpush3.bf16.msra.mxu1 %v3939_v7  ;;  %v3956_v24 = vld [vmem:[#allocation8 + $0x70] sm:$0xff]   ;;  %v3960_v28 = vld [vmem:[#allocation8 + $0x78] sm:$0xff]   ;;  %v266_v31 = vld [vmem:[%s4546_s26] sm:$0xff]  ;;  %v4567_v47 = vstv %s264_s13  ;;  %s4242_s7 = scalar_lea.vmem %s5110_s30, 512  ;;  %p5180_p9 = scmp.ne.s32.totalorder %s5167_s24, 0 }
  0x7f   : > { %3483 = vmatprep.subr.bf16.mxu1 %v3942_v10  ;;  %v3957_v25 = vld [vmem:[#allocation8 + $0x30] sm:$0xff]   ;;  %v3961_v29 = vld [vmem:[#allocation8 + $0x38] sm:$0xff]   ;;  %v267_v32 = vld [vmem:[%s4546_s26 + $0x8] sm:$0xff]  ;;  %v271_v42 = vmul.f32 %v4558_v39, %v266_v31  ;;  %p4243_p6 = scmp.ne.s32.totalorder %s5110_s30, %s4242_s7 }
  0x80   : > { %3456 = vmatpush3.bf16.msra.mxu0 %v3941_v9  ;;  %v3958_v26 = vld [vmem:[#allocation8 + $0xf0] sm:$0xff]   ;;  %v3962_v30 = vld [vmem:[#allocation8 + $0xf8] sm:$0xff]   ;;  %v3195_v35 = vld [vmem:[%s4546_s26 + $0x20] sm:$0xff]  ;;  %v272_v43 = vmul.f32 %v4558_v39, %v267_v32  ;;  %v4330_v9 = vmov 0.0  }
  0x81   : > { %3457 = vmatprep.subr.bf16.mxu0 %v3944_v12  ;;  %v3959_v27 = vld [vmem:[#allocation8 + $0xb0] sm:$0xff]   ;;  %v3192_v34 = vld [vmem:[%s4546_s26 + $0x18] sm:$0xff]  ;;  %v3196_v36 = vld [vmem:[%s4546_s26 + $0x28] sm:$0xff]  ;;  %v275_v51 = vadd.f32 %v271_v42, %v4567_v47  ;;  %v299_v53 = vmul.f32 %v3195_v35, %v4569_v48  ;;  %v4598_v10 = vrot.slane %v4330_v9, 2  ;;  %p4244_p12 = pnand %p4243_p6, %p5180_p9 }
  0x82   : > { %3484 = vmatpush3.bf16.msra.mxu1 %v3943_v11  ;;  %v3191_v33 = vld [vmem:[%s4546_s26 + $0x10] sm:$0xff]  ;;  %v3963_v37 = vld [vmem:[#allocation8 + $0xb8] sm:$0xff]   ;;  %v3964_v38 = vld [vmem:[#allocation8 + $0x140] sm:$0xff]   ;;  %v286_v45 = vmul.f32 %v3192_v34, %v4560_v40  ;;  %v276_v52 = vadd.f32 %v272_v43, %v4567_v47  ;;  %v300_v54 = vmul.f32 %v3196_v36, %v4569_v48 }
  0x83   : > { %3485 = vmatprep.subr.bf16.mxu1 %v3946_v14  ;;  %v3199_v41 = vld [vmem:[%s4546_s26 + $0x30] sm:$0xff]  ;;  %v285_v44 = vmul.f32 %v3191_v33, %v4560_v40  ;;  %v3966_v46 = vld [vmem:[#allocation8 + $0x1c0] sm:$0xff]   ;;  %v3200_v49 = vld [vmem:[%s4546_s26 + $0x38] sm:$0xff]  ;;  %p4245_p3 = pneg %p4244_p12 }
  0x84   : > { %3458 = vmatpush3.bf16.msra.mxu0 %v3945_v13  ;;  %v290_v56 = vadd.f32 %v286_v45, %v276_v52  ;;  %v313_v57 = vmul.f32 %v3199_v41, %v4572_v50  ;;  %v314_v58 = vmul.f32 %v3200_v49, %v4572_v50  ;;  %vm3308_vm2 = vmneg %vm538_vm0  ;;  %v3970_v31 = vld [vmem:[#allocation8 + $0x1c8] sm:$0xff]   ;;  %v3193_v34 = vld [vmem:[%s4546_s26 + $0x50] sm:$0xff] }
  0x85   : > { %3459 = vmatprep.subr.bf16.mxu0 %v3948_v16  ;;  %v289_v55 = vadd.f32 %v285_v44, %v275_v51  ;;  %vm4601_vm5 = vmpackc.low %vm4331_vm4, %vm3308_vm2  ;;  %v269_v32 = vld [vmem:[%s4546_s26 + $0x48] sm:$0xff]  ;;  %v3194_v35 = vld [vmem:[%s4546_s26 + $0x58] sm:$0xff]  ;;  %v287_v49 = vmul.f32 %v3193_v34, %v4560_v40 }
  0x86   : > { %3486 = vmatpush3.bf16.msra.mxu1 %v3947_v15  ;;  %v304_v60 = vadd.f32 %v300_v54, %v290_v56  ;;  %v3197_v41 = vld [vmem:[%s4546_s26 + $0x60] sm:$0xff]  ;;  %v3198_v42 = vld [vmem:[%s4546_s26 + $0x68] sm:$0xff]  ;;  %v3201_v43 = vld [vmem:[%s4546_s26 + $0x70] sm:$0xff] }
  0x87   : > { %3487 = vmatprep.subr.bf16.mxu1 %v3950_v18  ;;  %v303_v59 = vadd.f32 %v299_v53, %v289_v55  ;;  %v3202_v51 = vld [vmem:[%s4546_s26 + $0x78] sm:$0xff]  ;;  %v3972_v52 = vld [vmem:[#allocation8 + $0x150] sm:$0xff]   ;;  %v301_v54 = vmul.f32 %v3197_v41, %v4569_v48  ;;  %v302_v55 = vmul.f32 %v3198_v42, %v4569_v48  ;;  %v3971_v56 = vld [vmem:[#allocation8 + $0x188] sm:$0xff]  }
  0x88   : > { %3460 = vmatpush3.bf16.msra.mxu0 %v3949_v17  ;;  %v318_v62 = vadd.f32 %v314_v58, %v304_v60  ;;  %v315_v58 = vmul.f32 %v3201_v43, %v4572_v50  ;;  %v3976_v48 = vld [vmem:[#allocation8 + $0x158] sm:$0xff]   ;;  %vm4779_vm10 = vmpackc.low %vm538_vm0, %vm4331_vm4 }
  0x89   : > { %3461 = vmatprep.subr.bf16.mxu0 %v3952_v20  ;;  %v317_v61 = vadd.f32 %v313_v57, %v303_v59  ;;  %v3973_v59 = vld [vmem:[#allocation8 + $0x110] sm:$0xff]  }
  0x8a   : > { %3488 = vmatpush3.bf16.msra.mxu1 %v3951_v19  ;;  %v322_v0 = vmax.f32 %v318_v62, 0.0  ;;  %v3965_v19 = vld [vmem:[#allocation8 + $0x100] sm:$0xff]  }
  0x8b   : > { %3489 = vmatprep.subr.bf16.mxu1 %v3954_v22  ;;  %v321_v63 = vmax.f32 %v317_v61, 0.0  ;;  %v316_v61 = vmul.f32 %v3202_v51, %v4572_v50 }
  0x8c   : > { %3462 = vmatpush3.bf16.msra.mxu0 %v3953_v21  ;;  %v4580_v2 = vrot.slane %v322_v0, 2 }
  0x8d   : > { %3463 = vmatprep.subr.bf16.mxu0 %v3956_v24  ;;  %v539_v1 = vrot.slane %v321_v63, 2  ;;  %v3975_v63 = vld [vmem:[#allocation8 + $0x190] sm:$0xff]  }
  0x8e   : > { %3490 = vmatpush3.bf16.msra.mxu1 %v3955_v23  ;;  %v4592_v5 = vsel %vm538_vm0, %v4580_v2, 0.0 }
  0x8f   : > { %3491 = vmatprep.subr.bf16.mxu1 %v3958_v26  ;;  %v4585_v3 = vsel %vm538_vm0, %v539_v1, %v4580_v2  ;;  %v4588_v4 = vsel %vm538_vm0, 0.0, %v539_v1  ;;  %v563_v8 = vrot.slane %v4592_v5, 1  ;;  %v592_v14 = vrot.slane %v4592_v5, 3 }
  0x90   : > { %3464 = vmatpush3.bf16.msra.mxu0 %v3957_v25  ;;  %v560_v6 = vrot.slane %v4588_v4, 1  ;;  %v561_v7 = vrot.slane %v4585_v3, 1  ;;  %v589_v12 = vrot.slane %v4588_v4, 3  ;;  %v590_v13 = vrot.slane %v4585_v3, 3 }
  0x91   : > { %3465 = vmatprep.subr.bf16.mxu0 %v3960_v28  ;;  %v574_v15 = vrot.slane %v4588_v4, 2  ;;  %v3310_v18 = vpack.c.bf16 %v4585_v3, %v539_v1  ;;  %v575_v20 = vrot.slane %v4585_v3, 2  ;;  %v577_v26 = vrot.slane %v4592_v5, 2  ;;  %v3968_v28 = vld [vmem:[#allocation8 + $0x148] sm:$0xff]   ;;  %v3977_v1 = vld [vmem:[#allocation8 + $0x118] sm:$0xff]  }
  0x92   : > { %3492 = vmatpush3.bf16.msra.mxu1 %v3959_v27  ;;  %v562_v16 = vsel %vm559_vm1, %v560_v6, %v561_v7  ;;  %v4613_v17 = vsel %vm559_vm1, %v561_v7, %v563_v8  ;;  %v591_v22 = vsel %vm588_vm3, %v589_v12, %v590_v13  ;;  %v4622_v23 = vsel %vm588_vm3, %v590_v13, %v592_v14  ;;  %v3967_v27 = vld [vmem:[#allocation8 + $0x180] sm:$0xff]  }
  0x93   : > { %3493 = vmatprep.subr.bf16.mxu1 %v3962_v30  ;;  %v685_v21 = vpack.c.bf16 %v4613_v17, %v562_v16  ;;  %v687_v24 = vpack.c.bf16 %v4622_v23, %v591_v22  ;;  %v576_v25 = vsel %vm538_vm0, %v574_v15, %v575_v20  ;;  %v3969_v30 = vld [vmem:[#allocation8 + $0x108] sm:$0xff]   ;;  %v4635_v36 = vsel %vm538_vm0, %v575_v20, %v577_v26  ;;  %v3978_v15 = vld [vmem:[#allocation8 + $0x1d8] sm:$0xff]  }
  0x94   : > { %3466 = vmatpush3.bf16.msra.mxu0 %v3961_v29  ;;  %v268_v29 = vld [vmem:[%s4546_s26 + $0x40] sm:$0xff]  ;;  %v686_v44 = vpack.c.bf16 %v4635_v36, %v576_v25  ;;  %v3317_v62 = vpack.c.bf16 %v4580_v2, %v4585_v3  ;;  %v619_v7 = vrot.slane %v4588_v4, 5  ;;  %v620_v50 = vrot.slane %v4585_v3, 5  ;;  %s4332_s26 = smov [#allocation11]  }
  0x95   : > { %3507 = vmatprep.subr.bf16.mxu0 %v3964_v38  ;;  %1367 = vmatprep.mubr.bf16.mxu0 %v685_v21  ;;  %v273_v33 = vmul.f32 %v4558_v39, %v268_v29  ;;  %v274_v38 = vmul.f32 %v4558_v39, %v269_v32  ;;  %v288_v39 = vmul.f32 %v3194_v35, %v4560_v40  ;;  %v3974_v40 = vld [vmem:[#allocation8 + $0x1d0] sm:$0xff]   ;;  %v622_v13 = vrot.slane %v4592_v5, 5  ;;  %v3981_v21 = vld [vmem:[#allocation8 + $0x120] sm:$0xff]   ;;  %s4246_s21 = sshll.u32 %s4332_s26, 4  ;;  %s4247_s21 = int_to_ptr.vmem [resolvable:$false] %s4246_s21 }
  0x96   : > { %3494 = vmatpush3.bf16.msra.mxu1 %v3963_v37  ;;  %1416 = vmatprep.mubr.bf16.mxu1 %v687_v24  ;;  %v4639_v37 = vsel %vm538_vm0, %v577_v26, %v4598_v10  ;;  %v3982_v24 = vld [vmem:[#allocation8 + $0x1e0] sm:$0xff]   ;;  %v4665_v26 = vsel %vm618_vm6, %v619_v7, %v620_v50  ;;  %v649_v29 = vrot.slane %v4588_v4, 7  ;;  %s4248_s8 = scalar_lea.vmem %s4247_s21, 1024  ;;  %p4249_p13 = scmp.lt.s32.totalorder %s5110_s30, %s4247_s21 }
  0x97   : > { %3535 = vmatprep.subr.bf16.mxu1 %v3966_v46  ;;  %3311 = vmatmul.mubr.msk.bf16.vlgmr.msra.gmra.mrb[0].mxu0 %vm4601_vm5, %v3310_v18  ;;  %v694_v45 = vpack.c.bf16 %v4639_v37, %v4635_v36  ;;  %v277_v46 = vadd.f32 %v273_v33, %v4567_v47  ;;  %v278_v53 = vadd.f32 %v274_v38, %v4567_v47  ;;  %v3979_v18 = vld [vmem:[#allocation8 + $0x198] sm:$0xff]   ;;  %v3983_v32 = vld [vmem:[#allocation8 + $0x1a0] sm:$0xff]   ;;  %v3984_v33 = vld [vmem:[#allocation8 + $0x168] sm:$0xff]   ;;  %p4250_p7 = scmp.lt.s32.totalorder %s4248_s8, %s4242_s7 }
  0x98   : > { %3508 = vmatpush3.bf16.msra.mxu0 %v3965_v19  ;;  %v3980_v19 = vld [vmem:[#allocation8 + $0x160] sm:$0xff]   ;;  %v4033_v37 = vld [vmem:[#allocation8 + $0x328] sm:$0xff]  }
  0x99   : > { %3509 = vmatprep.subr.bf16.mxu0 %v3968_v28  ;;  %1417 = vmatmul.mubr.bf16.vlgmr.msra.gmra.mrb[0].mxu1 %v686_v44  ;;  %v291_v57 = vadd.f32 %v287_v49, %v277_v46  ;;  %v292_v60 = vadd.f32 %v288_v39, %v278_v53  ;;  %v3985_v44 = vld [vmem:[#allocation8 + $0x128] sm:$0xff]   ;;  %v4032_v36 = vld [vmem:[#allocation8 + $0x320] sm:$0xff]   ;;  %p4251_p1 = por %p4250_p7, %p4249_p13 }
  0x9a   : > { %3536 = vmatpush3.bf16.msra.mxu1 %v3967_v27  ;;  %v4668_v27 = vsel %vm618_vm6, %v620_v50, %v622_v13  ;;  %v605_v50 = vrot.slane %v4585_v3, 4  ;;  %v3990_v13 = vld [vmem:[#allocation8 + $0x1f0] sm:$0xff]  }
  0x9b   : > { %3537 = vmatprep.subr.bf16.mxu1 %v3970_v31  ;;  %v305_v47 = vadd.f32 %v301_v54, %v291_v57  ;;  %v306_v0 = vadd.f32 %v302_v55, %v292_v60  ;;  %v652_v31 = vrot.slane %v4592_v5, 7  ;;  %v689_v7 = vpack.c.bf16 %v4668_v27, %v4665_v26  ;;  %p4252_p0 = pnand %p4251_p1, %p4245_p3 }
  0x9c   : > { %3510 = vmatpush3.bf16.msra.mxu0 %v3969_v30  ;;  %v650_v30 = vrot.slane %v4585_v3, 7 }
  0x9d   : > { %3511 = vmatprep.subr.bf16.mxu0 %v3972_v52  ;;  %v319_v6 = vadd.f32 %v315_v58, %v305_v47  ;;  %v320_v12 = vadd.f32 %v316_v61, %v306_v0 }
  0x9e   : > { %3538 = vmatpush3.bf16.msra.mxu1 %v3971_v56  ;;  %v3986_v56 = vld [vmem:[#allocation8 + $0x1e8] sm:$0xff]   ;;  %v653_v0 = vsel %vm648_vm7, %v650_v30, %v652_v31  ;;  %v3994_v31 = vld [vmem:[#allocation8 + $0x1f8] sm:$0xff]  }
  0x9f   : > { %3539 = vmatprep.subr.bf16.mxu1 %v3974_v40  ;;  %v323_v16 = vmax.f32 %v319_v6, 0.0  ;;  %v324_v20 = vmax.f32 %v320_v12, 0.0  ;;  %v3989_v6 = vld [vmem:[#allocation8 + $0x130] sm:$0xff]   ;;  %v604_v12 = vrot.slane %v4588_v4, 4 }
  0xa0   : > { %3512 = vmatpush3.bf16.msra.mxu0 %v3973_v59 }
  0xa1   : > { %3513 = vmatprep.subr.bf16.mxu0 %v3976_v48  ;;  %v542_v22 = vrot.slane %v323_v16, 2  ;;  %v4662_v25 = vrot.slane %v324_v20, 2  ;;  %v651_v48 = vsel %vm648_vm7, %v649_v29, %v650_v30  ;;  %v3991_v16 = vld [vmem:[#allocation8 + $0x1b0] sm:$0xff]   ;;  %v3993_v20 = vld [vmem:[#allocation8 + $0x138] sm:$0xff]   ;;  %v606_v27 = vsel %vm603_vm8, %v604_v12, %v605_v50 }
  0xa2   : > { %3540 = vmatpush3.bf16.msra.mxu1 %v3975_v63  ;;  %v3988_v63 = vld [vmem:[#allocation8 + $0x170] sm:$0xff]   ;;  %v635_v29 = vrot.slane %v4585_v3, 6  ;;  %v637_v30 = vrot.slane %v4592_v5, 6 }
  0xa3   : > { %3541 = vmatprep.subr.bf16.mxu1 %v3978_v15  ;;  %v4671_v28 = vsel %vm538_vm0, 0.0, %v542_v22  ;;  %v4678_v34 = vsel %vm538_vm0, %v542_v22, %v4662_v25  ;;  %v4682_v35 = vsel %vm538_vm0, %v4662_v25, 0.0  ;;  %v607_v15 = vrot.slane %v4592_v5, 4 }
  0xa4   : > { %3514 = vmatpush3.bf16.msra.mxu0 %v3977_v1  ;;  %v565_v38 = vrot.slane %v4671_v28, 1  ;;  %v594_v41 = vrot.slane %v4671_v28, 3  ;;  %v566_v42 = vrot.slane %v4678_v34, 1  ;;  %v568_v43 = vrot.slane %v4682_v35, 1  ;;  %v3987_v1 = vld [vmem:[#allocation8 + $0x1a8] sm:$0xff]  }
  0xa5   : > { %3515 = vmatprep.subr.bf16.mxu0 %v3980_v19  ;;  %v3314_v46 = vpack.c.bf16 %v4678_v34, %v542_v22  ;;  %v595_v49 = vrot.slane %v4678_v34, 3  ;;  %v597_v51 = vrot.slane %v4682_v35, 3  ;;  %v579_v52 = vrot.slane %v4671_v28, 2 }
  0xa6   : > { %3542 = vmatpush3.bf16.msra.mxu1 %v3979_v18  ;;  %v580_v53 = vrot.slane %v4678_v34, 2  ;;  %v582_v39 = vrot.slane %v4682_v35, 2  ;;  %v567_v54 = vsel %vm559_vm1, %v565_v38, %v566_v42  ;;  %v4698_v55 = vsel %vm559_vm1, %v566_v42, %v568_v43  ;;  %v3992_v18 = vld [vmem:[#allocation8 + $0x178] sm:$0xff]   ;;  %v3996_v42 = vld [vmem:[#allocation8 + $0x240] sm:$0xff]  }
  0xa7   : > { %3543 = vmatprep.subr.bf16.mxu1 %v3982_v24  ;;  %v596_v57 = vsel %vm588_vm3, %v594_v41, %v595_v49  ;;  %v698_v58 = vpack.c.bf16 %v4698_v55, %v567_v54  ;;  %v4705_v59 = vsel %vm588_vm3, %v595_v49, %v597_v51  ;;  %v691_v19 = vpack.c.bf16 %v653_v0, %v651_v48  ;;  %v3995_v41 = vld [vmem:[#allocation8 + $0x1b8] sm:$0xff]   ;;  %v3999_v48 = vld [vmem:[#allocation8 + $0x280] sm:$0xff]   ;;  %v4000_v0 = vld [vmem:[#allocation8 + $0x248] sm:$0xff]  }
  0xa8   : > { %3516 = vmatpush3.bf16.msra.mxu0 %v3981_v21  ;;  %v581_v60 = vsel %vm538_vm0, %v579_v52, %v580_v53  ;;  %v4711_v61 = vsel %vm538_vm0, %v580_v53, %v582_v39  ;;  %v700_v40 = vpack.c.bf16 %v4705_v59, %v596_v57  ;;  %v634_v21 = vrot.slane %v4588_v4, 6 }
  0xa9   : > { %3517 = vmatprep.subr.bf16.mxu0 %v3984_v33  ;;  %v699_v47 = vpack.c.bf16 %v4711_v61, %v581_v60  ;;  %1375 = vmatprep.mubr.bf16.mxu0 %v698_v58  ;;  %v624_v22 = vrot.slane %v4671_v28, 5  ;;  %v625_v24 = vrot.slane %v4678_v34, 5  ;;  %v627_v26 = vrot.slane %v4682_v35, 5 }
  0xaa   : > { %3544 = vmatpush3.bf16.msra.mxu1 %v3983_v32  ;;  %3315 = vmatmul.mubr.msk.bf16.gmra.mrb[4].mxu0 %vm4601_vm5, %v3314_v46  ;;  %v4734_v4 = vsel %vm603_vm8, %v605_v50, %v607_v15  ;;  %v654_v32 = vrot.slane %v4671_v28, 7  ;;  %v655_v33 = vrot.slane %v4678_v34, 7  ;;  %v657_v38 = vrot.slane %v4682_v35, 7 }
  0xab   : > { %3545 = vmatprep.subr.bf16.mxu1 %v3986_v56  ;;  %1424 = vmatprep.mubr.bf16.mxu1 %v700_v40  ;;  %v626_v46 = vsel %vm618_vm6, %v624_v22, %v625_v24  ;;  %v628_v49 = vsel %vm618_vm6, %v625_v24, %v627_v26  ;;  %v688_v52 = vpack.c.bf16 %v4734_v4, %v606_v27  ;;  %v3998_v56 = vld [vmem:[#allocation8 + $0x2c0] sm:$0xff]   ;;  %v609_v57 = vrot.slane %v4671_v28, 4  ;;  %v4003_v24 = vld [vmem:[#allocation8 + $0x288] sm:$0xff]   ;;  %v4005_v27 = vld [vmem:[#allocation8 + $0x210] sm:$0xff]  }
  0xac   : > { %3518 = vmatpush3.bf16.msra.mxu0 %v3985_v44  ;;  %1425 = vmatmul.mubr.bf16.gmra.mrb[4].mxu1 %v699_v47  ;;  %v3997_v44 = vld [vmem:[#allocation8 + $0x200] sm:$0xff]   ;;  %v636_v53 = vsel %vm633_vm9, %v634_v21, %v635_v29  ;;  %v638_v54 = vsel %vm633_vm9, %v635_v29, %v637_v30  ;;  %v610_v58 = vrot.slane %v4678_v34, 4  ;;  %v612_v60 = vrot.slane %v4682_v35, 4 }
  0xad   : > { %3519 = vmatprep.subr.bf16.mxu0 %v3988_v63  ;;  %1465 = vmatprep.mubr.bf16.mxu0 %v689_v7  ;;  %v656_v40 = vsel %vm648_vm7, %v654_v32, %v655_v33  ;;  %v658_v47 = vsel %vm648_vm7, %v655_v33, %v657_v38  ;;  %v4750_v63 = vrot.slane %v4330_v9, 1  ;;  %v4001_v7 = vld [vmem:[#allocation8 + $0x208] sm:$0xff]   ;;  %v639_v12 = vrot.slane %v4671_v28, 6  ;;  %v4004_v28 = vld [vmem:[#allocation8 + $0x250] sm:$0xff]   ;;  %v4008_v33 = vld [vmem:[#allocation8 + $0x258] sm:$0xff]  }
  0xae   : > { %3546 = vmatpush3.bf16.msra.mxu1 %v3987_v1  ;;  %1514 = vmatprep.mubr.bf16.mxu1 %v691_v19  ;;  %v702_v1 = vpack.c.bf16 %v628_v49, %v626_v46  ;;  %v704_v50 = vpack.c.bf16 %v658_v47, %v656_v40  ;;  %v4002_v19 = vld [vmem:[#allocation8 + $0x2c8] sm:$0xff]   ;;  %v4762_v21 = vsel %vm603_vm8, %v610_v58, %v612_v60  ;;  %v4006_v32 = vld [vmem:[#allocation8 + $0x2d0] sm:$0xff]   ;;  %v4010_v46 = vld [vmem:[#allocation8 + $0x2d8] sm:$0xff]  }
  0xaf   : > { %3547 = vmatprep.subr.bf16.mxu1 %v3990_v13  ;;  %v640_v13 = vrot.slane %v4678_v34, 6  ;;  %v665_v22 = vsel %vm559_vm1, %v563_v8, %v4750_v63  ;;  %v4012_v49 = vld [vmem:[#allocation8 + $0x260] sm:$0xff]   ;;  %v4021_v40 = vld [vmem:[#allocation8 + $0x230] sm:$0xff]   ;;  %v3320_v2 = vpack.c.bf16 %v4662_v25, %v4678_v34  ;;  %v671_v3 = vsel %vm538_vm0, %v582_v39, %v4598_v10  ;;  %v4035_v25 = vld [vmem:[#allocation8 + $0x338] sm:$0xff]  }
  0xb0   : > { %3520 = vmatpush3.bf16.msra.mxu0 %v3989_v6  ;;  %v690_v6 = vpack.c.bf16 %v638_v54, %v636_v53  ;;  %v693_v8 = vpack.c.bf16 %v665_v22, %v4613_v17  ;;  %v4014_v17 = vld [vmem:[#allocation8 + $0x2e0] sm:$0xff]   ;;  %v4016_v53 = vld [vmem:[#allocation8 + $0x268] sm:$0xff]   ;;  %v707_v5 = vpack.c.bf16 %v671_v3, %v4711_v61  ;;  %v4139_v47 = vld [vmem:[#allocation8 + $0x678] sm:$0xff]  }
  0xb1   : > { %3521 = vmatprep.subr.bf16.mxu0 %v3992_v18  ;;  %v4756_v18 = vrot.slane %v4330_v9, 3  ;;  %v641_v29 = vsel %vm633_vm9, %v639_v12, %v640_v13  ;;  %v4017_v54 = vld [vmem:[#allocation8 + $0x228] sm:$0xff]   ;;  %v4026_v12 = vld [vmem:[#allocation8 + $0x2f8] sm:$0xff]   ;;  %v4037_v61 = vld [vmem:[#allocation8 + $0x400] sm:$0xff]  }
  0xb2   : > { %3548 = vmatpush3.bf16.msra.mxu1 %v3991_v16  ;;  %v642_v16 = vrot.slane %v4682_v35, 6  ;;  %v4040_v22 = vld [vmem:[#allocation8 + $0x388] sm:$0xff]  }
  0xb3   : > { %3549 = vmatprep.subr.bf16.mxu1 %v3994_v31  ;;  %v675_v31 = vsel %vm588_vm3, %v592_v14, %v4756_v18  ;;  %v4011_v14 = vld [vmem:[#allocation8 + $0x298] sm:$0xff]   ;;  %v4043_v35 = vld [vmem:[#allocation8 + $0x3c8] sm:$0xff]  }
  0xb4   : > { %3522 = vmatpush3.bf16.msra.mxu0 %v3993_v20  ;;  %v611_v20 = vsel %vm603_vm8, %v609_v57, %v610_v58  ;;  %v643_v30 = vsel %vm633_vm9, %v640_v13, %v642_v16  ;;  %v4020_v57 = vld [vmem:[#allocation8 + $0x270] sm:$0xff]   ;;  %v4019_v58 = vld [vmem:[#allocation8 + $0x2a8] sm:$0xff]   ;;  %v4027_v13 = vld [vmem:[#allocation8 + $0x2b8] sm:$0xff]   ;;  %v666_v16 = vsel %vm559_vm1, %v568_v43, %v4750_v63 }
  0xb5   : > { %3563 = vmatprep.subr.bf16.mxu0 %v3996_v42  ;;  %v701_v26 = vpack.c.bf16 %v4762_v21, %v611_v20  ;;  %v703_v38 = vpack.c.bf16 %v643_v30, %v641_v29  ;;  %v695_v42 = vpack.c.bf16 %v675_v31, %v4622_v23  ;;  %v4015_v23 = vld [vmem:[#allocation8 + $0x2a0] sm:$0xff]   ;;  %v676_v20 = vsel %vm588_vm3, %v597_v51, %v4756_v18  ;;  %v4030_v43 = vld [vmem:[#allocation8 + $0x310] sm:$0xff]   ;;  %v4048_v30 = vld [vmem:[#allocation8 + $0x398] sm:$0xff]  }
  0xb6   : > { %3550 = vmatpush3.bf16.msra.mxu1 %v3995_v41  ;;  %v4007_v41 = vld [vmem:[#allocation8 + $0x290] sm:$0xff]   ;;  %v4049_v31 = vld [vmem:[#allocation8 + $0x418] sm:$0xff]  }
  0xb7   : > { %1466 = vmatmul.mubr.bf16.vlgmr.msra.gmra.mrb[8].mxu0 %v688_v52  ;;  %3591 = vmatprep.subr.bf16.mxu1 %v3998_v56  ;;  %v4013_v52 = vld [vmem:[#allocation8 + $0x220] sm:$0xff]   ;;  %v4018_v56 = vld [vmem:[#allocation8 + $0x2e8] sm:$0xff]   ;;  %v4047_v29 = vld [vmem:[#allocation8 + $0x3d0] sm:$0xff]  }
  0xb8   : > { %3564 = vmatpush3.bf16.msra.mxu0 %v3997_v44  ;;  %1473 = vmatprep.mubr.bf16.mxu0 %v702_v1  ;;  %v4009_v44 = vld [vmem:[#allocation8 + $0x218] sm:$0xff]   ;;  %v4023_v1 = vld [vmem:[#allocation8 + $0x2b0] sm:$0xff]  }
  0xb9   : > { %3565 = vmatprep.subr.bf16.mxu0 %v4000_v0  ;;  %1515 = vmatmul.mubr.bf16.vlgmr.msra.gmra.mrb[8].mxu1 %v690_v6  ;;  %v4784_v0 = vrot.slane %v4330_v9, 4  ;;  %v4024_v6 = vld [vmem:[#allocation8 + $0x278] sm:$0xff]   ;;  %v706_v9 = vpack.c.bf16 %v666_v16, %v4698_v55 }
  0xba   : > { %3592 = vmatpush3.bf16.msra.mxu1 %v3999_v48  ;;  %1522 = vmatprep.mubr.bf16.mxu1 %v704_v50  ;;  %v4022_v48 = vld [vmem:[#allocation8 + $0x2f0] sm:$0xff]   ;;  %v4028_v50 = vld [vmem:[#allocation8 + $0x300] sm:$0xff]  }
  0xbb   : > { %3593 = vmatprep.subr.bf16.mxu1 %v4002_v19  ;;  %v4029_v19 = vld [vmem:[#allocation8 + $0x308] sm:$0xff]   ;;  %v680_v55 = vsel %vm603_vm8, %v607_v15, %v4784_v0  ;;  %v681_v34 = vsel %vm603_vm8, %v612_v60, %v4784_v0  ;;  %v4038_v15 = vld [vmem:[#allocation8 + $0x340] sm:$0xff]   ;;  %v4044_v60 = vld [vmem:[#allocation8 + $0x390] sm:$0xff]  }
  0xbc   : > { %3566 = vmatpush3.bf16.msra.mxu0 %v4001_v7  ;;  %v4025_v7 = vld [vmem:[#allocation8 + $0x238] sm:$0xff]   ;;  %v696_v51 = vpack.c.bf16 %v680_v55, %v4734_v4  ;;  %v709_v39 = vpack.c.bf16 %v681_v34, %v4762_v21  ;;  %v4039_v4 = vld [vmem:[#allocation8 + $0x3c0] sm:$0xff]   ;;  %v4046_v21 = vld [vmem:[#allocation8 + $0x350] sm:$0xff]  }
  0xbd   : > { %3567 = vmatprep.subr.bf16.mxu0 %v4004_v28  ;;  %v708_v28 = vpack.c.bf16 %v676_v20, %v4705_v59  ;;  %v4036_v59 = vld [vmem:[#allocation8 + $0x380] sm:$0xff]  }
  0xbe   : > { %3594 = vmatpush3.bf16.msra.mxu1 %v4003_v24  ;;  %v4041_v24 = vld [vmem:[#allocation8 + $0x408] sm:$0xff]  }
  0xbf   : > { %1474 = vmatmul.mubr.bf16.gmra.mrb[12].mxu0 %v701_v26  ;;  %3595 = vmatprep.subr.bf16.mxu1 %v4006_v32  ;;  %v4042_v26 = vld [vmem:[#allocation8 + $0x348] sm:$0xff]   ;;  %v4050_v32 = vld [vmem:[#allocation8 + $0x358] sm:$0xff]  }
  0xc0   : > { %3568 = vmatpush3.bf16.msra.mxu0 %v4005_v27  ;;  %1563 = vmatprep.mubr.bf16.mxu0 %v693_v8  ;;  %v4045_v27 = vld [vmem:[#allocation8 + $0x410] sm:$0xff]   ;;  %v4051_v8 = vld [vmem:[#allocation8 + $0x3d8] sm:$0xff]  }
  0xc1   : > { %3569 = vmatprep.subr.bf16.mxu0 %v4008_v33  ;;  %1523 = vmatmul.mubr.bf16.gmra.mrb[12].mxu1 %v703_v38  ;;  %v4052_v33 = vld [vmem:[#allocation8 + $0x3a0] sm:$0xff]  }
  0xc2   : > { %3596 = vmatpush3.bf16.msra.mxu1 %v4007_v41  ;;  %1612 = vmatprep.mubr.bf16.mxu1 %v695_v42  ;;  %v4053_v38 = vld [vmem:[#allocation8 + $0x420] sm:$0xff]  }
  0xc3   : > { %3597 = vmatprep.subr.bf16.mxu1 %v4010_v46  ;;  %v4054_v41 = vld [vmem:[#allocation8 + $0x360] sm:$0xff]   ;;  %v4057_v46 = vld [vmem:[#allocation8 + $0x428] sm:$0xff]  }
  0xc4   : > { %3570 = vmatpush3.bf16.msra.mxu0 %v4009_v44  ;;  %v4055_v42 = vld [vmem:[#allocation8 + $0x3e0] sm:$0xff]   ;;  %v4056_v44 = vld [vmem:[#allocation8 + $0x3a8] sm:$0xff]  }
  0xc5   : > { %3571 = vmatprep.subr.bf16.mxu0 %v4012_v49  ;;  %v4058_v49 = vld [vmem:[#allocation8 + $0x368] sm:$0xff]  }
  0xc6   : > { %3598 = vmatpush3.bf16.msra.mxu1 %v4011_v14  ;;  %v4059_v14 = vld [vmem:[#allocation8 + $0x3e8] sm:$0xff]  }
  0xc7   : > { %3599 = vmatprep.subr.bf16.mxu1 %v4014_v17  ;;  %v4061_v17 = vld [vmem:[#allocation8 + $0x430] sm:$0xff]  }
  0xc8   : > { %3572 = vmatpush3.bf16.msra.mxu0 %v4013_v52  ;;  %v4060_v52 = vld [vmem:[#allocation8 + $0x3b0] sm:$0xff]  }
  0xc9   : > { %3573 = vmatprep.subr.bf16.mxu0 %v4016_v53  ;;  %v4062_v53 = vld [vmem:[#allocation8 + $0x370] sm:$0xff]  }
  0xca   : > { %3600 = vmatpush3.bf16.msra.mxu1 %v4015_v23  ;;  %v4063_v23 = vld [vmem:[#allocation8 + $0x3f0] sm:$0xff]  }
  0xcb   : > { %3601 = vmatprep.subr.bf16.mxu1 %v4018_v56  ;;  %v4065_v56 = vld [vmem:[#allocation8 + $0x438] sm:$0xff]  }
  0xcc   : > { %3574 = vmatpush3.bf16.msra.mxu0 %v4017_v54  ;;  %v4064_v54 = vld [vmem:[#allocation8 + $0x3b8] sm:$0xff]  }
  0xcd   : > { %3575 = vmatprep.subr.bf16.mxu0 %v4020_v57  ;;  %v4066_v57 = vld [vmem:[#allocation8 + $0x378] sm:$0xff]  }
  0xce   : > { %3602 = vmatpush3.bf16.msra.mxu1 %v4019_v58  ;;  %v4067_v58 = vld [vmem:[#allocation8 + $0x3f8] sm:$0xff]  }
  0xcf   : > { %3603 = vmatprep.subr.bf16.mxu1 %v4022_v48  ;;  %v4069_v48 = vld [vmem:[#allocation8 + $0x500] sm:$0xff]  }
  0xd0   : > { %3576 = vmatpush3.bf16.msra.mxu0 %v4021_v40  ;;  %v4068_v40 = vld [vmem:[#allocation8 + $0x480] sm:$0xff]  }
  0xd1   : > { %3577 = vmatprep.subr.bf16.mxu0 %v4024_v6  ;;  %v710_v6 = vstv %s3203_s14 }
  0xd2   : > { %3604 = vmatpush3.bf16.msra.mxu1 %v4023_v1 }
  0xd3   : > { %3605 = vmatprep.subr.bf16.mxu1 %v4026_v12 }
  0xd4   : > { %3578 = vmatpush3.bf16.msra.mxu0 %v4025_v7 }
  0xd5   : > { %3807 = vmatprep.subr.bf16.mxu0 %v4028_v50 }
  0xd6   : > { %3606 = vmatpush3.bf16.msra.mxu1 %v4027_v13 }
  0xd7   : > { %3318 = vmatmul.mubr.msk.bf16.vlgmr.msra.gmra.mrb[16].mxu0 %vm4779_vm10, %v3317_v62  ;;  %v4031_v62 = vld [vmem:[#allocation8 + $0x318] sm:$0xff]   ;;  %3629 = vmatprep.subr.bf16.mxu1 %v4036_v59 }
  0xd8   : > { %3808 = vmatpush3.bf16.msra.mxu0 %v4028_v50  ;;  %1571 = vmatprep.mubr.bf16.mxu0 %v706_v9 }
  0xd9   : > { %3809 = vmatprep.subr.bf16.mxu0 %v4029_v19  ;;  %1613 = vmatmul.mubr.bf16.vlgmr.msra.gmra.mrb[16].mxu1 %v694_v45  ;;  %v4034_v45 = vld [vmem:[#allocation8 + $0x330] sm:$0xff]  }
  0xda   : > { %1620 = vmatprep.mubr.bf16.mxu1 %v708_v28  ;;  %3630 = vmatpush3.bf16.msra.mxu1 %v4038_v15 }
  0xdb   : > { %3631 = vmatprep.subr.bf16.mxu1 %v4040_v22 }
  0xdc   : > { %3810 = vmatpush3.bf16.msra.mxu0 %v4029_v19 }
  0xdd   : > { %3811 = vmatprep.subr.bf16.mxu0 %v4030_v43 }
  0xde   : > { %3632 = vmatpush3.bf16.msra.mxu1 %v4042_v26 }
  0xdf   : > { %3321 = vmatmul.mubr.msk.bf16.gmra.mrb[20].mxu0 %vm4779_vm10, %v3320_v2  ;;  %3633 = vmatprep.subr.bf16.mxu1 %v4044_v60 }
  0xe0   : > { %3812 = vmatpush3.bf16.msra.mxu0 %v4030_v43  ;;  %3823 = vmatprep.mubr.bf16.mxu0 %v696_v51 }
  0xe1   : > { %3813 = vmatprep.subr.bf16.mxu0 %v4031_v62  ;;  %1621 = vmatmul.mubr.bf16.gmra.mrb[20].mxu1 %v707_v5 }
  0xe2   : > { %3634 = vmatpush3.bf16.msra.mxu1 %v4046_v21 }
  0xe3   : > { %3635 = vmatprep.subr.bf16.mxu1 %v4048_v30 }
  0xe4   : > { %3814 = vmatpush3.bf16.msra.mxu0 %v4031_v62 }
  0xe5   : > { %3815 = vmatprep.subr.bf16.mxu0 %v4032_v36 }
  0xe6   : > { %3636 = vmatpush3.bf16.msra.mxu1 %v4050_v32 }
  0xe7   : > { %3637 = vmatprep.subr.bf16.mxu1 %v4052_v33 }
  0xe8   : > { %3816 = vmatpush3.bf16.msra.mxu0 %v4032_v36 }
  0xe9   : > { %3817 = vmatprep.subr.bf16.mxu0 %v4033_v37 }
  0xea   : > { %3638 = vmatpush3.bf16.msra.mxu1 %v4054_v41 }
  0xeb   : > { %3639 = vmatprep.subr.bf16.mxu1 %v4056_v44 }
  0xec   : > { %3818 = vmatpush3.bf16.msra.mxu0 %v4033_v37 }
  0xed   : > { %3819 = vmatprep.subr.bf16.mxu0 %v4034_v45 }
  0xee   : > { %3640 = vmatpush3.bf16.msra.mxu1 %v4058_v49 }
  0xef   : > { %3641 = vmatprep.subr.bf16.mxu1 %v4060_v52 }
  0xf0   : > { %3820 = vmatpush3.bf16.msra.mxu0 %v4034_v45 }
  0xf1   : > { %3821 = vmatprep.subr.bf16.mxu0 %v4035_v25 }
  0xf2   : > { %3642 = vmatpush3.bf16.msra.mxu1 %v4062_v53 }
  0xf3   : > { %3643 = vmatprep.subr.bf16.mxu1 %v4064_v54 }
  0xf4   : > { %3822 = vmatpush3.bf16.msra.mxu0 %v4035_v25 }
  0xf5   : > { %3657 = vmatprep.subr.bf16.mxu0 %v4037_v61 }
  0xf6   : > { %3644 = vmatpush3.bf16.msra.mxu1 %v4066_v57 }
  0xf7   : > { %3824 = vmatmul.mubr.bf16.vlgmr.msra.gmra.mrb[24].mxu0 %v709_v39  ;;  %3685 = vmatprep.subr.bf16.mxu1 %v4068_v40 }
  0xf8   : > { %3658 = vmatpush3.bf16.msra.mxu0 %v4039_v4 }
  0xf9   : > { %3659 = vmatprep.subr.bf16.mxu0 %v4041_v24 }
  0xfc   : > { %3660 = vmatpush3.bf16.msra.mxu0 %v4043_v35 }
  0xfd   : > { %3661 = vmatprep.subr.bf16.mxu0 %v4045_v27 }
 0x100   : > { %3662 = vmatpush3.bf16.msra.mxu0 %v4047_v29 }
 0x101   : > { %3663 = vmatprep.subr.bf16.mxu0 %v4049_v31 }
 0x104   : > { %3664 = vmatpush3.bf16.msra.mxu0 %v4051_v8 }
 0x105   : > { %3665 = vmatprep.subr.bf16.mxu0 %v4053_v38 }
 0x108   : > { %3666 = vmatpush3.bf16.msra.mxu0 %v4055_v42 }
 0x109   : > { %3667 = vmatprep.subr.bf16.mxu0 %v4057_v46 }
 0x10c   : > { %3668 = vmatpush3.bf16.msra.mxu0 %v4059_v14 }
 0x10d   : > { %3669 = vmatprep.subr.bf16.mxu0 %v4061_v17 }
 0x110   : > { %3670 = vmatpush3.bf16.msra.mxu0 %v4063_v23 }
 0x111   : > { %3671 = vmatprep.subr.bf16.mxu0 %v4065_v56 }
 0x114   : > { %3672 = vmatpush3.bf16.msra.mxu0 %v4067_v58 }
 0x115   : > { %3713 = vmatprep.subr.bf16.mxu0 %v4069_v48 }
 0x16a   : > { %v3467_v1 = vpop.f32.mrb[0].mxu0 }
 0x16b   : > { %v3468_v7 = vpop.f32.mrb[1].mxu0 }
 0x16c   : > { %v3469_v12 = vadd.f32 %v3468_v7, %v3467_v1  ;;  %v3470_v50 = vpop.f32.mrb[2].mxu0  ;;  %v3495_v13 = vpop.f32.mrb[0].mxu1 }
 0x16d   : > { %v3471_v16 = vpop.f32.mrb[3].mxu0  ;;  %v3496_v20 = vpop.f32.mrb[1].mxu1 }
 0x16e   : > { %v1370_v19 = vadd.f32 %v3469_v12, %v710_v6  ;;  %v3472_v9 = vadd.f32 %v3471_v16, %v3470_v50  ;;  %v3497_v43 = vadd.f32 %v3496_v20, %v3495_v13  ;;  %v3498_v28 = vpop.f32.mrb[2].mxu1 }
 0x16f   : > { %v3499_v2 = vpop.f32.mrb[3].mxu1 }
 0x170   : > { %v1373_v55 = vadd.f32 %v3472_v9, %v710_v6  ;;  %v1419_v3 = vadd.f32 %v3497_v43, %v1370_v19  ;;  %v3500_v62 = vadd.f32 %v3499_v2, %v3498_v28 }
 0x172   : > { %v1422_v51 = vadd.f32 %v3500_v62, %v1373_v55 }
 0x17d   : > { %v3473_v5 = vpop.f32.mrb[4].mxu0 }
 0x17e   : > { %v3474_v36 = vpop.f32.mrb[5].mxu0 }
 0x17f   : > { %v3501_v37 = vpop.f32.mrb[4].mxu1  ;;  %v3475_v45 = vadd.f32 %v3474_v36, %v3473_v5  ;;  %v3476_v25 = vpop.f32.mrb[6].mxu0 }
 0x180   : > { %v3502_v34 = vpop.f32.mrb[5].mxu1  ;;  %v3477_v39 = vpop.f32.mrb[7].mxu0 }
 0x181   : > { %v3503_v59 = vadd.f32 %v3502_v34, %v3501_v37  ;;  %v3504_v61 = vpop.f32.mrb[6].mxu1  ;;  %v1378_v15 = vadd.f32 %v3475_v45, %v710_v6  ;;  %v3478_v4 = vadd.f32 %v3477_v39, %v3476_v25 }
 0x182   : > { %v3505_v22 = vpop.f32.mrb[7].mxu1 }
 0x183   : > { %v3506_v24 = vadd.f32 %v3505_v22, %v3504_v61  ;;  %v1381_v26 = vadd.f32 %v3478_v4, %v710_v6  ;;  %v1427_v35 = vadd.f32 %v3503_v59, %v1378_v15 }
 0x185   : > { %v1430_v60 = vadd.f32 %v3506_v24, %v1381_v26 }
 0x18a   : > { %v3523_v27 = vpop.f32.mrb[8].mxu0 }
 0x18b   : > { %v3524_v21 = vpop.f32.mrb[9].mxu0 }
 0x18c   : > { %v3525_v29 = vadd.f32 %v3524_v21, %v3523_v27  ;;  %v3526_v30 = vpop.f32.mrb[10].mxu0  ;;  %v3551_v31 = vpop.f32.mrb[8].mxu1 }
 0x18d   : > { %v3527_v32 = vpop.f32.mrb[11].mxu0  ;;  %v3552_v38 = vpop.f32.mrb[9].mxu1 }
 0x18e   : > { %v1468_v8 = vadd.f32 %v3525_v29, %v1419_v3  ;;  %v3528_v33 = vadd.f32 %v3527_v32, %v3526_v30  ;;  %v3553_v41 = vadd.f32 %v3552_v38, %v3551_v31  ;;  %v3554_v42 = vpop.f32.mrb[10].mxu1 }
 0x18f   : > { %v3555_v46 = vpop.f32.mrb[11].mxu1 }
 0x190   : > { %v1471_v44 = vadd.f32 %v3528_v33, %v1422_v51  ;;  %v1517_v49 = vadd.f32 %v3553_v41, %v1468_v8  ;;  %v3556_v14 = vadd.f32 %v3555_v46, %v3554_v42 }
 0x192   : > { %v3529_v52 = vpop.f32.mrb[12].mxu0  ;;  %v1520_v17 = vadd.f32 %v3556_v14, %v1471_v44 }
 0x193   : > { %v3530_v53 = vpop.f32.mrb[13].mxu0 }
 0x194   : > { %v3531_v23 = vadd.f32 %v3530_v53, %v3529_v52  ;;  %v3532_v54 = vpop.f32.mrb[14].mxu0  ;;  %v3557_v56 = vpop.f32.mrb[12].mxu1 }
 0x195   : > { %v3533_v57 = vpop.f32.mrb[15].mxu0  ;;  %v3558_v48 = vpop.f32.mrb[13].mxu1 }
 0x196   : > { %v1476_v58 = vadd.f32 %v3531_v23, %v1427_v35  ;;  %v3534_v40 = vadd.f32 %v3533_v57, %v3532_v54  ;;  %v3559_v1 = vadd.f32 %v3558_v48, %v3557_v56  ;;  %v3560_v6 = vpop.f32.mrb[14].mxu1 }
 0x197   : > { %v3561_v12 = vpop.f32.mrb[15].mxu1 }
 0x198   : > { %v1479_v7 = vadd.f32 %v3534_v40, %v1430_v60  ;;  %v1525_v50 = vadd.f32 %v3559_v1, %v1476_v58  ;;  %v3562_v13 = vadd.f32 %v3561_v12, %v3560_v6 }
 0x19a   : > { %v1528_v16 = vadd.f32 %v3562_v13, %v1479_v7 }
 0x1aa   : > { %v3579_v19 = vpop.f32.mrb[16].mxu0 }
 0x1ab   : > { %v3580_v9 = vpop.f32.mrb[17].mxu0 }
 0x1ac   : > { %v3581_v20 = vadd.f32 %v3580_v9, %v3579_v19  ;;  %v3582_v43 = vpop.f32.mrb[18].mxu0  ;;  %v3607_v28 = vpop.f32.mrb[16].mxu1 }
 0x1ad   : > { %v3583_v55 = vpop.f32.mrb[19].mxu0  ;;  %v3608_v62 = vpop.f32.mrb[17].mxu1 }
 0x1ae   : > { %v1566_v2 = vadd.f32 %v3581_v20, %v1517_v49  ;;  %v3584_v3 = vadd.f32 %v3583_v55, %v3582_v43  ;;  %v3609_v51 = vadd.f32 %v3608_v62, %v3607_v28  ;;  %v3610_v5 = vpop.f32.mrb[18].mxu1 }
 0x1af   : > { %v3611_v37 = vpop.f32.mrb[19].mxu1 }
 0x1b0   : > { %v1569_v36 = vadd.f32 %v3584_v3, %v1520_v17  ;;  %v3612_v45 = vadd.f32 %v3611_v37, %v3610_v5  ;;  %v1615_v25 = vadd.f32 %v3609_v51, %v1566_v2 }
 0x1b2   : > { %v3585_v34 = vpop.f32.mrb[20].mxu0  ;;  %v1618_v59 = vadd.f32 %v3612_v45, %v1569_v36 }
 0x1b3   : > { %v3586_v39 = vpop.f32.mrb[21].mxu0 }
 0x1b4   : > { %v3587_v61 = vadd.f32 %v3586_v39, %v3585_v34  ;;  %v3588_v15 = vpop.f32.mrb[22].mxu0  ;;  %v3613_v4 = vpop.f32.mrb[20].mxu1 }
 0x1b5   : > { %v3589_v22 = vpop.f32.mrb[23].mxu0  ;;  %v3614_v35 = vpop.f32.mrb[21].mxu1 }
 0x1b6   : > { %v1574_v24 = vadd.f32 %v3587_v61, %v1525_v50  ;;  %v3590_v26 = vadd.f32 %v3589_v22, %v3588_v15  ;;  %v3615_v60 = vadd.f32 %v3614_v35, %v3613_v4  ;;  %v3616_v27 = vpop.f32.mrb[22].mxu1  ;;  %v4070_v61 = vld [vmem:[#allocation8 + $0x440] sm:$0xff]   ;;  %v4072_v35 = vld [vmem:[#allocation8 + $0x488] sm:$0xff]  }
 0x1b7   : > { %v3617_v29 = vpop.f32.mrb[23].mxu1 }
 0x1b8   : > { %v1577_v21 = vadd.f32 %v3590_v26, %v1528_v16  ;;  %v3618_v30 = vadd.f32 %v3617_v29, %v3616_v27  ;;  %v1623_v31 = vadd.f32 %v3615_v60, %v1574_v24  ;;  %v4071_v24 = vld [vmem:[#allocation8 + $0x4c0] sm:$0xff]  }
 0x1ba   : > { %v1626_v32 = vadd.f32 %v3618_v30, %v1577_v21  ;;  %v4073_v30 = vld [vmem:[#allocation8 + $0x508] sm:$0xff]  }
 0x1ca   : > { %v3825_v8 = vpop.f32.mrb[24].mxu0 }
 0x1cb   : > { %v1672_v33 = vadd.f32 %v3825_v8, %v1623_v31  ;;  %v1663_v38 = vpop.f32.mrb[25].mxu0 }
 0x1cc   : > { %v1664_v41 = vadd.f32 %v1663_v38, %v1615_v25  ;;  %v3826_v42 = vpop.f32.mrb[26].mxu0 }
 0x1cd   : > { %v1680_v44 = vmax.f32 %v1672_v33, 0.0  ;;  %v1675_v46 = vadd.f32 %v3826_v42, %v1626_v32  ;;  %v1666_v49 = vpop.f32.mrb[27].mxu0 }
 0x1ce   : > { %v1678_v14 = vmax.f32 %v1664_v41, 0.0  ;;  %v1667_v52 = vadd.f32 %v1666_v49, %v1618_v59 }
 0x1cf   : > { %v4823_v17 = vrot.slane %v1680_v44, 2  ;;  %v1681_v53 = vmax.f32 %v1675_v46, 0.0  ;;  %v4074_v44 = vld [vmem:[#allocation8 + $0x448] sm:$0xff]  }
 0x1d0   : > { %v1896_v23 = vrot.slane %v1678_v14, 2  ;;  %v1679_v54 = vmax.f32 %v1667_v52, 0.0  ;;  %v4075_v52 = vld [vmem:[#allocation8 + $0x4c8] sm:$0xff]  }
 0x1d1   : > { %v4827_v56 = vsel %vm538_vm0, 0.0, %v4823_v17  ;;  %v4829_v57 = vrot.slane %v1681_v53, 2 }
 0x1d2   : > { %v4832_v58 = vsel %vm538_vm0, 0.0, %v1896_v23  ;;  %v4834_v40 = vrot.slane %v1679_v54, 2  ;;  %v1921_v48 = vrot.slane %v4827_v56, 1  ;;  %v1949_v1 = vrot.slane %v4827_v56, 3  ;;  %v4077_v54 = vld [vmem:[#allocation8 + $0x510] sm:$0xff]  }
 0x1d3   : > { %v4841_v6 = vsel %vm538_vm0, %v4823_v17, %v4829_v57  ;;  %v4845_v7 = vsel %vm538_vm0, %v4829_v57, 0.0  ;;  %v1916_v12 = vrot.slane %v4832_v58, 1  ;;  %v1944_v50 = vrot.slane %v4832_v58, 3 }
 0x1d4   : > { %v3439_v13 = vpack.c.bf16 %v4829_v57, %v4841_v6  ;;  %v4853_v16 = vsel %vm538_vm0, %v1896_v23, %v4834_v40  ;;  %v4857_v19 = vsel %vm538_vm0, %v4834_v40, 0.0  ;;  %v1930_v9 = vrot.slane %v4832_v58, 2  ;;  %v4138_v57 = vld [vmem:[#allocation8 + $0x670] sm:$0xff]  }
 0x1d5   : > { %v3436_v20 = vpack.c.bf16 %v4834_v40, %v4853_v16  ;;  %v1917_v43 = vrot.slane %v4853_v16, 1  ;;  %v1919_v28 = vrot.slane %v4857_v19, 1  ;;  %v1945_v55 = vrot.slane %v4853_v16, 3  ;;  %v4135_v40 = vld [vmem:[#allocation8 + $0x658] sm:$0xff]  }
 0x1d6   : > { %v1947_v2 = vrot.slane %v4857_v19, 3  ;;  %v3429_v3 = vpack.c.bf16 %v4853_v16, %v1896_v23  ;;  %v1931_v62 = vrot.slane %v4853_v16, 2  ;;  %v1933_v51 = vrot.slane %v4857_v19, 2 }
 0x1d7   : > { %v1918_v5 = vsel %vm559_vm1, %v1916_v12, %v1917_v43  ;;  %v4873_v36 = vsel %vm559_vm1, %v1917_v43, %v1919_v28  ;;  %v1946_v37 = vsel %vm588_vm3, %v1944_v50, %v1945_v55  ;;  %v1922_v45 = vrot.slane %v4841_v6, 1 }
 0x1d8   : > { %v2031_v25 = vpack.c.bf16 %v4873_v36, %v1918_v5  ;;  %v4881_v34 = vsel %vm588_vm3, %v1945_v55, %v1947_v2  ;;  %v1932_v39 = vsel %vm538_vm0, %v1930_v9, %v1931_v62  ;;  %v4885_v59 = vsel %vm538_vm0, %v1931_v62, %v1933_v51  ;;  %v4078_v62 = vld [vmem:[#allocation8 + $0x450] sm:$0xff]  }
 0x1d9   : > { %v2033_v15 = vpack.c.bf16 %v4881_v34, %v1946_v37  ;;  %v4890_v4 = vsel %vm538_vm0, %v1933_v51, %v4598_v10  ;;  %v2032_v22 = vpack.c.bf16 %v4885_v59, %v1932_v39  ;;  %v1923_v26 = vsel %vm559_vm1, %v1921_v48, %v1922_v45 }
 0x1da   : > { %2713 = vmatprep.mubr.bf16.mxu1 %v2031_v25  ;;  %v2040_v60 = vpack.c.bf16 %v4890_v4, %v4885_v59  ;;  %v1924_v27 = vrot.slane %v4845_v7, 1  ;;  %v1950_v21 = vrot.slane %v4841_v6, 3  ;;  %v1952_v29 = vrot.slane %v4845_v7, 3  ;;  %v4079_v25 = vld [vmem:[#allocation8 + $0x4d0] sm:$0xff]  }
 0x1db   : > { %2762 = vmatprep.mubr.bf16.mxu0 %v2033_v15  ;;  %3430 = vmatmul.mubr.msk.bf16.vlgmr.msra.gmra.mrb[24].mxu1 %vm4601_vm5, %v3429_v3  ;;  %v3433_v31 = vpack.c.bf16 %v4841_v6, %v4823_v17  ;;  %v1935_v32 = vrot.slane %v4827_v56, 2  ;;  %v1936_v8 = vrot.slane %v4841_v6, 2  ;;  %v1938_v33 = vrot.slane %v4845_v7, 2  ;;  %v4076_v17 = vld [vmem:[#allocation8 + $0x490] sm:$0xff]  }
 0x1dc   : > { %2763 = vmatmul.mubr.bf16.vlgmr.msra.gmra.mrb[28].mxu0 %v2032_v22  ;;  %3686 = vmatpush3.bf16.msra.mxu1 %v4070_v61  ;;  %v4909_v38 = vsel %vm559_vm1, %v1922_v45, %v1924_v27  ;;  %v1951_v41 = vsel %vm588_vm3, %v1949_v1, %v1950_v21  ;;  %v4915_v42 = vsel %vm588_vm3, %v1950_v21, %v1952_v29  ;;  %v1972_v46 = vrot.slane %v4832_v58, 5 }
 0x1dd   : > { %3714 = vmatpush3.bf16.msra.mxu0 %v4071_v24  ;;  %v2044_v49 = vpack.c.bf16 %v4909_v38, %v1923_v26  ;;  %v2046_v14 = vpack.c.bf16 %v4915_v42, %v1951_v41  ;;  %3687 = vmatprep.subr.bf16.mxu1 %v4072_v35  ;;  %v1937_v53 = vsel %vm538_vm0, %v1935_v32, %v1936_v8  ;;  %v1973_v23 = vrot.slane %v4853_v16, 5  ;;  %v4080_v26 = vld [vmem:[#allocation8 + $0x498] sm:$0xff]  }
 0x1de   : > { %3715 = vmatprep.subr.bf16.mxu0 %v4073_v30  ;;  %v4925_v48 = vsel %vm538_vm0, %v1936_v8, %v1938_v33  ;;  %v1975_v1 = vrot.slane %v4857_v19, 5  ;;  %v2000_v12 = vrot.slane %v4832_v58, 7  ;;  %v2001_v50 = vrot.slane %v4853_v16, 7  ;;  %v4081_v32 = vld [vmem:[#allocation8 + $0x518] sm:$0xff]  }
 0x1df   : > { %2721 = vmatprep.mubr.bf16.mxu1 %v2044_v49  ;;  %2770 = vmatprep.mubr.bf16.mxu0 %v2046_v14  ;;  %v2045_v9 = vpack.c.bf16 %v4925_v48, %v1937_v53  ;;  %v1974_v43 = vsel %vm618_vm6, %v1972_v46, %v1973_v23  ;;  %v2003_v55 = vrot.slane %v4857_v19, 7  ;;  %v1958_v3 = vrot.slane %v4832_v58, 4  ;;  %v4082_v46 = vld [vmem:[#allocation8 + $0x458] sm:$0xff]  }
 0x1e0   : > { %3688 = vmatpush3.bf16.msra.mxu1 %v4074_v44  ;;  %v1976_v51 = vsel %vm618_vm6, %v1973_v23, %v1975_v1  ;;  %v2002_v5 = vsel %vm648_vm7, %v2000_v12, %v2001_v50  ;;  %v1959_v37 = vrot.slane %v4853_v16, 4  ;;  %v1961_v45 = vrot.slane %v4857_v19, 4  ;;  %v4085_v12 = vld [vmem:[#allocation8 + $0x520] sm:$0xff]  }
 0x1e1   : > { %3716 = vmatpush3.bf16.msra.mxu0 %v4075_v52  ;;  %3689 = vmatprep.subr.bf16.mxu1 %v4076_v17  ;;  %v2035_v39 = vpack.c.bf16 %v1976_v51, %v1974_v43  ;;  %v2004_v61 = vsel %vm648_vm7, %v2001_v50, %v2003_v55  ;;  %v1986_v15 = vrot.slane %v4832_v58, 6  ;;  %v1987_v22 = vrot.slane %v4853_v16, 6  ;;  %v4083_v52 = vld [vmem:[#allocation8 + $0x4d8] sm:$0xff]   ;;  %v4084_v17 = vld [vmem:[#allocation8 + $0x4a0] sm:$0xff]  }
 0x1e2   : > { %3717 = vmatprep.subr.bf16.mxu0 %v4077_v54  ;;  %v2037_v24 = vpack.c.bf16 %v2004_v61, %v2002_v5  ;;  %v4942_v35 = vsel %vm603_vm8, %v1958_v3, %v1959_v37  ;;  %v4947_v21 = vsel %vm603_vm8, %v1959_v37, %v1961_v45  ;;  %v1989_v30 = vrot.slane %v4857_v19, 6  ;;  %v4086_v37 = vld [vmem:[#allocation8 + $0x460] sm:$0xff]   ;;  %v4095_v19 = vld [vmem:[#allocation8 + $0x4f0] sm:$0xff]  }
 0x1e3   : > { %3434 = vmatmul.mubr.msk.bf16.gmra.mrb[28].mxu1 %vm4601_vm5, %v3433_v31  ;;  %v2034_v58 = vpack.c.bf16 %v4947_v21, %v4942_v35  ;;  %v4955_v8 = vsel %vm633_vm9, %v1986_v15, %v1987_v22  ;;  %v1977_v41 = vrot.slane %v4827_v56, 5  ;;  %v1978_v44 = vrot.slane %v4841_v6, 5  ;;  %v4110_v35 = vld [vmem:[#allocation8 + $0x550] sm:$0xff]   ;;  %v4136_v16 = vld [vmem:[#allocation8 + $0x660] sm:$0xff]  }
 0x1e4   : > { %2771 = vmatmul.mubr.bf16.gmra.mrb[32].mxu0 %v2045_v9  ;;  %3690 = vmatpush3.bf16.msra.mxu1 %v4078_v62  ;;  %v4960_v49 = vsel %vm633_vm9, %v1987_v22, %v1989_v30  ;;  %v1980_v11 = vrot.slane %v4845_v7, 5  ;;  %v2005_v31 = vrot.slane %v4827_v56, 7  ;;  %v2006_v14 = vrot.slane %v4841_v6, 7  ;;  %v4088_v22 = vld [vmem:[#allocation8 + $0x4a8] sm:$0xff]  }
 0x1e5   : > { %3718 = vmatpush3.bf16.msra.mxu0 %v4079_v25  ;;  %2811 = vmatprep.mubr.bf16.mxu1 %v2035_v39  ;;  %v2036_v53 = vpack.c.bf16 %v4960_v49, %v4955_v8  ;;  %v4968_v23 = vsel %vm618_vm6, %v1977_v41, %v1978_v44  ;;  %v2008_v54 = vrot.slane %v4845_v7, 7  ;;  %v1963_v1 = vrot.slane %v4827_v56, 4  ;;  %v4089_v41 = vld [vmem:[#allocation8 + $0x528] sm:$0xff]   ;;  %v4112_v8 = vld [vmem:[#allocation8 + $0x598] sm:$0xff]  }
 0x1e6   : > { %2860 = vmatprep.mubr.bf16.mxu0 %v2037_v24  ;;  %3691 = vmatprep.subr.bf16.mxu1 %v4080_v26  ;;  %v4973_v50 = vsel %vm618_vm6, %v1978_v44, %v1980_v11  ;;  %v4976_v9 = vsel %vm648_vm7, %v2005_v31, %v2006_v14  ;;  %v1964_v43 = vrot.slane %v4841_v6, 4  ;;  %v1966_v55 = vrot.slane %v4845_v7, 4  ;;  %v4113_v49 = vld [vmem:[#allocation8 + $0x618] sm:$0xff]  }
 0x1e7   : > { %3719 = vmatprep.subr.bf16.mxu0 %v4081_v32  ;;  %v2048_v3 = vpack.c.bf16 %v4973_v50, %v4968_v23  ;;  %v4983_v62 = vsel %vm648_vm7, %v2006_v14, %v2008_v54  ;;  %v1991_v51 = vrot.slane %v4827_v56, 6  ;;  %v1992_v5 = vrot.slane %v4841_v6, 6  ;;  %v4087_v56 = vld [vmem:[#allocation8 + $0x4e0] sm:$0xff]   ;;  %v4092_v54 = vld [vmem:[#allocation8 + $0x4b0] sm:$0xff]   ;;  %v4115_v23 = vld [vmem:[#allocation8 + $0x5d8] sm:$0xff]  }
 0x1e8   : > { %3692 = vmatpush3.bf16.msra.mxu1 %v4082_v46  ;;  %v2050_v25 = vpack.c.bf16 %v4983_v62, %v4976_v9  ;;  %v4990_v39 = vsel %vm603_vm8, %v1963_v1, %v1964_v43  ;;  %v4993_v61 = vsel %vm603_vm8, %v1964_v43, %v1966_v55  ;;  %v4997_v15 = vsel %vm603_vm8, %v1966_v55, %v4784_v0  ;;  %v4099_v9 = vld [vmem:[#allocation8 + $0x4f8] sm:$0xff]   ;;  %v4100_v43 = vld [vmem:[#allocation8 + $0x580] sm:$0xff]  }
 0x1e9   : > { %3720 = vmatpush3.bf16.msra.mxu0 %v4083_v52  ;;  %3693 = vmatprep.subr.bf16.mxu1 %v4084_v17  ;;  %v2047_v24 = vpack.c.bf16 %v4993_v61, %v4990_v39  ;;  %v2055_v26 = vpack.c.bf16 %v4997_v15, %v4993_v61  ;;  %v5004_v30 = vsel %vm633_vm9, %v1991_v51, %v1992_v5  ;;  %v1994_v32 = vrot.slane %v4845_v7, 6  ;;  %v4091_v17 = vld [vmem:[#allocation8 + $0x4e8] sm:$0xff]   ;;  %v4093_v7 = vld [vmem:[#allocation8 + $0x530] sm:$0xff]   ;;  %v4101_v55 = vld [vmem:[#allocation8 + $0x600] sm:$0xff]  }
 0x1ea   : > { %3721 = vmatprep.subr.bf16.mxu0 %v4085_v12  ;;  %v5011_v44 = vsel %vm559_vm1, %v1919_v28, %v4750_v63  ;;  %v5017_v46 = vsel %vm588_vm3, %v1947_v2, %v4756_v18  ;;  %v5023_v11 = vsel %vm559_vm1, %v1924_v27, %v4750_v63  ;;  %v5029_v31 = vsel %vm588_vm3, %v1952_v29, %v4756_v18  ;;  %v4090_v63 = vld [vmem:[#allocation8 + $0x468] sm:$0xff]   ;;  %v4102_v62 = vld [vmem:[#allocation8 + $0x540] sm:$0xff]  }
 0x1eb   : > { %v5032_v28 = vsel %vm633_vm9, %v1992_v5, %v1994_v32  ;;  %v2039_v14 = vpack.c.bf16 %v5011_v44, %v4873_v36  ;;  %v2041_v2 = vpack.c.bf16 %v5017_v46, %v4881_v34  ;;  %v2052_v52 = vpack.c.bf16 %v5023_v11, %v4909_v38  ;;  %v4103_v51 = vld [vmem:[#allocation8 + $0x5c0] sm:$0xff]   ;;  %v4104_v5 = vld [vmem:[#allocation8 + $0x588] sm:$0xff]   ;;  %v4109_v32 = vld [vmem:[#allocation8 + $0x610] sm:$0xff]  }
 0x1ec   : > { %3694 = vmatpush3.bf16.msra.mxu1 %v4086_v37  ;;  %v2049_v27 = vpack.c.bf16 %v5032_v28, %v5004_v30  ;;  %v2054_v18 = vpack.c.bf16 %v5029_v31, %v4915_v42  ;;  %v5048_v29 = vsel %vm538_vm0, %v1938_v33, %v4598_v10  ;;  %v5054_v36 = vsel %vm603_vm8, %v1961_v45, %v4784_v0  ;;  %v4094_v10 = vld [vmem:[#allocation8 + $0x470] sm:$0xff]   ;;  %v4096_v33 = vld [vmem:[#allocation8 + $0x4b8] sm:$0xff]   ;;  %v4105_v37 = vld [vmem:[#allocation8 + $0x608] sm:$0xff]  }
 0x1ed   : > { %3722 = vmatpush3.bf16.msra.mxu0 %v4087_v56  ;;  %3695 = vmatprep.subr.bf16.mxu1 %v4088_v22  ;;  %v2053_v1 = vpack.c.bf16 %v5048_v29, %v4925_v48  ;;  %v2042_v12 = vpack.c.bf16 %v5054_v36, %v4947_v21  ;;  %v4097_v0 = vld [vmem:[#allocation8 + $0x538] sm:$0xff]   ;;  %v4106_v56 = vld [vmem:[#allocation8 + $0x548] sm:$0xff]   ;;  %v4108_v30 = vld [vmem:[#allocation8 + $0x590] sm:$0xff]   ;;  %v2056_v59 = vstv %s3322_s25 }
 0x1ee   : > { %3723 = vmatprep.subr.bf16.mxu0 %v4089_v41  ;;  %v4098_v45 = vld [vmem:[#allocation8 + $0x478] sm:$0xff]   ;;  %v4107_v22 = vld [vmem:[#allocation8 + $0x5c8] sm:$0xff]   ;;  %v4116_v50 = vld [vmem:[#allocation8 + $0x5a0] sm:$0xff]  }
 0x1ef   : > { %v4119_v39 = vld [vmem:[#allocation8 + $0x5e0] sm:$0xff]   ;;  %v4121_v41 = vld [vmem:[#allocation8 + $0x628] sm:$0xff]   ;;  %v4124_v46 = vld [vmem:[#allocation8 + $0x5b0] sm:$0xff]  }
 0x1f0   : > { %3696 = vmatpush3.bf16.msra.mxu1 %v4090_v63  ;;  %v4122_v44 = vld [vmem:[#allocation8 + $0x568] sm:$0xff]   ;;  %v4125_v28 = vld [vmem:[#allocation8 + $0x630] sm:$0xff]   ;;  %v4128_v63 = vld [vmem:[#allocation8 + $0x5b8] sm:$0xff]  }
 0x1f1   : > { %3724 = vmatpush3.bf16.msra.mxu0 %v4091_v17  ;;  %3697 = vmatprep.subr.bf16.mxu1 %v4092_v54  ;;  %v4123_v34 = vld [vmem:[#allocation8 + $0x5e8] sm:$0xff]   ;;  %v4130_v17 = vld [vmem:[#allocation8 + $0x578] sm:$0xff]  }
 0x1f2   : > { %3725 = vmatprep.subr.bf16.mxu0 %v4093_v7  ;;  %v4131_v54 = vld [vmem:[#allocation8 + $0x5f8] sm:$0xff]   ;;  %v4132_v7 = vld [vmem:[#allocation8 + $0x640] sm:$0xff]  }
 0x1f4   : > { %3698 = vmatpush3.bf16.msra.mxu1 %v4094_v10  ;;  %v4133_v10 = vld [vmem:[#allocation8 + $0x648] sm:$0xff]  }
 0x1f5   : > { %3726 = vmatpush3.bf16.msra.mxu0 %v4095_v19  ;;  %3699 = vmatprep.subr.bf16.mxu1 %v4096_v33  ;;  %v4134_v19 = vld [vmem:[#allocation8 + $0x650] sm:$0xff]  }
 0x1f6   : > { %3727 = vmatprep.subr.bf16.mxu0 %v4097_v0 }
 0x1f8   : > { %3700 = vmatpush3.bf16.msra.mxu1 %v4098_v45 }
 0x1f9   : > { %3728 = vmatpush3.bf16.msra.mxu0 %v4099_v9  ;;  %3741 = vmatprep.subr.bf16.mxu1 %v4100_v43 }
 0x1fa   : > { %3769 = vmatprep.subr.bf16.mxu0 %v4101_v55 }
 0x1fb   : > { %2812 = vmatmul.mubr.bf16.vlgmr.msra.gmra.mrb[32].mxu1 %v2034_v58  ;;  %v4111_v58 = vld [vmem:[#allocation8 + $0x5d0] sm:$0xff]  }
 0x1fc   : > { %2861 = vmatmul.mubr.bf16.vlgmr.msra.gmra.mrb[36].mxu0 %v2036_v53  ;;  %2819 = vmatprep.mubr.bf16.mxu1 %v2048_v3  ;;  %v4114_v53 = vld [vmem:[#allocation8 + $0x558] sm:$0xff]   ;;  %v4117_v3 = vld [vmem:[#allocation8 + $0x620] sm:$0xff]  }
 0x1fd   : > { %2868 = vmatprep.mubr.bf16.mxu0 %v2050_v25  ;;  %3742 = vmatpush3.bf16.msra.mxu1 %v4102_v62  ;;  %v4118_v25 = vld [vmem:[#allocation8 + $0x560] sm:$0xff]  }
 0x1fe   : > { %3770 = vmatpush3.bf16.msra.mxu0 %v4103_v51  ;;  %3743 = vmatprep.subr.bf16.mxu1 %v4104_v5 }
 0x1ff   : > { %3771 = vmatprep.subr.bf16.mxu0 %v4105_v37 }
 0x201   : > { %3744 = vmatpush3.bf16.msra.mxu1 %v4106_v56 }
 0x202   : > { %3772 = vmatpush3.bf16.msra.mxu0 %v4107_v22  ;;  %3745 = vmatprep.subr.bf16.mxu1 %v4108_v30 }
 0x203   : > { %2820 = vmatmul.mubr.bf16.gmra.mrb[36].mxu1 %v2047_v24  ;;  %3773 = vmatprep.subr.bf16.mxu0 %v4109_v32  ;;  %v4120_v24 = vld [vmem:[#allocation8 + $0x5a8] sm:$0xff]  }
 0x204   : > { %2869 = vmatmul.mubr.bf16.gmra.mrb[40].mxu0 %v2049_v27  ;;  %2909 = vmatprep.mubr.bf16.mxu1 %v2039_v14  ;;  %v4126_v14 = vld [vmem:[#allocation8 + $0x570] sm:$0xff]   ;;  %v4129_v27 = vld [vmem:[#allocation8 + $0x638] sm:$0xff]  }
 0x205   : > { %3746 = vmatpush3.bf16.msra.mxu1 %v4110_v35  ;;  %2958 = vmatprep.mubr.bf16.mxu0 %v2041_v2  ;;  %v4127_v2 = vld [vmem:[#allocation8 + $0x5f0] sm:$0xff]  }
 0x206   : > { %3774 = vmatpush3.bf16.msra.mxu0 %v4111_v58  ;;  %3747 = vmatprep.subr.bf16.mxu1 %v4112_v8 }
 0x207   : > { %3775 = vmatprep.subr.bf16.mxu0 %v4113_v49 }
 0x209   : > { %3748 = vmatpush3.bf16.msra.mxu1 %v4114_v53 }
 0x20a   : > { %3776 = vmatpush3.bf16.msra.mxu0 %v4115_v23  ;;  %3749 = vmatprep.subr.bf16.mxu1 %v4116_v50 }
 0x20b   : > { %3777 = vmatprep.subr.bf16.mxu0 %v4117_v3 }
 0x20d   : > { %3750 = vmatpush3.bf16.msra.mxu1 %v4118_v25 }
 0x20e   : > { %3778 = vmatpush3.bf16.msra.mxu0 %v4119_v39  ;;  %3751 = vmatprep.subr.bf16.mxu1 %v4120_v24 }
 0x20f   : > { %3779 = vmatprep.subr.bf16.mxu0 %v4121_v41 }
 0x211   : > { %3752 = vmatpush3.bf16.msra.mxu1 %v4122_v44 }
 0x212   : > { %3780 = vmatpush3.bf16.msra.mxu0 %v4123_v34  ;;  %3753 = vmatprep.subr.bf16.mxu1 %v4124_v46 }
 0x213   : > { %3781 = vmatprep.subr.bf16.mxu0 %v4125_v28 }
 0x215   : > { %3754 = vmatpush3.bf16.msra.mxu1 %v4126_v14 }
 0x216   : > { %3782 = vmatpush3.bf16.msra.mxu0 %v4127_v2  ;;  %3755 = vmatprep.subr.bf16.mxu1 %v4128_v63 }
 0x217   : > { %3783 = vmatprep.subr.bf16.mxu0 %v4129_v27 }
 0x219   : > { %3756 = vmatpush3.bf16.msra.mxu1 %v4130_v17 }
 0x21a   : > { %3784 = vmatpush3.bf16.msra.mxu0 %v4131_v54  ;;  %3827 = vmatprep.subr.bf16.mxu1 %v4132_v7 }
 0x21c   : > { %3437 = vmatmul.mubr.msk.bf16.vlgmr.msra.gmra.mrb[40].mxu1 %vm4779_vm10, %v3436_v20  ;;  %v4137_v20 = vld [vmem:[#allocation8 + $0x668] sm:$0xff]  }
 0x21d   : > { %2959 = vmatmul.mubr.bf16.vlgmr.msra.gmra.mrb[44].mxu0 %v2040_v60  ;;  %2917 = vmatprep.mubr.bf16.mxu1 %v2052_v52 }
 0x21e   : > { %2966 = vmatprep.mubr.bf16.mxu0 %v2054_v18  ;;  %3828 = vmatpush3.bf16.msra.mxu1 %v4132_v7 }
 0x21f   : > { %3829 = vmatprep.subr.bf16.mxu1 %v4133_v10 }
 0x222   : > { %3830 = vmatpush3.bf16.msra.mxu1 %v4133_v10 }
 0x223   : > { %3831 = vmatprep.subr.bf16.mxu1 %v4134_v19 }
 0x224   : > { %3440 = vmatmul.mubr.msk.bf16.gmra.mrb[44].mxu1 %vm4779_vm10, %v3439_v13 }
 0x225   : > { %2967 = vmatmul.mubr.bf16.gmra.mrb[48].mxu0 %v2053_v1  ;;  %3843 = vmatprep.mubr.bf16.mxu1 %v2042_v12 }
 0x226   : > { %3832 = vmatpush3.bf16.msra.mxu1 %v4134_v19 }
 0x227   : > { %3833 = vmatprep.subr.bf16.mxu1 %v4135_v40 }
 0x22a   : > { %3834 = vmatpush3.bf16.msra.mxu1 %v4135_v40 }
 0x22b   : > { %3835 = vmatprep.subr.bf16.mxu1 %v4136_v16 }
 0x22e   : > { %3836 = vmatpush3.bf16.msra.mxu1 %v4136_v16 }
 0x22f   : > { %3837 = vmatprep.subr.bf16.mxu1 %v4137_v20 }
 0x232   : > { %3838 = vmatpush3.bf16.msra.mxu1 %v4137_v20 }
 0x233   : > { %3839 = vmatprep.subr.bf16.mxu1 %v4138_v57 }
 0x236   : > { %3840 = vmatpush3.bf16.msra.mxu1 %v4138_v57 }
 0x237   : > { %3841 = vmatprep.subr.bf16.mxu1 %v4139_v47 }
 0x23a   : > { %3842 = vmatpush3.bf16.msra.mxu1 %v4139_v47 }
 0x23d   : > { %3844 = vmatmul.mubr.bf16.vlgmr.msra.gmra.mrb[48].mxu1 %v2055_v26 }
 0x2ae   : > { %v3645_v6 = vpop.f32.mrb[24].mxu1 }
 0x2af   : > { %v3673_v13 = vpop.f32.mrb[28].mxu0  ;;  %v3646_v4 = vpop.f32.mrb[25].mxu1 }
 0x2b0   : > { %v3647_v60 = vadd.f32 %v3646_v4, %v3645_v6  ;;  %v3674_v38 = vpop.f32.mrb[29].mxu0  ;;  %v3648_v42 = vpop.f32.mrb[26].mxu1 }
 0x2b1   : > { %v3675_v48 = vadd.f32 %v3674_v38, %v3673_v13  ;;  %v3676_v21 = vpop.f32.mrb[30].mxu0  ;;  %v3649_v11 = vpop.f32.mrb[27].mxu1 }
 0x2b2   : > { %v2716_v31 = vadd.f32 %v3647_v60, %v2056_v59  ;;  %v3650_v52 = vadd.f32 %v3649_v11, %v3648_v42  ;;  %v3677_v18 = vpop.f32.mrb[31].mxu0 }
 0x2b3   : > { %v3678_v29 = vadd.f32 %v3677_v18, %v3676_v21 }
 0x2b4   : > { %v2765_v36 = vadd.f32 %v3675_v48, %v2716_v31  ;;  %v2719_v1 = vadd.f32 %v3650_v52, %v2056_v59 }
 0x2b6   : > { %v2768_v12 = vadd.f32 %v3678_v29, %v2719_v1  ;;  %v3651_v61 = vpop.f32.mrb[28].mxu1 }
 0x2b7   : > { %v3679_v15 = vpop.f32.mrb[32].mxu0  ;;  %v3652_v26 = vpop.f32.mrb[29].mxu1 }
 0x2b8   : > { %v3653_v33 = vadd.f32 %v3652_v26, %v3651_v61  ;;  %v3680_v0 = vpop.f32.mrb[33].mxu0  ;;  %v3654_v45 = vpop.f32.mrb[30].mxu1 }
 0x2b9   : > { %v3681_v9 = vadd.f32 %v3680_v0, %v3679_v15  ;;  %v3682_v43 = vpop.f32.mrb[34].mxu0  ;;  %v3655_v55 = vpop.f32.mrb[31].mxu1 }
 0x2ba   : > { %v2724_v62 = vadd.f32 %v3653_v33, %v2056_v59  ;;  %v3656_v51 = vadd.f32 %v3655_v55, %v3654_v45  ;;  %v3683_v5 = vpop.f32.mrb[35].mxu0 }
 0x2bb   : > { %v3684_v37 = vadd.f32 %v3683_v5, %v3682_v43 }
 0x2bc   : > { %v2773_v56 = vadd.f32 %v3681_v9, %v2724_v62  ;;  %v2727_v22 = vadd.f32 %v3656_v51, %v2056_v59 }
 0x2be   : > { %v2776_v30 = vadd.f32 %v3684_v37, %v2727_v22 }
 0x2ce   : > { %v3701_v32 = vpop.f32.mrb[32].mxu1 }
 0x2cf   : > { %v3729_v35 = vpop.f32.mrb[36].mxu0  ;;  %v3702_v58 = vpop.f32.mrb[33].mxu1 }
 0x2d0   : > { %v3703_v8 = vadd.f32 %v3702_v58, %v3701_v32  ;;  %v3730_v49 = vpop.f32.mrb[37].mxu0  ;;  %v3704_v53 = vpop.f32.mrb[34].mxu1 }
 0x2d1   : > { %v3731_v23 = vadd.f32 %v3730_v49, %v3729_v35  ;;  %v3732_v50 = vpop.f32.mrb[38].mxu0  ;;  %v3705_v3 = vpop.f32.mrb[35].mxu1 }
 0x2d2   : > { %v2814_v25 = vadd.f32 %v3703_v8, %v2765_v36  ;;  %v3706_v39 = vadd.f32 %v3705_v3, %v3704_v53  ;;  %v3733_v24 = vpop.f32.mrb[39].mxu0 }
 0x2d3   : > { %v3734_v41 = vadd.f32 %v3733_v24, %v3732_v50 }
 0x2d4   : > { %v2863_v44 = vadd.f32 %v3731_v23, %v2814_v25  ;;  %v2817_v34 = vadd.f32 %v3706_v39, %v2768_v12 }
 0x2d6   : > { %v2866_v46 = vadd.f32 %v3734_v41, %v2817_v34  ;;  %v3707_v28 = vpop.f32.mrb[36].mxu1 }
 0x2d7   : > { %v3735_v14 = vpop.f32.mrb[40].mxu0  ;;  %v3708_v2 = vpop.f32.mrb[37].mxu1 }
 0x2d8   : > { %v3709_v63 = vadd.f32 %v3708_v2, %v3707_v28  ;;  %v3736_v27 = vpop.f32.mrb[41].mxu0  ;;  %v3710_v17 = vpop.f32.mrb[38].mxu1 }
 0x2d9   : > { %v3737_v54 = vadd.f32 %v3736_v27, %v3735_v14  ;;  %v3738_v7 = vpop.f32.mrb[42].mxu0  ;;  %v3711_v10 = vpop.f32.mrb[39].mxu1 }
 0x2da   : > { %v2822_v19 = vadd.f32 %v3709_v63, %v2773_v56  ;;  %v3712_v40 = vadd.f32 %v3711_v10, %v3710_v17  ;;  %v3739_v16 = vpop.f32.mrb[43].mxu0 }
 0x2db   : > { %v3740_v20 = vadd.f32 %v3739_v16, %v3738_v7 }
 0x2dc   : > { %v2871_v57 = vadd.f32 %v3737_v54, %v2822_v19  ;;  %v2825_v47 = vadd.f32 %v3712_v40, %v2776_v30 }
 0x2de   : > { %v2874_v6 = vadd.f32 %v3740_v20, %v2825_v47 }
 0x2ef   : > { %v3757_v13 = vpop.f32.mrb[40].mxu1 }
 0x2f0   : > { %v3785_v59 = vpop.f32.mrb[44].mxu0  ;;  %v3758_v4 = vpop.f32.mrb[41].mxu1 }
 0x2f1   : > { %v3759_v60 = vadd.f32 %v3758_v4, %v3757_v13  ;;  %v3786_v38 = vpop.f32.mrb[45].mxu0  ;;  %v3760_v42 = vpop.f32.mrb[42].mxu1 }
 0x2f2   : > { %v3787_v48 = vadd.f32 %v3786_v38, %v3785_v59  ;;  %v3788_v21 = vpop.f32.mrb[46].mxu0  ;;  %v3761_v11 = vpop.f32.mrb[43].mxu1 }
 0x2f3   : > { %v2912_v31 = vadd.f32 %v3759_v60, %v2863_v44  ;;  %v3762_v52 = vadd.f32 %v3761_v11, %v3760_v42  ;;  %v3789_v18 = vpop.f32.mrb[47].mxu0 }
 0x2f4   : > { %v3790_v29 = vadd.f32 %v3789_v18, %v3788_v21 }
 0x2f5   : > { %v2915_v36 = vadd.f32 %v3762_v52, %v2866_v46  ;;  %v2961_v1 = vadd.f32 %v3787_v48, %v2912_v31 }
 0x2f7   : > { %v3763_v12 = vpop.f32.mrb[44].mxu1  ;;  %v2964_v61 = vadd.f32 %v3790_v29, %v2915_v36 }
 0x2f8   : > { %v3791_v15 = vpop.f32.mrb[48].mxu0  ;;  %v3764_v26 = vpop.f32.mrb[45].mxu1 }
 0x2f9   : > { %v3765_v33 = vadd.f32 %v3764_v26, %v3763_v12  ;;  %v3792_v0 = vpop.f32.mrb[49].mxu0  ;;  %v3766_v45 = vpop.f32.mrb[46].mxu1 }
 0x2fa   : > { %v3793_v9 = vadd.f32 %v3792_v0, %v3791_v15  ;;  %v3794_v43 = vpop.f32.mrb[50].mxu0  ;;  %v3767_v55 = vpop.f32.mrb[47].mxu1 }
 0x2fb   : > { %v2920_v62 = vadd.f32 %v3765_v33, %v2871_v57  ;;  %v3768_v51 = vadd.f32 %v3767_v55, %v3766_v45  ;;  %v3795_v5 = vpop.f32.mrb[51].mxu0 }
 0x2fc   : > { %v3796_v37 = vadd.f32 %v3795_v5, %v3794_v43 }
 0x2fd   : > { %v2923_v56 = vadd.f32 %v3768_v51, %v2874_v6  ;;  %v2969_v22 = vadd.f32 %v3793_v9, %v2920_v62 }
 0x2ff   : > { %v2972_v30 = vadd.f32 %v3796_v37, %v2923_v56 }
 0x310   : > { %v3845_v32 = vpop.f32.mrb[48].mxu1 }
 0x311   : > { %v3018_v35 = vadd.f32 %v3845_v32, %v2969_v22  ;;  %v3009_v58 = vpop.f32.mrb[49].mxu1 }
 0x312   : > { %v3010_v8 = vadd.f32 %v3009_v58, %v2961_v1  ;;  %v3846_v49 = vpop.f32.mrb[50].mxu1 }
 0x313   : > { %v3026_v53 = vsub.f32 0.0, %v3018_v35  ;;  %v3021_v23 = vadd.f32 %v3846_v49, %v2972_v30  ;;  %v3012_v50 = vpop.f32.mrb[51].mxu1 }
 0x314   : > { %v3024_v3 = vsub.f32 0.0, %v3010_v8  ;;  %v3013_v25 = vadd.f32 %v3012_v50, %v2964_v61 }
 0x315   : > { %v3032_v39 = vmul.f32 1.442695, %v3026_v53  ;;  %v3027_v24 = vsub.f32 0.0, %v3021_v23 }
 0x316   : > { %v3028_v41 = vmul.f32 1.442695, %v3024_v3  ;;  %v3025_v44 = vsub.f32 0.0, %v3013_v25 }
 0x317   : > { %4140 = vpow2.f32 %v3032_v39  ;;  %v3034_v34 = vmul.f32 1.442695, %v3027_v24 }
 0x318   : > { %4142 = vpow2.f32 %v3028_v41  ;;  %v3030_v46 = vmul.f32 1.442695, %v3025_v44 }
 0x319   : > { %4144 = vpow2.f32 %v3034_v34 }
 0x31a   : > { %4146 = vpow2.f32 %v3030_v46 }
 0x321   : > { %v4141_v28 = vpop.eup %4140 }
 0x322   : > { %v4143_v14 = vpop.eup %4142  ;;  %v3038_v2 = vadd.f32 1.0, %v4141_v28 }
 0x323   : > { %v4145_v63 = vpop.eup %4144  ;;  %v3036_v27 = vadd.f32 1.0, %v4143_v14 }
 0x324   : > { %v4147_v17 = vpop.eup %4146  ;;  %4148 = vrcp.f32 %v3038_v2  ;;  %v3039_v54 = vadd.f32 1.0, %v4145_v63 }
 0x325   : > { %4150 = vrcp.f32 %v3036_v27  ;;  %v3037_v7 = vadd.f32 1.0, %v4147_v17 }
 0x326   : > { %4152 = vrcp.f32 %v3039_v54 }
 0x327   : > { %4154 = vrcp.f32 %v3037_v7 }
 0x32e   : > { %v4149_v10 = vpop.eup %4148 }
 0x32f   : > { %v4151_v19 = vpop.eup %4150  ;;  %3046 = vst [vmem:[%s256_s28 + $0x10] sm:$0xff] %v4149_v10 }
 0x330   : > { %v4153_v40 = vpop.eup %4152  ;;  %3044 = vst [vmem:[%s256_s28] sm:$0xff] %v4151_v19 }
 0x331   : > { %v4155_v16 = vpop.eup %4154  ;;  %3047 = vst [vmem:[%s256_s28 + $0x18] sm:$0xff] %v4153_v40 }
 0x332   : > { %3045 = vst [vmem:[%s256_s28 + $0x8] sm:$0xff] %v4155_v16 }
 0x333   : > { %4255 = shalt.err (!%p4252_p0)
}
 0x334   : > { %s4256_s10 = scalar_lea.hbm %s5108_s5, 512  ;;  %s4260_s14 = scalar_lea.hbm %s5158_s4, 1024 }
 0x335   : > { %p4257_p5 = scmp.ne.s32.totalorder %s5108_s5, %s4256_s10  ;;  %p4261_p2 = scmp.lt.u32.totalorder %s5108_s5, %s5158_s4 }
 0x336   : > { %p4262_p11 = scmp.lt.u32.totalorder %s4260_s14, %s4256_s10  ;;  %p4264_p6 = scmp.lt.u32.totalorder %s4256_s10, %s5108_s5 }
 0x337   : > { %p4258_p4 = pnand %p4257_p5, %p5180_p9 }
 0x338   : > { %p4263_p8 = por %p4262_p11, %p4261_p2 }
 0x339   : > { %p4259_p10 = pneg %p4258_p4 }
 0x33a   : > { %p4265_p12 = por %p4264_p6, %p4263_p8 }
 0x33c   : > { %p4266_p3 = pnand %p4265_p12, %p4259_p10 }
 0x33e   : > { %4269 = shalt.err (!%p4266_p3)
}
 0x33f   : > { %s4333_s29 = smov 128   ;;  %s4334_s28 = smov 8  }
 0x340   : > { %3861 = dma.vmem_to_hbm [thread:$0]  (%p5180_p9), %s5110_s30, 512, %s5108_s5, %s3049_s19, %s4333_s29, %s4333_s29, %s4334_s28  }
 0x341 PF: > { %s3078_s6 = sand.u32 1, %s4308_s15   ;;  %p5181_p13 = scmp.ne.s32.totalorder %s5163_s22, 0 }
 0x342   : > { %p5182_p7 = scmp.ge.s32.totalorder %s4320_s18, 2  ;;  %s3079_s9 = scalar_lea.sflag [#allocation4], %s3078_s6 }
 0x344   : > { %p3878_p1 = pnand %p5182_p7, %p5181_p13 }
 0x346   : > { %4303 = dma.done.wait (!%p3878_p1), %s3079_s9, 512  }
 0x347   : > { %4305 = vsyncadd (!%p3878_p1), %s3079_s9, 4294966784  ;;  %p20_p0 = scmp.ge.s32.totalorder %s4468_s12, 4   ;;  %s5183_s15 = smov %s4312_s16 }
 0x348   : > { %s5184_s16 = smov %s4316_s17  ;;  %s5185_s17 = smov %s4478_s20 }
 0x349   : > { %s5186_s18 = smov %s4468_s12  ;;  %22 = sbr.rel (!%p20_p0) target bundleno = 8 (0x8), region = 100 }
 0x350   :  { %3084 = vsyncpa [#allocation3], 1 }
 0x351   :  { %3086 = vsyncpa [#allocation3 + $0x1], 1 }
 0x352   :  { %3087 = vsyncpa [#allocation10], 1 }
 0x353   :  { %3089 = vsyncpa [#allocation10 + $0x1], 1 }
 0x354   :  { %3090 = vsyncpa [#allocation4], 1 }
 0x355   :  { %3092 = vsyncpa [#allocation4 + $0x1], 1 }
 0x356   :  { %3093 = vsyncpa [#allocation5], 1 }
 0x357   :  { %3095 = vsyncpa [#allocation5 + $0x1], 1 }
 0x358   :  { %3096 = vsyncpa [#allocation6], 1 }
 0x359   :  { %3098 = vsyncpa [#allocation6 + $0x1], 1 }

// kernel: tpu_custom_call.1
= control target key start
LH: loop header
LB: loop body
LE: loop exit
PB: predicated region body
PF: predicated region fallthrough
CT: control target
= control target key end

     0   :  { %9 = vsyncpa [#allocation5], 0  ;;  %s5154_s0 = inlined_call_operand.hbm [shape: f32[4], index: 0, kind: input, shape index: {}]   ;;  %s5155_s1 = inlined_call_operand.vmem [shape: f32[3], index: 1, kind: input, shape index: {}]   ;;  %s5156_s2 = inlined_call_operand.hbm [shape: bf16[2,1664,128], index: 2, kind: input, shape index: {}]   ;;  %s5157_s3 = inlined_call_operand.hbm [shape: f32[4,4,16,128], index: 3, kind: input, shape index: {}]   ;;  %s5158_s4 = inlined_call_operand.hbm [shape: f32[4,16,128], index: 4, kind: output, shape index: {}]  }
   0x1   :  { %10 = vsyncpa [#allocation6], 0 }
   0x2   :  { %11 = vsyncpa [#allocation3], 0 }
   0x3   :  { %12 = vsyncpa [#allocation10], 0 }
   0x4   :  { %14 = vsyncpa [#allocation10 + $0x1], 0 }
   0x5   :  { %15 = vsyncpa [#allocation4], 0 }
   0x6   :  { %17 = vsyncpa [#allocation4 + $0x1], 0  ;;  %s4360_s15 = smov 0   ;;  %s4362_s16 = smov 0  }
   0x7   :  { %s4364_s17 = smov 0   ;;  %s4366_s18 = smov 0  }
   0x8 LB: > { %s4381_s19 = sadd.s32 4294967295, %s4320_s18   ;;  %s3172_s20 = sadd.s32 4294967294, %s4320_s18   ;;  %s4320_s18 = sphi %s4366_s18, %s5186_s18   ;;  %s4316_s17 = sphi %s4364_s17, %s5185_s17   ;;  %s4312_s16 = sphi %s4362_s16, %s5184_s16   ;;  %s4308_s15 = sphi %s4360_s15, %s5183_s15  }
   0x9   : > { %p106_p0 = scmp.ne.s32.totalorder %s4312_s16, %s4308_s15  ;;  %p5159_p1 = scmp.eq.s32.totalorder %s4381_s19, 0 }
   0xa   : > { %p136_p3 = scmp.eq.s32.totalorder %s3172_s20, 1  ;;  %p3173_p5 = scmp.ge.s32.totalorder %s4320_s18, 1 }
   0xb   : > { %p4390_p4 = por %p5159_p1, %p106_p0  ;;  %p143_p7 = scmp.lt.s32.totalorder %s4320_s18, 3 }
   0xc   : > { %p4395_p6 = por %p136_p3, %p106_p0  ;;  %s165_s26 = sshll.u32 %s5155_s1, 4  ;;  %s166_s26 = int_to_ptr.vmem [resolvable:$true] %s165_s26 }
   0xd   : > { %s5162_s21 = scalar_select %p4390_p4, 1, 0 }
   0xe   : > { %s5163_s22 = scalar_select %p4395_p6, 1, 0 }
   0xf   : > { %p4400_p8 = pnand %p3173_p5, %p143_p7  ;;  %s4322_s28 = smov [#allocation8]  }
  0x10   : > { %s175_s29 = sshll.u32 %s4322_s28, 4  ;;  %s4156_s6 = scalar_lea.hbm %s5154_s0, 16  ;;  %s4416_s29 = int_to_ptr.vmem [resolvable:$true] %s175_s29 }
  0x11   : > { %p3863_p10 = pneg %p4400_p8  ;;  %p4157_p12 = scmp.ne.s32.totalorder %s5154_s0, %s4156_s6 }
  0x12   : > { %p4163_p5 = scmp.lt.u32.totalorder %s4156_s6, %s5154_s0 }
  0x13   : > { %p4412_p11 = pnand %p3863_p10, %p5159_p1 }
  0x15   : > { %p4158_p13 = pneg %p4412_p11 }
  0x17   : > { %p4159_p0 = pnand %p4158_p13, %p4157_p12 }
  0x19   : > { %p4160_p3 = pneg %p4159_p0 }
  0x1b   : > { %p4165_p7 = pnand %p4163_p5, %p4160_p3 }
  0x1d   : > { %4168 = shalt.err (!%p4165_p7)
}
  0x1e   : > { %s4323_s11 = smov [#allocation2]   ;;  %s4169_s14 = scalar_lea.vmem %s166_s26, 16 }
  0x1f   : > { %3866 = dma.hbm_to_smem (!%p4412_p11), %s5154_s0, 16, %s4323_s11, [#allocation5]  }
  0x20   : > { %p4170_p10 = scmp.ne.s32.totalorder %s166_s26, %s4169_s14  ;;  %p4177_p9 = scmp.lt.s32.totalorder %s166_s26, %s166_s26 }
  0x21   : > { %p4178_p1 = scmp.lt.s32.totalorder %s4169_s14, %s4169_s14 }
  0x22   : > { %p4172_p12 = pnand %p4170_p10, %p4158_p13 }
  0x23   : > { %p4179_p2 = por %p4178_p1, %p4177_p9 }
  0x24   : > { %p4173_p0 = pneg %p4172_p12 }
  0x26   : > { %p4180_p6 = pnand %p4179_p2, %p4173_p0 }
  0x28   : > { %4183 = shalt.err (!%p4180_p6)
}
  0x29   : > { %s4324_s20 = smov [#allocation7]   ;;  %s4184_s28 = scalar_lea.hbm %s5156_s2, 26624 }
  0x2a   : > { %3869 = dma.vmem_to_smem (!%p4412_p11), %s166_s26, 16, %s4324_s20, [#allocation6]  }
  0x2b   : > { %p4185_p3 = scmp.ne.s32.totalorder %s5156_s2, %s4184_s28  ;;  %p4191_p1 = scmp.lt.u32.totalorder %s4184_s28, %s5156_s2 }
  0x2d   : > { %p4187_p5 = pnand %p4185_p3, %p4158_p13 }
  0x2f   : > { %p4188_p7 = pneg %p4187_p5 }
  0x31   : > { %p4193_p2 = pnand %p4191_p1, %p4188_p7 }
  0x33   : > { %4196 = shalt.err (!%p4193_p2)
}
  0x34   : > { %s4197_s26 = scalar_lea.vmem %s4416_s29, 26624  ;;  %p4205_p12 = scmp.lt.s32.totalorder %s4416_s29, %s4416_s29 }
  0x35   : > { %p4198_p6 = scmp.ne.s32.totalorder %s4416_s29, %s4197_s26  ;;  %p4206_p0 = scmp.lt.s32.totalorder %s4197_s26, %s4197_s26 }
  0x37   : > { %p4200_p9 = pnand %p4198_p6, %p4158_p13  ;;  %p4207_p3 = por %p4206_p0, %p4205_p12 }
  0x39   : > { %p4201_p10 = pneg %p4200_p9 }
  0x3b   : > { %p4208_p5 = pnand %p4207_p3, %p4201_p10 }
  0x3d   : > { %4211 = shalt.err (!%p4208_p5)
}
  0x3e   : > { %s4325_s8 = smov 64   ;;  %s4326_s9 = smov 4  }
  0x3f   : > { %3872 = dma.hbm_to_vmem [thread:$0]  (!%p4412_p11), %s5156_s2, 26624, %s4416_s29, [#allocation3], %s4325_s8, %s4325_s8, %s4326_s9  }
  0x40   : > { %s4468_s12 = sadd.s32 1, %s4320_s18   ;;  %s93_s14 = sadd.s32 1, %s4316_s17 }
  0x41   : > { %s90_s13 = ssub.s32 %s4320_s18, %s4468_s12  ;;  %p100_p7 = scmp.ne.s32.totalorder %s4316_s17, %s4312_s16 }
  0x42   : > { %p91_p13 = scmp.eq.s32.totalorder %s90_s13, 0  ;;  %p101_p1 = scmp.eq.s32.totalorder %s4320_s18, 0 }
  0x43   : > { %p3884_p2 = scmp.lt.s32.totalorder %s4320_s18, 2  ;;  %p5166_p9 = scmp.eq.s32.totalorder %s4381_s19, 1 }
  0x44   : > { %s4478_s20 = scalar_select %p91_p13, %s4316_s17, %s93_s14  }
  0x45   : > { %p102_p6 = por %p101_p1, %p100_p7  ;;  %p4482_p10 = por %p5166_p9, %p100_p7 }
  0x46   : > { %s189_s27 = sand.u32 1, %s4316_s17   ;;  %s3448_s25 = sshll.u32 %s4320_s18, 11 }
  0x47   : > { %s5167_s24 = scalar_select %p4482_p10, 1, 0 }
  0x48   : > { %s3178_s29 = sshll.u32 %s189_s27, 7  ;;  %s4491_s5 = scalar_lea.hbm %s5157_s3, %s3448_s25 }
  0x49   : > { %s193_s6 = scalar_lea.vmem [#allocation9], %s3178_s29  ;;  %p4493_p11 = pnand %p3884_p2, %p102_p6 }
  0x4a   : > { %s201_s7 = sshll.u32 %s193_s6, 4  ;;  %s4499_s8 = scalar_lea.sflag [#allocation10], %s189_s27  ;;  %s4497_s7 = int_to_ptr.vmem [resolvable:$true] %s201_s7 }
  0x4b   : > { %s4212_s9 = scalar_lea.hbm %s4491_s5, 2048  ;;  %p4214_p0 = pneg %p4493_p11 }
  0x4c   : > { %p4213_p12 = scmp.ne.s32.totalorder %s4491_s5, %s4212_s9  ;;  %s4217_s13 = scalar_lea.hbm %s5157_s3, 4096 }
  0x4d   : > { %p4218_p13 = scmp.lt.u32.totalorder %s4491_s5, %s5157_s3  ;;  %p4219_p7 = scmp.lt.u32.totalorder %s4217_s13, %s4212_s9 }
  0x4e   : > { %p4215_p3 = pnand %p4214_p0, %p4213_p12  ;;  %p4221_p2 = scmp.lt.u32.totalorder %s4212_s9, %s4491_s5 }
  0x4f   : > { %p4220_p1 = por %p4219_p7, %p4218_p13 }
  0x50   : > { %p4216_p5 = pneg %p4215_p3 }
  0x51   : > { %p4222_p6 = por %p4221_p2, %p4220_p1 }
  0x53   : > { %p4223_p9 = pnand %p4222_p6, %p4216_p5 }
  0x55   : > { %4226 = shalt.err (!%p4223_p9)
}
  0x56   : > { %s4227_s27 = scalar_lea.vmem %s4497_s7, 2048  ;;  %s4327_s29 = smov [#allocation9]  }
  0x57   : > { %p4228_p12 = scmp.ne.s32.totalorder %s4497_s7, %s4227_s27  ;;  %s4232_s28 = sshll.u32 %s4327_s29, 4  ;;  %s4233_s28 = int_to_ptr.vmem [resolvable:$false] %s4232_s28 }
  0x58   : > { %s4234_s30 = scalar_lea.vmem %s4233_s28, 4096  ;;  %p4235_p4 = scmp.lt.s32.totalorder %s4497_s7, %s4233_s28 }
  0x59   : > { %p4230_p3 = pnand %p4228_p12, %p4214_p0  ;;  %p4236_p13 = scmp.lt.s32.totalorder %s4234_s30, %s4227_s27 }
  0x5b   : > { %p4231_p10 = pneg %p4230_p3  ;;  %p4237_p7 = por %p4236_p13, %p4235_p4 }
  0x5d   : > { %p4238_p1 = pnand %p4237_p7, %p4231_p10 }
  0x5f   : > { %4241 = shalt.err (!%p4238_p1)
}
  0x60   : > { %s4328_s6 = smov 128   ;;  %s4329_s9 = smov 8  }
  0x61   : > { %3876 = dma.hbm_to_vmem [thread:$0]  (!%p4493_p11), %s4491_s5, 2048, %s4497_s7, %s4499_s8, %s4328_s6, %s4328_s6, %s4329_s9  }
  0x62   : > { %213 = sbr.rel (%p4400_p8) target bundleno = 833 (0x341), region = 36  ;;  %p5169_p0 = scmp.eq.s32.totalorder (!%p4400_p8), %s4381_s19, 0 }
  0x69   : > { %4287 = dma.done.wait (%p5169_p0), [#allocation5], 16   ;;  %p5170_p5 = pmov %p5169_p0 }
  0x6a   : > { %p5171_p4 = pmov %p5169_p0 }
  0x6b   : > { %4289 = vsyncadd (%p5170_p5), [#allocation5], 4294967280 }
  0x6c   : > { %4291 = dma.done.wait (%p5171_p4), [#allocation6], 16   ;;  %p5172_p10 = pmov %p5169_p0 }
  0x6d   : > { %p5173_p2 = pmov %p5169_p0 }
  0x6e   : > { %4293 = vsyncadd (%p5172_p10), [#allocation6], 4294967280 }
  0x6f   : > { %4295 = dma.done.wait (%p5173_p2), [#allocation3], 26624   ;;  %p5174_p11 = pmov %p5169_p0 }
  0x70   : > { %s4542_s23 = sand.u32 1, %s4312_s16   ;;  %p5175_p8 = scmp.ne.s32.totalorder %s5162_s21, 0 }
  0x71   : > { %4297 = vsyncadd (%p5174_p11), [#allocation3], 4294940672  ;;  %s3186_s5 = sshll.u32 %s4542_s23, 7  ;;  %s228_s7 = scalar_lea.sflag [#allocation10], %s4542_s23 }
  0x72   : > { %s4546_s26 = scalar_lea.vmem [#allocation9], %s3186_s5 }
  0x73   : > { %4299 = dma.done.wait (%p5175_p8), %s228_s7, 2048  }
  0x74   : > { %4301 = vsyncadd (%p5175_p8), %s228_s7, 4294965248 }
  0x75   : > { %236 = sfence }
  0x76   : > { %v3932_v0 = vld [vmem:[#allocation8 + $0x40] sm:$0xff]   ;;  %v3936_v4 = vld [vmem:[#allocation8 + $0x48] sm:$0xff]   ;;  %v3940_v8 = vld [vmem:[#allocation8 + $0x50] sm:$0xff]   ;;  %s260_s21 = sld [smem:[#allocation2]]  ;;  %s3188_s8 = sld [smem:[#allocation2 + $0x1]]  ;;  %vm538_vm0 = vcmask 1045504  }
  0x77   : > { %v3933_v1 = vld [vmem:[#allocation8] sm:$0xff]   ;;  %3451 = vmatprep.subr.bf16.mxu0 %v3932_v0  ;;  %v3937_v5 = vld [vmem:[#allocation8 + $0x8] sm:$0xff]   ;;  %v3941_v9 = vld [vmem:[#allocation8 + $0x10] sm:$0xff]   ;;  %s3189_s10 = sld [smem:[#allocation2 + $0x2]]  ;;  %s3190_s11 = sld [smem:[#allocation2 + $0x3]]  ;;  %vm559_vm1 = vcmask 1046528  }
  0x78   : > { %v3934_v2 = vld [vmem:[#allocation8 + $0xc0] sm:$0xff]   ;;  %3452 = vmatpush3.bf16.msra.mxu0 %v3933_v1  ;;  %v3938_v6 = vld [vmem:[#allocation8 + $0xc8] sm:$0xff]   ;;  %v3942_v10 = vld [vmem:[#allocation8 + $0xd0] sm:$0xff]   ;;  %s264_s13 = sld [smem:[#allocation7]]  ;;  %vm588_vm3 = vcmask 1044480   ;;  %vm4331_vm4 = vmmov 1  }
  0x79   : > { %v3935_v3 = vld [vmem:[#allocation8 + $0x80] sm:$0xff]   ;;  %3479 = vmatprep.subr.bf16.mxu1 %v3934_v2  ;;  %3453 = vmatprep.subr.bf16.mxu0 %v3936_v4  ;;  %v3939_v7 = vld [vmem:[#allocation8 + $0x88] sm:$0xff]   ;;  %v3943_v11 = vld [vmem:[#allocation8 + $0x90] sm:$0xff]   ;;  %vm618_vm6 = vcmask 1042432   ;;  %vm648_vm7 = vcmask 1040384   ;;  %vm603_vm8 = vcmask 1043456  }
  0x7a   : > { %3480 = vmatpush3.bf16.msra.mxu1 %v3935_v3  ;;  %v3944_v12 = vld [vmem:[#allocation8 + $0x58] sm:$0xff]   ;;  %v3948_v16 = vld [vmem:[#allocation8 + $0x60] sm:$0xff]   ;;  %v3952_v20 = vld [vmem:[#allocation8 + $0x68] sm:$0xff]   ;;  %vm633_vm9 = vcmask 1041408   ;;  %s3203_s14 = sld [smem:[#allocation7 + $0x1]]  ;;  %s3322_s25 = sld [smem:[#allocation7 + $0x2]] }
  0x7b   : > { %3481 = vmatprep.subr.bf16.mxu1 %v3938_v6  ;;  %v3945_v13 = vld [vmem:[#allocation8 + $0x18] sm:$0xff]   ;;  %v3949_v17 = vld [vmem:[#allocation8 + $0x20] sm:$0xff]   ;;  %v3953_v21 = vld [vmem:[#allocation8 + $0x28] sm:$0xff]   ;;  %s3187_s27 = sshll.u32 %s4542_s23, 5  ;;  %s3450_s29 = sshll.u32 %s4381_s19, 9 }
  0x7c   : > { %3454 = vmatpush3.bf16.msra.mxu0 %v3937_v5  ;;  %v3946_v14 = vld [vmem:[#allocation8 + $0xd8] sm:$0xff]   ;;  %v3950_v18 = vld [vmem:[#allocation8 + $0xe0] sm:$0xff]   ;;  %v3954_v22 = vld [vmem:[#allocation8 + $0xe8] sm:$0xff]   ;;  %v4558_v39 = vstv %s260_s21  ;;  %v4560_v40 = vstv %s3188_s8  ;;  %s256_s28 = scalar_lea.vmem [#allocation11], %s3187_s27  ;;  %s5108_s5 = scalar_lea.hbm %s5158_s4, %s3450_s29 }
  0x7d   : > { %3455 = vmatprep.subr.bf16.mxu0 %v3940_v8  ;;  %v3947_v15 = vld [vmem:[#allocation8 + $0x98] sm:$0xff]   ;;  %v3951_v19 = vld [vmem:[#allocation8 + $0xa0] sm:$0xff]   ;;  %v3955_v23 = vld [vmem:[#allocation8 + $0xa8] sm:$0xff]   ;;  %v4569_v48 = vstv %s3189_s10  ;;  %v4572_v50 = vstv %s3190_s11  ;;  %s3063_s30 = sshll.u32 %s256_s28, 4  ;;  %s3049_s19 = scalar_lea.sflag [#allocation4], %s4542_s23  ;;  %s5110_s30 = int_to_ptr.vmem [resolvable:$true] %s3063_s30 }
  0x7e   : > { %3482 = vmatpush3.bf16.msra.mxu1 %v3939_v7  ;;  %v3956_v24 = vld [vmem:[#allocation8 + $0x70] sm:$0xff]   ;;  %v3960_v28 = vld [vmem:[#allocation8 + $0x78] sm:$0xff]   ;;  %v266_v31 = vld [vmem:[%s4546_s26] sm:$0xff]  ;;  %v4567_v47 = vstv %s264_s13  ;;  %s4242_s7 = scalar_lea.vmem %s5110_s30, 512  ;;  %p5180_p9 = scmp.ne.s32.totalorder %s5167_s24, 0 }
  0x7f   : > { %3483 = vmatprep.subr.bf16.mxu1 %v3942_v10  ;;  %v3957_v25 = vld [vmem:[#allocation8 + $0x30] sm:$0xff]   ;;  %v3961_v29 = vld [vmem:[#allocation8 + $0x38] sm:$0xff]   ;;  %v267_v32 = vld [vmem:[%s4546_s26 + $0x8] sm:$0xff]  ;;  %v271_v42 = vmul.f32 %v4558_v39, %v266_v31  ;;  %p4243_p6 = scmp.ne.s32.totalorder %s5110_s30, %s4242_s7 }
  0x80   : > { %3456 = vmatpush3.bf16.msra.mxu0 %v3941_v9  ;;  %v3958_v26 = vld [vmem:[#allocation8 + $0xf0] sm:$0xff]   ;;  %v3962_v30 = vld [vmem:[#allocation8 + $0xf8] sm:$0xff]   ;;  %v3195_v35 = vld [vmem:[%s4546_s26 + $0x20] sm:$0xff]  ;;  %v272_v43 = vmul.f32 %v4558_v39, %v267_v32  ;;  %v4330_v9 = vmov 0.0  }
  0x81   : > { %3457 = vmatprep.subr.bf16.mxu0 %v3944_v12  ;;  %v3959_v27 = vld [vmem:[#allocation8 + $0xb0] sm:$0xff]   ;;  %v3192_v34 = vld [vmem:[%s4546_s26 + $0x18] sm:$0xff]  ;;  %v3196_v36 = vld [vmem:[%s4546_s26 + $0x28] sm:$0xff]  ;;  %v275_v51 = vadd.f32 %v271_v42, %v4567_v47  ;;  %v299_v53 = vmul.f32 %v3195_v35, %v4569_v48  ;;  %v4598_v10 = vrot.slane %v4330_v9, 2  ;;  %p4244_p12 = pnand %p4243_p6, %p5180_p9 }
  0x82   : > { %3484 = vmatpush3.bf16.msra.mxu1 %v3943_v11  ;;  %v3191_v33 = vld [vmem:[%s4546_s26 + $0x10] sm:$0xff]  ;;  %v3963_v37 = vld [vmem:[#allocation8 + $0xb8] sm:$0xff]   ;;  %v3964_v38 = vld [vmem:[#allocation8 + $0x140] sm:$0xff]   ;;  %v286_v45 = vmul.f32 %v3192_v34, %v4560_v40  ;;  %v276_v52 = vadd.f32 %v272_v43, %v4567_v47  ;;  %v300_v54 = vmul.f32 %v3196_v36, %v4569_v48 }
  0x83   : > { %3485 = vmatprep.subr.bf16.mxu1 %v3946_v14  ;;  %v3199_v41 = vld [vmem:[%s4546_s26 + $0x30] sm:$0xff]  ;;  %v285_v44 = vmul.f32 %v3191_v33, %v4560_v40  ;;  %v3966_v46 = vld [vmem:[#allocation8 + $0x1c0] sm:$0xff]   ;;  %v3200_v49 = vld [vmem:[%s4546_s26 + $0x38] sm:$0xff]  ;;  %p4245_p3 = pneg %p4244_p12 }
  0x84   : > { %3458 = vmatpush3.bf16.msra.mxu0 %v3945_v13  ;;  %v290_v56 = vadd.f32 %v286_v45, %v276_v52  ;;  %v313_v57 = vmul.f32 %v3199_v41, %v4572_v50  ;;  %v314_v58 = vmul.f32 %v3200_v49, %v4572_v50  ;;  %vm3308_vm2 = vmneg %vm538_vm0  ;;  %v3970_v31 = vld [vmem:[#allocation8 + $0x1c8] sm:$0xff]   ;;  %v3193_v34 = vld [vmem:[%s4546_s26 + $0x50] sm:$0xff] }
  0x85   : > { %3459 = vmatprep.subr.bf16.mxu0 %v3948_v16  ;;  %v289_v55 = vadd.f32 %v285_v44, %v275_v51  ;;  %vm4601_vm5 = vmpackc.low %vm4331_vm4, %vm3308_vm2  ;;  %v269_v32 = vld [vmem:[%s4546_s26 + $0x48] sm:$0xff]  ;;  %v3194_v35 = vld [vmem:[%s4546_s26 + $0x58] sm:$0xff]  ;;  %v287_v49 = vmul.f32 %v3193_v34, %v4560_v40 }
  0x86   : > { %3486 = vmatpush3.bf16.msra.mxu1 %v3947_v15  ;;  %v304_v60 = vadd.f32 %v300_v54, %v290_v56  ;;  %v3197_v41 = vld [vmem:[%s4546_s26 + $0x60] sm:$0xff]  ;;  %v3198_v42 = vld [vmem:[%s4546_s26 + $0x68] sm:$0xff]  ;;  %v3201_v43 = vld [vmem:[%s4546_s26 + $0x70] sm:$0xff] }
  0x87   : > { %3487 = vmatprep.subr.bf16.mxu1 %v3950_v18  ;;  %v303_v59 = vadd.f32 %v299_v53, %v289_v55  ;;  %v3202_v51 = vld [vmem:[%s4546_s26 + $0x78] sm:$0xff]  ;;  %v3972_v52 = vld [vmem:[#allocation8 + $0x150] sm:$0xff]   ;;  %v301_v54 = vmul.f32 %v3197_v41, %v4569_v48  ;;  %v302_v55 = vmul.f32 %v3198_v42, %v4569_v48  ;;  %v3971_v56 = vld [vmem:[#allocation8 + $0x188] sm:$0xff]  }
  0x88   : > { %3460 = vmatpush3.bf16.msra.mxu0 %v3949_v17  ;;  %v318_v62 = vadd.f32 %v314_v58, %v304_v60  ;;  %v315_v58 = vmul.f32 %v3201_v43, %v4572_v50  ;;  %v3976_v48 = vld [vmem:[#allocation8 + $0x158] sm:$0xff]   ;;  %vm4779_vm10 = vmpackc.low %vm538_vm0, %vm4331_vm4 }
  0x89   : > { %3461 = vmatprep.subr.bf16.mxu0 %v3952_v20  ;;  %v317_v61 = vadd.f32 %v313_v57, %v303_v59  ;;  %v3973_v59 = vld [vmem:[#allocation8 + $0x110] sm:$0xff]  }
  0x8a   : > { %3488 = vmatpush3.bf16.msra.mxu1 %v3951_v19  ;;  %v322_v0 = vmax.f32 %v318_v62, 0.0  ;;  %v3965_v19 = vld [vmem:[#allocation8 + $0x100] sm:$0xff]  }
  0x8b   : > { %3489 = vmatprep.subr.bf16.mxu1 %v3954_v22  ;;  %v321_v63 = vmax.f32 %v317_v61, 0.0  ;;  %v316_v61 = vmul.f32 %v3202_v51, %v4572_v50 }
  0x8c   : > { %3462 = vmatpush3.bf16.msra.mxu0 %v3953_v21  ;;  %v4580_v2 = vrot.slane %v322_v0, 2 }
  0x8d   : > { %3463 = vmatprep.subr.bf16.mxu0 %v3956_v24  ;;  %v539_v1 = vrot.slane %v321_v63, 2  ;;  %v3975_v63 = vld [vmem:[#allocation8 + $0x190] sm:$0xff]  }
  0x8e   : > { %3490 = vmatpush3.bf16.msra.mxu1 %v3955_v23  ;;  %v4592_v5 = vsel %vm538_vm0, %v4580_v2, 0.0 }
  0x8f   : > { %3491 = vmatprep.subr.bf16.mxu1 %v3958_v26  ;;  %v4585_v3 = vsel %vm538_vm0, %v539_v1, %v4580_v2  ;;  %v4588_v4 = vsel %vm538_vm0, 0.0, %v539_v1  ;;  %v563_v8 = vrot.slane %v4592_v5, 1  ;;  %v592_v14 = vrot.slane %v4592_v5, 3 }
  0x90   : > { %3464 = vmatpush3.bf16.msra.mxu0 %v3957_v25  ;;  %v560_v6 = vrot.slane %v4588_v4, 1  ;;  %v561_v7 = vrot.slane %v4585_v3, 1  ;;  %v589_v12 = vrot.slane %v4588_v4, 3  ;;  %v590_v13 = vrot.slane %v4585_v3, 3 }
  0x91   : > { %3465 = vmatprep.subr.bf16.mxu0 %v3960_v28  ;;  %v574_v15 = vrot.slane %v4588_v4, 2  ;;  %v3310_v18 = vpack.c.bf16 %v4585_v3, %v539_v1  ;;  %v575_v20 = vrot.slane %v4585_v3, 2  ;;  %v577_v26 = vrot.slane %v4592_v5, 2  ;;  %v3968_v28 = vld [vmem:[#allocation8 + $0x148] sm:$0xff]   ;;  %v3977_v1 = vld [vmem:[#allocation8 + $0x118] sm:$0xff]  }
  0x92   : > { %3492 = vmatpush3.bf16.msra.mxu1 %v3959_v27  ;;  %v562_v16 = vsel %vm559_vm1, %v560_v6, %v561_v7  ;;  %v4613_v17 = vsel %vm559_vm1, %v561_v7, %v563_v8  ;;  %v591_v22 = vsel %vm588_vm3, %v589_v12, %v590_v13  ;;  %v4622_v23 = vsel %vm588_vm3, %v590_v13, %v592_v14  ;;  %v3967_v27 = vld [vmem:[#allocation8 + $0x180] sm:$0xff]  }
  0x93   : > { %3493 = vmatprep.subr.bf16.mxu1 %v3962_v30  ;;  %v685_v21 = vpack.c.bf16 %v4613_v17, %v562_v16  ;;  %v687_v24 = vpack.c.bf16 %v4622_v23, %v591_v22  ;;  %v576_v25 = vsel %vm538_vm0, %v574_v15, %v575_v20  ;;  %v3969_v30 = vld [vmem:[#allocation8 + $0x108] sm:$0xff]   ;;  %v4635_v36 = vsel %vm538_vm0, %v575_v20, %v577_v26  ;;  %v3978_v15 = vld [vmem:[#allocation8 + $0x1d8] sm:$0xff]  }
  0x94   : > { %3466 = vmatpush3.bf16.msra.mxu0 %v3961_v29  ;;  %v268_v29 = vld [vmem:[%s4546_s26 + $0x40] sm:$0xff]  ;;  %v686_v44 = vpack.c.bf16 %v4635_v36, %v576_v25  ;;  %v3317_v62 = vpack.c.bf16 %v4580_v2, %v4585_v3  ;;  %v619_v7 = vrot.slane %v4588_v4, 5  ;;  %v620_v50 = vrot.slane %v4585_v3, 5  ;;  %s4332_s26 = smov [#allocation11]  }
  0x95   : > { %3507 = vmatprep.subr.bf16.mxu0 %v3964_v38  ;;  %1367 = vmatprep.mubr.bf16.mxu0 %v685_v21  ;;  %v273_v33 = vmul.f32 %v4558_v39, %v268_v29  ;;  %v274_v38 = vmul.f32 %v4558_v39, %v269_v32  ;;  %v288_v39 = vmul.f32 %v3194_v35, %v4560_v40  ;;  %v3974_v40 = vld [vmem:[#allocation8 + $0x1d0] sm:$0xff]   ;;  %v622_v13 = vrot.slane %v4592_v5, 5  ;;  %v3981_v21 = vld [vmem:[#allocation8 + $0x120] sm:$0xff]   ;;  %s4246_s21 = sshll.u32 %s4332_s26, 4  ;;  %s4247_s21 = int_to_ptr.vmem [resolvable:$false] %s4246_s21 }
  0x96   : > { %3494 = vmatpush3.bf16.msra.mxu1 %v3963_v37  ;;  %1416 = vmatprep.mubr.bf16.mxu1 %v687_v24  ;;  %v4639_v37 = vsel %vm538_vm0, %v577_v26, %v4598_v10  ;;  %v3982_v24 = vld [vmem:[#allocation8 + $0x1e0] sm:$0xff]   ;;  %v4665_v26 = vsel %vm618_vm6, %v619_v7, %v620_v50  ;;  %v649_v29 = vrot.slane %v4588_v4, 7  ;;  %s4248_s8 = scalar_lea.vmem %s4247_s21, 1024  ;;  %p4249_p13 = scmp.lt.s32.totalorder %s5110_s30, %s4247_s21 }
  0x97   : > { %3535 = vmatprep.subr.bf16.mxu1 %v3966_v46  ;;  %3311 = vmatmul.mubr.msk.bf16.vlgmr.msra.gmra.mrb[0].mxu0 %vm4601_vm5, %v3310_v18  ;;  %v694_v45 = vpack.c.bf16 %v4639_v37, %v4635_v36  ;;  %v277_v46 = vadd.f32 %v273_v33, %v4567_v47  ;;  %v278_v53 = vadd.f32 %v274_v38, %v4567_v47  ;;  %v3979_v18 = vld [vmem:[#allocation8 + $0x198] sm:$0xff]   ;;  %v3983_v32 = vld [vmem:[#allocation8 + $0x1a0] sm:$0xff]   ;;  %v3984_v33 = vld [vmem:[#allocation8 + $0x168] sm:$0xff]   ;;  %p4250_p7 = scmp.lt.s32.totalorder %s4248_s8, %s4242_s7 }
  0x98   : > { %3508 = vmatpush3.bf16.msra.mxu0 %v3965_v19  ;;  %v3980_v19 = vld [vmem:[#allocation8 + $0x160] sm:$0xff]   ;;  %v4033_v37 = vld [vmem:[#allocation8 + $0x328] sm:$0xff]  }
  0x99   : > { %3509 = vmatprep.subr.bf16.mxu0 %v3968_v28  ;;  %1417 = vmatmul.mubr.bf16.vlgmr.msra.gmra.mrb[0].mxu1 %v686_v44  ;;  %v291_v57 = vadd.f32 %v287_v49, %v277_v46  ;;  %v292_v60 = vadd.f32 %v288_v39, %v278_v53  ;;  %v3985_v44 = vld [vmem:[#allocation8 + $0x128] sm:$0xff]   ;;  %v4032_v36 = vld [vmem:[#allocation8 + $0x320] sm:$0xff]   ;;  %p4251_p1 = por %p4250_p7, %p4249_p13 }
  0x9a   : > { %3536 = vmatpush3.bf16.msra.mxu1 %v3967_v27  ;;  %v4668_v27 = vsel %vm618_vm6, %v620_v50, %v622_v13  ;;  %v605_v50 = vrot.slane %v4585_v3, 4  ;;  %v3990_v13 = vld [vmem:[#allocation8 + $0x1f0] sm:$0xff]  }
  0x9b   : > { %3537 = vmatprep.subr.bf16.mxu1 %v3970_v31  ;;  %v305_v47 = vadd.f32 %v301_v54, %v291_v57  ;;  %v306_v0 = vadd.f32 %v302_v55, %v292_v60  ;;  %v652_v31 = vrot.slane %v4592_v5, 7  ;;  %v689_v7 = vpack.c.bf16 %v4668_v27, %v4665_v26  ;;  %p4252_p0 = pnand %p4251_p1, %p4245_p3 }
  0x9c   : > { %3510 = vmatpush3.bf16.msra.mxu0 %v3969_v30  ;;  %v650_v30 = vrot.slane %v4585_v3, 7 }
  0x9d   : > { %3511 = vmatprep.subr.bf16.mxu0 %v3972_v52  ;;  %v319_v6 = vadd.f32 %v315_v58, %v305_v47  ;;  %v320_v12 = vadd.f32 %v316_v61, %v306_v0 }
  0x9e   : > { %3538 = vmatpush3.bf16.msra.mxu1 %v3971_v56  ;;  %v3986_v56 = vld [vmem:[#allocation8 + $0x1e8] sm:$0xff]   ;;  %v653_v0 = vsel %vm648_vm7, %v650_v30, %v652_v31  ;;  %v3994_v31 = vld [vmem:[#allocation8 + $0x1f8] sm:$0xff]  }
  0x9f   : > { %3539 = vmatprep.subr.bf16.mxu1 %v3974_v40  ;;  %v323_v16 = vmax.f32 %v319_v6, 0.0  ;;  %v324_v20 = vmax.f32 %v320_v12, 0.0  ;;  %v3989_v6 = vld [vmem:[#allocation8 + $0x130] sm:$0xff]   ;;  %v604_v12 = vrot.slane %v4588_v4, 4 }
  0xa0   : > { %3512 = vmatpush3.bf16.msra.mxu0 %v3973_v59 }
  0xa1   : > { %3513 = vmatprep.subr.bf16.mxu0 %v3976_v48  ;;  %v542_v22 = vrot.slane %v323_v16, 2  ;;  %v4662_v25 = vrot.slane %v324_v20, 2  ;;  %v651_v48 = vsel %vm648_vm7, %v649_v29, %v650_v30  ;;  %v3991_v16 = vld [vmem:[#allocation8 + $0x1b0] sm:$0xff]   ;;  %v3993_v20 = vld [vmem:[#allocation8 + $0x138] sm:$0xff]   ;;  %v606_v27 = vsel %vm603_vm8, %v604_v12, %v605_v50 }
  0xa2   : > { %3540 = vmatpush3.bf16.msra.mxu1 %v3975_v63  ;;  %v3988_v63 = vld [vmem:[#allocation8 + $0x170] sm:$0xff]   ;;  %v635_v29 = vrot.slane %v4585_v3, 6  ;;  %v637_v30 = vrot.slane %v4592_v5, 6 }
  0xa3   : > { %3541 = vmatprep.subr.bf16.mxu1 %v3978_v15  ;;  %v4671_v28 = vsel %vm538_vm0, 0.0, %v542_v22  ;;  %v4678_v34 = vsel %vm538_vm0, %v542_v22, %v4662_v25  ;;  %v4682_v35 = vsel %vm538_vm0, %v4662_v25, 0.0  ;;  %v607_v15 = vrot.slane %v4592_v5, 4 }
  0xa4   : > { %3514 = vmatpush3.bf16.msra.mxu0 %v3977_v1  ;;  %v565_v38 = vrot.slane %v4671_v28, 1  ;;  %v594_v41 = vrot.slane %v4671_v28, 3  ;;  %v566_v42 = vrot.slane %v4678_v34, 1  ;;  %v568_v43 = vrot.slane %v4682_v35, 1  ;;  %v3987_v1 = vld [vmem:[#allocation8 + $0x1a8] sm:$0xff]  }
  0xa5   : > { %3515 = vmatprep.subr.bf16.mxu0 %v3980_v19  ;;  %v3314_v46 = vpack.c.bf16 %v4678_v34, %v542_v22  ;;  %v595_v49 = vrot.slane %v4678_v34, 3  ;;  %v597_v51 = vrot.slane %v4682_v35, 3  ;;  %v579_v52 = vrot.slane %v4671_v28, 2 }
  0xa6   : > { %3542 = vmatpush3.bf16.msra.mxu1 %v3979_v18  ;;  %v580_v53 = vrot.slane %v4678_v34, 2  ;;  %v582_v39 = vrot.slane %v4682_v35, 2  ;;  %v567_v54 = vsel %vm559_vm1, %v565_v38, %v566_v42  ;;  %v4698_v55 = vsel %vm559_vm1, %v566_v42, %v568_v43  ;;  %v3992_v18 = vld [vmem:[#allocation8 + $0x178] sm:$0xff]   ;;  %v3996_v42 = vld [vmem:[#allocation8 + $0x240] sm:$0xff]  }
  0xa7   : > { %3543 = vmatprep.subr.bf16.mxu1 %v3982_v24  ;;  %v596_v57 = vsel %vm588_vm3, %v594_v41, %v595_v49  ;;  %v698_v58 = vpack.c.bf16 %v4698_v55, %v567_v54  ;;  %v4705_v59 = vsel %vm588_vm3, %v595_v49, %v597_v51  ;;  %v691_v19 = vpack.c.bf16 %v653_v0, %v651_v48  ;;  %v3995_v41 = vld [vmem:[#allocation8 + $0x1b8] sm:$0xff]   ;;  %v3999_v48 = vld [vmem:[#allocation8 + $0x280] sm:$0xff]   ;;  %v4000_v0 = vld [vmem:[#allocation8 + $0x248] sm:$0xff]  }
  0xa8   : > { %3516 = vmatpush3.bf16.msra.mxu0 %v3981_v21  ;;  %v581_v60 = vsel %vm538_vm0, %v579_v52, %v580_v53  ;;  %v4711_v61 = vsel %vm538_vm0, %v580_v53, %v582_v39  ;;  %v700_v40 = vpack.c.bf16 %v4705_v59, %v596_v57  ;;  %v634_v21 = vrot.slane %v4588_v4, 6 }
  0xa9   : > { %3517 = vmatprep.subr.bf16.mxu0 %v3984_v33  ;;  %v699_v47 = vpack.c.bf16 %v4711_v61, %v581_v60  ;;  %1375 = vmatprep.mubr.bf16.mxu0 %v698_v58  ;;  %v624_v22 = vrot.slane %v4671_v28, 5  ;;  %v625_v24 = vrot.slane %v4678_v34, 5  ;;  %v627_v26 = vrot.slane %v4682_v35, 5 }
  0xaa   : > { %3544 = vmatpush3.bf16.msra.mxu1 %v3983_v32  ;;  %3315 = vmatmul.mubr.msk.bf16.gmra.mrb[4].mxu0 %vm4601_vm5, %v3314_v46  ;;  %v4734_v4 = vsel %vm603_vm8, %v605_v50, %v607_v15  ;;  %v654_v32 = vrot.slane %v4671_v28, 7  ;;  %v655_v33 = vrot.slane %v4678_v34, 7  ;;  %v657_v38 = vrot.slane %v4682_v35, 7 }
  0xab   : > { %3545 = vmatprep.subr.bf16.mxu1 %v3986_v56  ;;  %1424 = vmatprep.mubr.bf16.mxu1 %v700_v40  ;;  %v626_v46 = vsel %vm618_vm6, %v624_v22, %v625_v24  ;;  %v628_v49 = vsel %vm618_vm6, %v625_v24, %v627_v26  ;;  %v688_v52 = vpack.c.bf16 %v4734_v4, %v606_v27  ;;  %v3998_v56 = vld [vmem:[#allocation8 + $0x2c0] sm:$0xff]   ;;  %v609_v57 = vrot.slane %v4671_v28, 4  ;;  %v4003_v24 = vld [vmem:[#allocation8 + $0x288] sm:$0xff]   ;;  %v4005_v27 = vld [vmem:[#allocation8 + $0x210] sm:$0xff]  }
  0xac   : > { %3518 = vmatpush3.bf16.msra.mxu0 %v3985_v44  ;;  %1425 = vmatmul.mubr.bf16.gmra.mrb[4].mxu1 %v699_v47  ;;  %v3997_v44 = vld [vmem:[#allocation8 + $0x200] sm:$0xff]   ;;  %v636_v53 = vsel %vm633_vm9, %v634_v21, %v635_v29  ;;  %v638_v54 = vsel %vm633_vm9, %v635_v29, %v637_v30  ;;  %v610_v58 = vrot.slane %v4678_v34, 4  ;;  %v612_v60 = vrot.slane %v4682_v35, 4 }
  0xad   : > { %3519 = vmatprep.subr.bf16.mxu0 %v3988_v63  ;;  %1465 = vmatprep.mubr.bf16.mxu0 %v689_v7  ;;  %v656_v40 = vsel %vm648_vm7, %v654_v32, %v655_v33  ;;  %v658_v47 = vsel %vm648_vm7, %v655_v33, %v657_v38  ;;  %v4750_v63 = vrot.slane %v4330_v9, 1  ;;  %v4001_v7 = vld [vmem:[#allocation8 + $0x208] sm:$0xff]   ;;  %v639_v12 = vrot.slane %v4671_v28, 6  ;;  %v4004_v28 = vld [vmem:[#allocation8 + $0x250] sm:$0xff]   ;;  %v4008_v33 = vld [vmem:[#allocation8 + $0x258] sm:$0xff]  }
  0xae   : > { %3546 = vmatpush3.bf16.msra.mxu1 %v3987_v1  ;;  %1514 = vmatprep.mubr.bf16.mxu1 %v691_v19  ;;  %v702_v1 = vpack.c.bf16 %v628_v49, %v626_v46  ;;  %v704_v50 = vpack.c.bf16 %v658_v47, %v656_v40  ;;  %v4002_v19 = vld [vmem:[#allocation8 + $0x2c8] sm:$0xff]   ;;  %v4762_v21 = vsel %vm603_vm8, %v610_v58, %v612_v60  ;;  %v4006_v32 = vld [vmem:[#allocation8 + $0x2d0] sm:$0xff]   ;;  %v4010_v46 = vld [vmem:[#allocation8 + $0x2d8] sm:$0xff]  }
  0xaf   : > { %3547 = vmatprep.subr.bf16.mxu1 %v3990_v13  ;;  %v640_v13 = vrot.slane %v4678_v34, 6  ;;  %v665_v22 = vsel %vm559_vm1, %v563_v8, %v4750_v63  ;;  %v4012_v49 = vld [vmem:[#allocation8 + $0x260] sm:$0xff]   ;;  %v4021_v40 = vld [vmem:[#allocation8 + $0x230] sm:$0xff]   ;;  %v3320_v2 = vpack.c.bf16 %v4662_v25, %v4678_v34  ;;  %v671_v3 = vsel %vm538_vm0, %v582_v39, %v4598_v10  ;;  %v4035_v25 = vld [vmem:[#allocation8 + $0x338] sm:$0xff]  }
  0xb0   : > { %3520 = vmatpush3.bf16.msra.mxu0 %v3989_v6  ;;  %v690_v6 = vpack.c.bf16 %v638_v54, %v636_v53  ;;  %v693_v8 = vpack.c.bf16 %v665_v22, %v4613_v17  ;;  %v4014_v17 = vld [vmem:[#allocation8 + $0x2e0] sm:$0xff]   ;;  %v4016_v53 = vld [vmem:[#allocation8 + $0x268] sm:$0xff]   ;;  %v707_v5 = vpack.c.bf16 %v671_v3, %v4711_v61  ;;  %v4139_v47 = vld [vmem:[#allocation8 + $0x678] sm:$0xff]  }
  0xb1   : > { %3521 = vmatprep.subr.bf16.mxu0 %v3992_v18  ;;  %v4756_v18 = vrot.slane %v4330_v9, 3  ;;  %v641_v29 = vsel %vm633_vm9, %v639_v12, %v640_v13  ;;  %v4017_v54 = vld [vmem:[#allocation8 + $0x228] sm:$0xff]   ;;  %v4026_v12 = vld [vmem:[#allocation8 + $0x2f8] sm:$0xff]   ;;  %v4037_v61 = vld [vmem:[#allocation8 + $0x400] sm:$0xff]  }
  0xb2   : > { %3548 = vmatpush3.bf16.msra.mxu1 %v3991_v16  ;;  %v642_v16 = vrot.slane %v4682_v35, 6  ;;  %v4040_v22 = vld [vmem:[#allocation8 + $0x388] sm:$0xff]  }
  0xb3   : > { %3549 = vmatprep.subr.bf16.mxu1 %v3994_v31  ;;  %v675_v31 = vsel %vm588_vm3, %v592_v14, %v4756_v18  ;;  %v4011_v14 = vld [vmem:[#allocation8 + $0x298] sm:$0xff]   ;;  %v4043_v35 = vld [vmem:[#allocation8 + $0x3c8] sm:$0xff]  }
  0xb4   : > { %3522 = vmatpush3.bf16.msra.mxu0 %v3993_v20  ;;  %v611_v20 = vsel %vm603_vm8, %v609_v57, %v610_v58  ;;  %v643_v30 = vsel %vm633_vm9, %v640_v13, %v642_v16  ;;  %v4020_v57 = vld [vmem:[#allocation8 + $0x270] sm:$0xff]   ;;  %v4019_v58 = vld [vmem:[#allocation8 + $0x2a8] sm:$0xff]   ;;  %v4027_v13 = vld [vmem:[#allocation8 + $0x2b8] sm:$0xff]   ;;  %v666_v16 = vsel %vm559_vm1, %v568_v43, %v4750_v63 }
  0xb5   : > { %3563 = vmatprep.subr.bf16.mxu0 %v3996_v42  ;;  %v701_v26 = vpack.c.bf16 %v4762_v21, %v611_v20  ;;  %v703_v38 = vpack.c.bf16 %v643_v30, %v641_v29  ;;  %v695_v42 = vpack.c.bf16 %v675_v31, %v4622_v23  ;;  %v4015_v23 = vld [vmem:[#allocation8 + $0x2a0] sm:$0xff]   ;;  %v676_v20 = vsel %vm588_vm3, %v597_v51, %v4756_v18  ;;  %v4030_v43 = vld [vmem:[#allocation8 + $0x310] sm:$0xff]   ;;  %v4048_v30 = vld [vmem:[#allocation8 + $0x398] sm:$0xff]  }
  0xb6   : > { %3550 = vmatpush3.bf16.msra.mxu1 %v3995_v41  ;;  %v4007_v41 = vld [vmem:[#allocation8 + $0x290] sm:$0xff]   ;;  %v4049_v31 = vld [vmem:[#allocation8 + $0x418] sm:$0xff]  }
  0xb7   : > { %1466 = vmatmul.mubr.bf16.vlgmr.msra.gmra.mrb[8].mxu0 %v688_v52  ;;  %3591 = vmatprep.subr.bf16.mxu1 %v3998_v56  ;;  %v4013_v52 = vld [vmem:[#allocation8 + $0x220] sm:$0xff]   ;;  %v4018_v56 = vld [vmem:[#allocation8 + $0x2e8] sm:$0xff]   ;;  %v4047_v29 = vld [vmem:[#allocation8 + $0x3d0] sm:$0xff]  }
  0xb8   : > { %3564 = vmatpush3.bf16.msra.mxu0 %v3997_v44  ;;  %1473 = vmatprep.mubr.bf16.mxu0 %v702_v1  ;;  %v4009_v44 = vld [vmem:[#allocation8 + $0x218] sm:$0xff]   ;;  %v4023_v1 = vld [vmem:[#allocation8 + $0x2b0] sm:$0xff]  }
  0xb9   : > { %3565 = vmatprep.subr.bf16.mxu0 %v4000_v0  ;;  %1515 = vmatmul.mubr.bf16.vlgmr.msra.gmra.mrb[8].mxu1 %v690_v6  ;;  %v4784_v0 = vrot.slane %v4330_v9, 4  ;;  %v4024_v6 = vld [vmem:[#allocation8 + $0x278] sm:$0xff]   ;;  %v706_v9 = vpack.c.bf16 %v666_v16, %v4698_v55 }
  0xba   : > { %3592 = vmatpush3.bf16.msra.mxu1 %v3999_v48  ;;  %1522 = vmatprep.mubr.bf16.mxu1 %v704_v50  ;;  %v4022_v48 = vld [vmem:[#allocation8 + $0x2f0] sm:$0xff]   ;;  %v4028_v50 = vld [vmem:[#allocation8 + $0x300] sm:$0xff]  }
  0xbb   : > { %3593 = vmatprep.subr.bf16.mxu1 %v4002_v19  ;;  %v4029_v19 = vld [vmem:[#allocation8 + $0x308] sm:$0xff]   ;;  %v680_v55 = vsel %vm603_vm8, %v607_v15, %v4784_v0  ;;  %v681_v34 = vsel %vm603_vm8, %v612_v60, %v4784_v0  ;;  %v4038_v15 = vld [vmem:[#allocation8 + $0x340] sm:$0xff]   ;;  %v4044_v60 = vld [vmem:[#allocation8 + $0x390] sm:$0xff]  }
  0xbc   : > { %3566 = vmatpush3.bf16.msra.mxu0 %v4001_v7  ;;  %v4025_v7 = vld [vmem:[#allocation8 + $0x238] sm:$0xff]   ;;  %v696_v51 = vpack.c.bf16 %v680_v55, %v4734_v4  ;;  %v709_v39 = vpack.c.bf16 %v681_v34, %v4762_v21  ;;  %v4039_v4 = vld [vmem:[#allocation8 + $0x3c0] sm:$0xff]   ;;  %v4046_v21 = vld [vmem:[#allocation8 + $0x350] sm:$0xff]  }
  0xbd   : > { %3567 = vmatprep.subr.bf16.mxu0 %v4004_v28  ;;  %v708_v28 = vpack.c.bf16 %v676_v20, %v4705_v59  ;;  %v4036_v59 = vld [vmem:[#allocation8 + $0x380] sm:$0xff]  }
  0xbe   : > { %3594 = vmatpush3.bf16.msra.mxu1 %v4003_v24  ;;  %v4041_v24 = vld [vmem:[#allocation8 + $0x408] sm:$0xff]  }
  0xbf   : > { %1474 = vmatmul.mubr.bf16.gmra.mrb[12].mxu0 %v701_v26  ;;  %3595 = vmatprep.subr.bf16.mxu1 %v4006_v32  ;;  %v4042_v26 = vld [vmem:[#allocation8 + $0x348] sm:$0xff]   ;;  %v4050_v32 = vld [vmem:[#allocation8 + $0x358] sm:$0xff]  }
  0xc0   : > { %3568 = vmatpush3.bf16.msra.mxu0 %v4005_v27  ;;  %1563 = vmatprep.mubr.bf16.mxu0 %v693_v8  ;;  %v4045_v27 = vld [vmem:[#allocation8 + $0x410] sm:$0xff]   ;;  %v4051_v8 = vld [vmem:[#allocation8 + $0x3d8] sm:$0xff]  }
  0xc1   : > { %3569 = vmatprep.subr.bf16.mxu0 %v4008_v33  ;;  %1523 = vmatmul.mubr.bf16.gmra.mrb[12].mxu1 %v703_v38  ;;  %v4052_v33 = vld [vmem:[#allocation8 + $0x3a0] sm:$0xff]  }
  0xc2   : > { %3596 = vmatpush3.bf16.msra.mxu1 %v4007_v41  ;;  %1612 = vmatprep.mubr.bf16.mxu1 %v695_v42  ;;  %v4053_v38 = vld [vmem:[#allocation8 + $0x420] sm:$0xff]  }
  0xc3   : > { %3597 = vmatprep.subr.bf16.mxu1 %v4010_v46  ;;  %v4054_v41 = vld [vmem:[#allocation8 + $0x360] sm:$0xff]   ;;  %v4057_v46 = vld [vmem:[#allocation8 + $0x428] sm:$0xff]  }
  0xc4   : > { %3570 = vmatpush3.bf16.msra.mxu0 %v4009_v44  ;;  %v4055_v42 = vld [vmem:[#allocation8 + $0x3e0] sm:$0xff]   ;;  %v4056_v44 = vld [vmem:[#allocation8 + $0x3a8] sm:$0xff]  }
  0xc5   : > { %3571 = vmatprep.subr.bf16.mxu0 %v4012_v49  ;;  %v4058_v49 = vld [vmem:[#allocation8 + $0x368] sm:$0xff]  }
  0xc6   : > { %3598 = vmatpush3.bf16.msra.mxu1 %v4011_v14  ;;  %v4059_v14 = vld [vmem:[#allocation8 + $0x3e8] sm:$0xff]  }
  0xc7   : > { %3599 = vmatprep.subr.bf16.mxu1 %v4014_v17  ;;  %v4061_v17 = vld [vmem:[#allocation8 + $0x430] sm:$0xff]  }
  0xc8   : > { %3572 = vmatpush3.bf16.msra.mxu0 %v4013_v52  ;;  %v4060_v52 = vld [vmem:[#allocation8 + $0x3b0] sm:$0xff]  }
  0xc9   : > { %3573 = vmatprep.subr.bf16.mxu0 %v4016_v53  ;;  %v4062_v53 = vld [vmem:[#allocation8 + $0x370] sm:$0xff]  }
  0xca   : > { %3600 = vmatpush3.bf16.msra.mxu1 %v4015_v23  ;;  %v4063_v23 = vld [vmem:[#allocation8 + $0x3f0] sm:$0xff]  }
  0xcb   : > { %3601 = vmatprep.subr.bf16.mxu1 %v4018_v56  ;;  %v4065_v56 = vld [vmem:[#allocation8 + $0x438] sm:$0xff]  }
  0xcc   : > { %3574 = vmatpush3.bf16.msra.mxu0 %v4017_v54  ;;  %v4064_v54 = vld [vmem:[#allocation8 + $0x3b8] sm:$0xff]  }
  0xcd   : > { %3575 = vmatprep.subr.bf16.mxu0 %v4020_v57  ;;  %v4066_v57 = vld [vmem:[#allocation8 + $0x378] sm:$0xff]  }
  0xce   : > { %3602 = vmatpush3.bf16.msra.mxu1 %v4019_v58  ;;  %v4067_v58 = vld [vmem:[#allocation8 + $0x3f8] sm:$0xff]  }
  0xcf   : > { %3603 = vmatprep.subr.bf16.mxu1 %v4022_v48  ;;  %v4069_v48 = vld [vmem:[#allocation8 + $0x500] sm:$0xff]  }
  0xd0   : > { %3576 = vmatpush3.bf16.msra.mxu0 %v4021_v40  ;;  %v4068_v40 = vld [vmem:[#allocation8 + $0x480] sm:$0xff]  }
  0xd1   : > { %3577 = vmatprep.subr.bf16.mxu0 %v4024_v6  ;;  %v710_v6 = vstv %s3203_s14 }
  0xd2   : > { %3604 = vmatpush3.bf16.msra.mxu1 %v4023_v1 }
  0xd3   : > { %3605 = vmatprep.subr.bf16.mxu1 %v4026_v12 }
  0xd4   : > { %3578 = vmatpush3.bf16.msra.mxu0 %v4025_v7 }
  0xd5   : > { %3807 = vmatprep.subr.bf16.mxu0 %v4028_v50 }
  0xd6   : > { %3606 = vmatpush3.bf16.msra.mxu1 %v4027_v13 }
  0xd7   : > { %3318 = vmatmul.mubr.msk.bf16.vlgmr.msra.gmra.mrb[16].mxu0 %vm4779_vm10, %v3317_v62  ;;  %v4031_v62 = vld [vmem:[#allocation8 + $0x318] sm:$0xff]   ;;  %3629 = vmatprep.subr.bf16.mxu1 %v4036_v59 }
  0xd8   : > { %3808 = vmatpush3.bf16.msra.mxu0 %v4028_v50  ;;  %1571 = vmatprep.mubr.bf16.mxu0 %v706_v9 }
  0xd9   : > { %3809 = vmatprep.subr.bf16.mxu0 %v4029_v19  ;;  %1613 = vmatmul.mubr.bf16.vlgmr.msra.gmra.mrb[16].mxu1 %v694_v45  ;;  %v4034_v45 = vld [vmem:[#allocation8 + $0x330] sm:$0xff]  }
  0xda   : > { %1620 = vmatprep.mubr.bf16.mxu1 %v708_v28  ;;  %3630 = vmatpush3.bf16.msra.mxu1 %v4038_v15 }
  0xdb   : > { %3631 = vmatprep.subr.bf16.mxu1 %v4040_v22 }
  0xdc   : > { %3810 = vmatpush3.bf16.msra.mxu0 %v4029_v19 }
  0xdd   : > { %3811 = vmatprep.subr.bf16.mxu0 %v4030_v43 }
  0xde   : > { %3632 = vmatpush3.bf16.msra.mxu1 %v4042_v26 }
  0xdf   : > { %3321 = vmatmul.mubr.msk.bf16.gmra.mrb[20].mxu0 %vm4779_vm10, %v3320_v2  ;;  %3633 = vmatprep.subr.bf16.mxu1 %v4044_v60 }
  0xe0   : > { %3812 = vmatpush3.bf16.msra.mxu0 %v4030_v43  ;;  %3823 = vmatprep.mubr.bf16.mxu0 %v696_v51 }
  0xe1   : > { %3813 = vmatprep.subr.bf16.mxu0 %v4031_v62  ;;  %1621 = vmatmul.mubr.bf16.gmra.mrb[20].mxu1 %v707_v5 }
  0xe2   : > { %3634 = vmatpush3.bf16.msra.mxu1 %v4046_v21 }
  0xe3   : > { %3635 = vmatprep.subr.bf16.mxu1 %v4048_v30 }
  0xe4   : > { %3814 = vmatpush3.bf16.msra.mxu0 %v4031_v62 }
  0xe5   : > { %3815 = vmatprep.subr.bf16.mxu0 %v4032_v36 }
  0xe6   : > { %3636 = vmatpush3.bf16.msra.mxu1 %v4050_v32 }
  0xe7   : > { %3637 = vmatprep.subr.bf16.mxu1 %v4052_v33 }
  0xe8   : > { %3816 = vmatpush3.bf16.msra.mxu0 %v4032_v36 }
  0xe9   : > { %3817 = vmatprep.subr.bf16.mxu0 %v4033_v37 }
  0xea   : > { %3638 = vmatpush3.bf16.msra.mxu1 %v4054_v41 }
  0xeb   : > { %3639 = vmatprep.subr.bf16.mxu1 %v4056_v44 }
  0xec   : > { %3818 = vmatpush3.bf16.msra.mxu0 %v4033_v37 }
  0xed   : > { %3819 = vmatprep.subr.bf16.mxu0 %v4034_v45 }
  0xee   : > { %3640 = vmatpush3.bf16.msra.mxu1 %v4058_v49 }
  0xef   : > { %3641 = vmatprep.subr.bf16.mxu1 %v4060_v52 }
  0xf0   : > { %3820 = vmatpush3.bf16.msra.mxu0 %v4034_v45 }
  0xf1   : > { %3821 = vmatprep.subr.bf16.mxu0 %v4035_v25 }
  0xf2   : > { %3642 = vmatpush3.bf16.msra.mxu1 %v4062_v53 }
  0xf3   : > { %3643 = vmatprep.subr.bf16.mxu1 %v4064_v54 }
  0xf4   : > { %3822 = vmatpush3.bf16.msra.mxu0 %v4035_v25 }
  0xf5   : > { %3657 = vmatprep.subr.bf16.mxu0 %v4037_v61 }
  0xf6   : > { %3644 = vmatpush3.bf16.msra.mxu1 %v4066_v57 }
  0xf7   : > { %3824 = vmatmul.mubr.bf16.vlgmr.msra.gmra.mrb[24].mxu0 %v709_v39  ;;  %3685 = vmatprep.subr.bf16.mxu1 %v4068_v40 }
  0xf8   : > { %3658 = vmatpush3.bf16.msra.mxu0 %v4039_v4 }
  0xf9   : > { %3659 = vmatprep.subr.bf16.mxu0 %v4041_v24 }
  0xfc   : > { %3660 = vmatpush3.bf16.msra.mxu0 %v4043_v35 }
  0xfd   : > { %3661 = vmatprep.subr.bf16.mxu0 %v4045_v27 }
 0x100   : > { %3662 = vmatpush3.bf16.msra.mxu0 %v4047_v29 }
 0x101   : > { %3663 = vmatprep.subr.bf16.mxu0 %v4049_v31 }
 0x104   : > { %3664 = vmatpush3.bf16.msra.mxu0 %v4051_v8 }
 0x105   : > { %3665 = vmatprep.subr.bf16.mxu0 %v4053_v38 }
 0x108   : > { %3666 = vmatpush3.bf16.msra.mxu0 %v4055_v42 }
 0x109   : > { %3667 = vmatprep.subr.bf16.mxu0 %v4057_v46 }
 0x10c   : > { %3668 = vmatpush3.bf16.msra.mxu0 %v4059_v14 }
 0x10d   : > { %3669 = vmatprep.subr.bf16.mxu0 %v4061_v17 }
 0x110   : > { %3670 = vmatpush3.bf16.msra.mxu0 %v4063_v23 }
 0x111   : > { %3671 = vmatprep.subr.bf16.mxu0 %v4065_v56 }
 0x114   : > { %3672 = vmatpush3.bf16.msra.mxu0 %v4067_v58 }
 0x115   : > { %3713 = vmatprep.subr.bf16.mxu0 %v4069_v48 }
 0x16a   : > { %v3467_v1 = vpop.f32.mrb[0].mxu0 }
 0x16b   : > { %v3468_v7 = vpop.f32.mrb[1].mxu0 }
 0x16c   : > { %v3469_v12 = vadd.f32 %v3468_v7, %v3467_v1  ;;  %v3470_v50 = vpop.f32.mrb[2].mxu0  ;;  %v3495_v13 = vpop.f32.mrb[0].mxu1 }
 0x16d   : > { %v3471_v16 = vpop.f32.mrb[3].mxu0  ;;  %v3496_v20 = vpop.f32.mrb[1].mxu1 }
 0x16e   : > { %v1370_v19 = vadd.f32 %v3469_v12, %v710_v6  ;;  %v3472_v9 = vadd.f32 %v3471_v16, %v3470_v50  ;;  %v3497_v43 = vadd.f32 %v3496_v20, %v3495_v13  ;;  %v3498_v28 = vpop.f32.mrb[2].mxu1 }
 0x16f   : > { %v3499_v2 = vpop.f32.mrb[3].mxu1 }
 0x170   : > { %v1373_v55 = vadd.f32 %v3472_v9, %v710_v6  ;;  %v1419_v3 = vadd.f32 %v3497_v43, %v1370_v19  ;;  %v3500_v62 = vadd.f32 %v3499_v2, %v3498_v28 }
 0x172   : > { %v1422_v51 = vadd.f32 %v3500_v62, %v1373_v55 }
 0x17d   : > { %v3473_v5 = vpop.f32.mrb[4].mxu0 }
 0x17e   : > { %v3474_v36 = vpop.f32.mrb[5].mxu0 }
 0x17f   : > { %v3501_v37 = vpop.f32.mrb[4].mxu1  ;;  %v3475_v45 = vadd.f32 %v3474_v36, %v3473_v5  ;;  %v3476_v25 = vpop.f32.mrb[6].mxu0 }
 0x180   : > { %v3502_v34 = vpop.f32.mrb[5].mxu1  ;;  %v3477_v39 = vpop.f32.mrb[7].mxu0 }
 0x181   : > { %v3503_v59 = vadd.f32 %v3502_v34, %v3501_v37  ;;  %v3504_v61 = vpop.f32.mrb[6].mxu1  ;;  %v1378_v15 = vadd.f32 %v3475_v45, %v710_v6  ;;  %v3478_v4 = vadd.f32 %v3477_v39, %v3476_v25 }
 0x182   : > { %v3505_v22 = vpop.f32.mrb[7].mxu1 }
 0x183   : > { %v3506_v24 = vadd.f32 %v3505_v22, %v3504_v61  ;;  %v1381_v26 = vadd.f32 %v3478_v4, %v710_v6  ;;  %v1427_v35 = vadd.f32 %v3503_v59, %v1378_v15 }
 0x185   : > { %v1430_v60 = vadd.f32 %v3506_v24, %v1381_v26 }
 0x18a   : > { %v3523_v27 = vpop.f32.mrb[8].mxu0 }
 0x18b   : > { %v3524_v21 = vpop.f32.mrb[9].mxu0 }
 0x18c   : > { %v3525_v29 = vadd.f32 %v3524_v21, %v3523_v27  ;;  %v3526_v30 = vpop.f32.mrb[10].mxu0  ;;  %v3551_v31 = vpop.f32.mrb[8].mxu1 }
 0x18d   : > { %v3527_v32 = vpop.f32.mrb[11].mxu0  ;;  %v3552_v38 = vpop.f32.mrb[9].mxu1 }
 0x18e   : > { %v1468_v8 = vadd.f32 %v3525_v29, %v1419_v3  ;;  %v3528_v33 = vadd.f32 %v3527_v32, %v3526_v30  ;;  %v3553_v41 = vadd.f32 %v3552_v38, %v3551_v31  ;;  %v3554_v42 = vpop.f32.mrb[10].mxu1 }
 0x18f   : > { %v3555_v46 = vpop.f32.mrb[11].mxu1 }
 0x190   : > { %v1471_v44 = vadd.f32 %v3528_v33, %v1422_v51  ;;  %v1517_v49 = vadd.f32 %v3553_v41, %v1468_v8  ;;  %v3556_v14 = vadd.f32 %v3555_v46, %v3554_v42 }
 0x192   : > { %v3529_v52 = vpop.f32.mrb[12].mxu0  ;;  %v1520_v17 = vadd.f32 %v3556_v14, %v1471_v44 }
 0x193   : > { %v3530_v53 = vpop.f32.mrb[13].mxu0 }
 0x194   : > { %v3531_v23 = vadd.f32 %v3530_v53, %v3529_v52  ;;  %v3532_v54 = vpop.f32.mrb[14].mxu0  ;;  %v3557_v56 = vpop.f32.mrb[12].mxu1 }
 0x195   : > { %v3533_v57 = vpop.f32.mrb[15].mxu0  ;;  %v3558_v48 = vpop.f32.mrb[13].mxu1 }
 0x196   : > { %v1476_v58 = vadd.f32 %v3531_v23, %v1427_v35  ;;  %v3534_v40 = vadd.f32 %v3533_v57, %v3532_v54  ;;  %v3559_v1 = vadd.f32 %v3558_v48, %v3557_v56  ;;  %v3560_v6 = vpop.f32.mrb[14].mxu1 }
 0x197   : > { %v3561_v12 = vpop.f32.mrb[15].mxu1 }
 0x198   : > { %v1479_v7 = vadd.f32 %v3534_v40, %v1430_v60  ;;  %v1525_v50 = vadd.f32 %v3559_v1, %v1476_v58  ;;  %v3562_v13 = vadd.f32 %v3561_v12, %v3560_v6 }
 0x19a   : > { %v1528_v16 = vadd.f32 %v3562_v13, %v1479_v7 }
 0x1aa   : > { %v3579_v19 = vpop.f32.mrb[16].mxu0 }
 0x1ab   : > { %v3580_v9 = vpop.f32.mrb[17].mxu0 }
 0x1ac   : > { %v3581_v20 = vadd.f32 %v3580_v9, %v3579_v19  ;;  %v3582_v43 = vpop.f32.mrb[18].mxu0  ;;  %v3607_v28 = vpop.f32.mrb[16].mxu1 }
 0x1ad   : > { %v3583_v55 = vpop.f32.mrb[19].mxu0  ;;  %v3608_v62 = vpop.f32.mrb[17].mxu1 }
 0x1ae   : > { %v1566_v2 = vadd.f32 %v3581_v20, %v1517_v49  ;;  %v3584_v3 = vadd.f32 %v3583_v55, %v3582_v43  ;;  %v3609_v51 = vadd.f32 %v3608_v62, %v3607_v28  ;;  %v3610_v5 = vpop.f32.mrb[18].mxu1 }
 0x1af   : > { %v3611_v37 = vpop.f32.mrb[19].mxu1 }
 0x1b0   : > { %v1569_v36 = vadd.f32 %v3584_v3, %v1520_v17  ;;  %v3612_v45 = vadd.f32 %v3611_v37, %v3610_v5  ;;  %v1615_v25 = vadd.f32 %v3609_v51, %v1566_v2 }
 0x1b2   : > { %v3585_v34 = vpop.f32.mrb[20].mxu0  ;;  %v1618_v59 = vadd.f32 %v3612_v45, %v1569_v36 }
 0x1b3   : > { %v3586_v39 = vpop.f32.mrb[21].mxu0 }
 0x1b4   : > { %v3587_v61 = vadd.f32 %v3586_v39, %v3585_v34  ;;  %v3588_v15 = vpop.f32.mrb[22].mxu0  ;;  %v3613_v4 = vpop.f32.mrb[20].mxu1 }
 0x1b5   : > { %v3589_v22 = vpop.f32.mrb[23].mxu0  ;;  %v3614_v35 = vpop.f32.mrb[21].mxu1 }
 0x1b6   : > { %v1574_v24 = vadd.f32 %v3587_v61, %v1525_v50  ;;  %v3590_v26 = vadd.f32 %v3589_v22, %v3588_v15  ;;  %v3615_v60 = vadd.f32 %v3614_v35, %v3613_v4  ;;  %v3616_v27 = vpop.f32.mrb[22].mxu1  ;;  %v4070_v61 = vld [vmem:[#allocation8 + $0x440] sm:$0xff]   ;;  %v4072_v35 = vld [vmem:[#allocation8 + $0x488] sm:$0xff]  }
 0x1b7   : > { %v3617_v29 = vpop.f32.mrb[23].mxu1 }
 0x1b8   : > { %v1577_v21 = vadd.f32 %v3590_v26, %v1528_v16  ;;  %v3618_v30 = vadd.f32 %v3617_v29, %v3616_v27  ;;  %v1623_v31 = vadd.f32 %v3615_v60, %v1574_v24  ;;  %v4071_v24 = vld [vmem:[#allocation8 + $0x4c0] sm:$0xff]  }
 0x1ba   : > { %v1626_v32 = vadd.f32 %v3618_v30, %v1577_v21  ;;  %v4073_v30 = vld [vmem:[#allocation8 + $0x508] sm:$0xff]  }
 0x1ca   : > { %v3825_v8 = vpop.f32.mrb[24].mxu0 }
 0x1cb   : > { %v1672_v33 = vadd.f32 %v3825_v8, %v1623_v31  ;;  %v1663_v38 = vpop.f32.mrb[25].mxu0 }
 0x1cc   : > { %v1664_v41 = vadd.f32 %v1663_v38, %v1615_v25  ;;  %v3826_v42 = vpop.f32.mrb[26].mxu0 }
 0x1cd   : > { %v1680_v44 = vmax.f32 %v1672_v33, 0.0  ;;  %v1675_v46 = vadd.f32 %v3826_v42, %v1626_v32  ;;  %v1666_v49 = vpop.f32.mrb[27].mxu0 }
 0x1ce   : > { %v1678_v14 = vmax.f32 %v1664_v41, 0.0  ;;  %v1667_v52 = vadd.f32 %v1666_v49, %v1618_v59 }
 0x1cf   : > { %v4823_v17 = vrot.slane %v1680_v44, 2  ;;  %v1681_v53 = vmax.f32 %v1675_v46, 0.0  ;;  %v4074_v44 = vld [vmem:[#allocation8 + $0x448] sm:$0xff]  }
 0x1d0   : > { %v1896_v23 = vrot.slane %v1678_v14, 2  ;;  %v1679_v54 = vmax.f32 %v1667_v52, 0.0  ;;  %v4075_v52 = vld [vmem:[#allocation8 + $0x4c8] sm:$0xff]  }
 0x1d1   : > { %v4827_v56 = vsel %vm538_vm0, 0.0, %v4823_v17  ;;  %v4829_v57 = vrot.slane %v1681_v53, 2 }
 0x1d2   : > { %v4832_v58 = vsel %vm538_vm0, 0.0, %v1896_v23  ;;  %v4834_v40 = vrot.slane %v1679_v54, 2  ;;  %v1921_v48 = vrot.slane %v4827_v56, 1  ;;  %v1949_v1 = vrot.slane %v4827_v56, 3  ;;  %v4077_v54 = vld [vmem:[#allocation8 + $0x510] sm:$0xff]  }
 0x1d3   : > { %v4841_v6 = vsel %vm538_vm0, %v4823_v17, %v4829_v57  ;;  %v4845_v7 = vsel %vm538_vm0, %v4829_v57, 0.0  ;;  %v1916_v12 = vrot.slane %v4832_v58, 1  ;;  %v1944_v50 = vrot.slane %v4832_v58, 3 }
 0x1d4   : > { %v3439_v13 = vpack.c.bf16 %v4829_v57, %v4841_v6  ;;  %v4853_v16 = vsel %vm538_vm0, %v1896_v23, %v4834_v40  ;;  %v4857_v19 = vsel %vm538_vm0, %v4834_v40, 0.0  ;;  %v1930_v9 = vrot.slane %v4832_v58, 2  ;;  %v4138_v57 = vld [vmem:[#allocation8 + $0x670] sm:$0xff]  }
 0x1d5   : > { %v3436_v20 = vpack.c.bf16 %v4834_v40, %v4853_v16  ;;  %v1917_v43 = vrot.slane %v4853_v16, 1  ;;  %v1919_v28 = vrot.slane %v4857_v19, 1  ;;  %v1945_v55 = vrot.slane %v4853_v16, 3  ;;  %v4135_v40 = vld [vmem:[#allocation8 + $0x658] sm:$0xff]  }
 0x1d6   : > { %v1947_v2 = vrot.slane %v4857_v19, 3  ;;  %v3429_v3 = vpack.c.bf16 %v4853_v16, %v1896_v23  ;;  %v1931_v62 = vrot.slane %v4853_v16, 2  ;;  %v1933_v51 = vrot.slane %v4857_v19, 2 }
 0x1d7   : > { %v1918_v5 = vsel %vm559_vm1, %v1916_v12, %v1917_v43  ;;  %v4873_v36 = vsel %vm559_vm1, %v1917_v43, %v1919_v28  ;;  %v1946_v37 = vsel %vm588_vm3, %v1944_v50, %v1945_v55  ;;  %v1922_v45 = vrot.slane %v4841_v6, 1 }
 0x1d8   : > { %v2031_v25 = vpack.c.bf16 %v4873_v36, %v1918_v5  ;;  %v4881_v34 = vsel %vm588_vm3, %v1945_v55, %v1947_v2  ;;  %v1932_v39 = vsel %vm538_vm0, %v1930_v9, %v1931_v62  ;;  %v4885_v59 = vsel %vm538_vm0, %v1931_v62, %v1933_v51  ;;  %v4078_v62 = vld [vmem:[#allocation8 + $0x450] sm:$0xff]  }
 0x1d9   : > { %v2033_v15 = vpack.c.bf16 %v4881_v34, %v1946_v37  ;;  %v4890_v4 = vsel %vm538_vm0, %v1933_v51, %v4598_v10  ;;  %v2032_v22 = vpack.c.bf16 %v4885_v59, %v1932_v39  ;;  %v1923_v26 = vsel %vm559_vm1, %v1921_v48, %v1922_v45 }
 0x1da   : > { %2713 = vmatprep.mubr.bf16.mxu1 %v2031_v25  ;;  %v2040_v60 = vpack.c.bf16 %v4890_v4, %v4885_v59  ;;  %v1924_v27 = vrot.slane %v4845_v7, 1  ;;  %v1950_v21 = vrot.slane %v4841_v6, 3  ;;  %v1952_v29 = vrot.slane %v4845_v7, 3  ;;  %v4079_v25 = vld [vmem:[#allocation8 + $0x4d0] sm:$0xff]  }
 0x1db   : > { %2762 = vmatprep.mubr.bf16.mxu0 %v2033_v15  ;;  %3430 = vmatmul.mubr.msk.bf16.vlgmr.msra.gmra.mrb[24].mxu1 %vm4601_vm5, %v3429_v3  ;;  %v3433_v31 = vpack.c.bf16 %v4841_v6, %v4823_v17  ;;  %v1935_v32 = vrot.slane %v4827_v56, 2  ;;  %v1936_v8 = vrot.slane %v4841_v6, 2  ;;  %v1938_v33 = vrot.slane %v4845_v7, 2  ;;  %v4076_v17 = vld [vmem:[#allocation8 + $0x490] sm:$0xff]  }
 0x1dc   : > { %2763 = vmatmul.mubr.bf16.vlgmr.msra.gmra.mrb[28].mxu0 %v2032_v22  ;;  %3686 = vmatpush3.bf16.msra.mxu1 %v4070_v61  ;;  %v4909_v38 = vsel %vm559_vm1, %v1922_v45, %v1924_v27  ;;  %v1951_v41 = vsel %vm588_vm3, %v1949_v1, %v1950_v21  ;;  %v4915_v42 = vsel %vm588_vm3, %v1950_v21, %v1952_v29  ;;  %v1972_v46 = vrot.slane %v4832_v58, 5 }
 0x1dd   : > { %3714 = vmatpush3.bf16.msra.mxu0 %v4071_v24  ;;  %v2044_v49 = vpack.c.bf16 %v4909_v38, %v1923_v26  ;;  %v2046_v14 = vpack.c.bf16 %v4915_v42, %v1951_v41  ;;  %3687 = vmatprep.subr.bf16.mxu1 %v4072_v35  ;;  %v1937_v53 = vsel %vm538_vm0, %v1935_v32, %v1936_v8  ;;  %v1973_v23 = vrot.slane %v4853_v16, 5  ;;  %v4080_v26 = vld [vmem:[#allocation8 + $0x498] sm:$0xff]  }
 0x1de   : > { %3715 = vmatprep.subr.bf16.mxu0 %v4073_v30  ;;  %v4925_v48 = vsel %vm538_vm0, %v1936_v8, %v1938_v33  ;;  %v1975_v1 = vrot.slane %v4857_v19, 5  ;;  %v2000_v12 = vrot.slane %v4832_v58, 7  ;;  %v2001_v50 = vrot.slane %v4853_v16, 7  ;;  %v4081_v32 = vld [vmem:[#allocation8 + $0x518] sm:$0xff]  }
 0x1df   : > { %2721 = vmatprep.mubr.bf16.mxu1 %v2044_v49  ;;  %2770 = vmatprep.mubr.bf16.mxu0 %v2046_v14  ;;  %v2045_v9 = vpack.c.bf16 %v4925_v48, %v1937_v53  ;;  %v1974_v43 = vsel %vm618_vm6, %v1972_v46, %v1973_v23  ;;  %v2003_v55 = vrot.slane %v4857_v19, 7  ;;  %v1958_v3 = vrot.slane %v4832_v58, 4  ;;  %v4082_v46 = vld [vmem:[#allocation8 + $0x458] sm:$0xff]  }
 0x1e0   : > { %3688 = vmatpush3.bf16.msra.mxu1 %v4074_v44  ;;  %v1976_v51 = vsel %vm618_vm6, %v1973_v23, %v1975_v1  ;;  %v2002_v5 = vsel %vm648_vm7, %v2000_v12, %v2001_v50  ;;  %v1959_v37 = vrot.slane %v4853_v16, 4  ;;  %v1961_v45 = vrot.slane %v4857_v19, 4  ;;  %v4085_v12 = vld [vmem:[#allocation8 + $0x520] sm:$0xff]  }
 0x1e1   : > { %3716 = vmatpush3.bf16.msra.mxu0 %v4075_v52  ;;  %3689 = vmatprep.subr.bf16.mxu1 %v4076_v17  ;;  %v2035_v39 = vpack.c.bf16 %v1976_v51, %v1974_v43  ;;  %v2004_v61 = vsel %vm648_vm7, %v2001_v50, %v2003_v55  ;;  %v1986_v15 = vrot.slane %v4832_v58, 6  ;;  %v1987_v22 = vrot.slane %v4853_v16, 6  ;;  %v4083_v52 = vld [vmem:[#allocation8 + $0x4d8] sm:$0xff]   ;;  %v4084_v17 = vld [vmem:[#allocation8 + $0x4a0] sm:$0xff]  }
 0x1e2   : > { %3717 = vmatprep.subr.bf16.mxu0 %v4077_v54  ;;  %v2037_v24 = vpack.c.bf16 %v2004_v61, %v2002_v5  ;;  %v4942_v35 = vsel %vm603_vm8, %v1958_v3, %v1959_v37  ;;  %v4947_v21 = vsel %vm603_vm8, %v1959_v37, %v1961_v45  ;;  %v1989_v30 = vrot.slane %v4857_v19, 6  ;;  %v4086_v37 = vld [vmem:[#allocation8 + $0x460] sm:$0xff]   ;;  %v4095_v19 = vld [vmem:[#allocation8 + $0x4f0] sm:$0xff]  }
 0x1e3   : > { %3434 = vmatmul.mubr.msk.bf16.gmra.mrb[28].mxu1 %vm4601_vm5, %v3433_v31  ;;  %v2034_v58 = vpack.c.bf16 %v4947_v21, %v4942_v35  ;;  %v4955_v8 = vsel %vm633_vm9, %v1986_v15, %v1987_v22  ;;  %v1977_v41 = vrot.slane %v4827_v56, 5  ;;  %v1978_v44 = vrot.slane %v4841_v6, 5  ;;  %v4110_v35 = vld [vmem:[#allocation8 + $0x550] sm:$0xff]   ;;  %v4136_v16 = vld [vmem:[#allocation8 + $0x660] sm:$0xff]  }
 0x1e4   : > { %2771 = vmatmul.mubr.bf16.gmra.mrb[32].mxu0 %v2045_v9  ;;  %3690 = vmatpush3.bf16.msra.mxu1 %v4078_v62  ;;  %v4960_v49 = vsel %vm633_vm9, %v1987_v22, %v1989_v30  ;;  %v1980_v11 = vrot.slane %v4845_v7, 5  ;;  %v2005_v31 = vrot.slane %v4827_v56, 7  ;;  %v2006_v14 = vrot.slane %v4841_v6, 7  ;;  %v4088_v22 = vld [vmem:[#allocation8 + $0x4a8] sm:$0xff]  }
 0x1e5   : > { %3718 = vmatpush3.bf16.msra.mxu0 %v4079_v25  ;;  %2811 = vmatprep.mubr.bf16.mxu1 %v2035_v39  ;;  %v2036_v53 = vpack.c.bf16 %v4960_v49, %v4955_v8  ;;  %v4968_v23 = vsel %vm618_vm6, %v1977_v41, %v1978_v44  ;;  %v2008_v54 = vrot.slane %v4845_v7, 7  ;;  %v1963_v1 = vrot.slane %v4827_v56, 4  ;;  %v4089_v41 = vld [vmem:[#allocation8 + $0x528] sm:$0xff]   ;;  %v4112_v8 = vld [vmem:[#allocation8 + $0x598] sm:$0xff]  }
 0x1e6   : > { %2860 = vmatprep.mubr.bf16.mxu0 %v2037_v24  ;;  %3691 = vmatprep.subr.bf16.mxu1 %v4080_v26  ;;  %v4973_v50 = vsel %vm618_vm6, %v1978_v44, %v1980_v11  ;;  %v4976_v9 = vsel %vm648_vm7, %v2005_v31, %v2006_v14  ;;  %v1964_v43 = vrot.slane %v4841_v6, 4  ;;  %v1966_v55 = vrot.slane %v4845_v7, 4  ;;  %v4113_v49 = vld [vmem:[#allocation8 + $0x618] sm:$0xff]  }
 0x1e7   : > { %3719 = vmatprep.subr.bf16.mxu0 %v4081_v32  ;;  %v2048_v3 = vpack.c.bf16 %v4973_v50, %v4968_v23  ;;  %v4983_v62 = vsel %vm648_vm7, %v2006_v14, %v2008_v54  ;;  %v1991_v51 = vrot.slane %v4827_v56, 6  ;;  %v1992_v5 = vrot.slane %v4841_v6, 6  ;;  %v4087_v56 = vld [vmem:[#allocation8 + $0x4e0] sm:$0xff]   ;;  %v4092_v54 = vld [vmem:[#allocation8 + $0x4b0] sm:$0xff]   ;;  %v4115_v23 = vld [vmem:[#allocation8 + $0x5d8] sm:$0xff]  }
 0x1e8   : > { %3692 = vmatpush3.bf16.msra.mxu1 %v4082_v46  ;;  %v2050_v25 = vpack.c.bf16 %v4983_v62, %v4976_v9  ;;  %v4990_v39 = vsel %vm603_vm8, %v1963_v1, %v1964_v43  ;;  %v4993_v61 = vsel %vm603_vm8, %v1964_v43, %v1966_v55  ;;  %v4997_v15 = vsel %vm603_vm8, %v1966_v55, %v4784_v0  ;;  %v4099_v9 = vld [vmem:[#allocation8 + $0x4f8] sm:$0xff]   ;;  %v4100_v43 = vld [vmem:[#allocation8 + $0x580] sm:$0xff]  }
 0x1e9   : > { %3720 = vmatpush3.bf16.msra.mxu0 %v4083_v52  ;;  %3693 = vmatprep.subr.bf16.mxu1 %v4084_v17  ;;  %v2047_v24 = vpack.c.bf16 %v4993_v61, %v4990_v39  ;;  %v2055_v26 = vpack.c.bf16 %v4997_v15, %v4993_v61  ;;  %v5004_v30 = vsel %vm633_vm9, %v1991_v51, %v1992_v5  ;;  %v1994_v32 = vrot.slane %v4845_v7, 6  ;;  %v4091_v17 = vld [vmem:[#allocation8 + $0x4e8] sm:$0xff]   ;;  %v4093_v7 = vld [vmem:[#allocation8 + $0x530] sm:$0xff]   ;;  %v4101_v55 = vld [vmem:[#allocation8 + $0x600] sm:$0xff]  }
 0x1ea   : > { %3721 = vmatprep.subr.bf16.mxu0 %v4085_v12  ;;  %v5011_v44 = vsel %vm559_vm1, %v1919_v28, %v4750_v63  ;;  %v5017_v46 = vsel %vm588_vm3, %v1947_v2, %v4756_v18  ;;  %v5023_v11 = vsel %vm559_vm1, %v1924_v27, %v4750_v63  ;;  %v5029_v31 = vsel %vm588_vm3, %v1952_v29, %v4756_v18  ;;  %v4090_v63 = vld [vmem:[#allocation8 + $0x468] sm:$0xff]   ;;  %v4102_v62 = vld [vmem:[#allocation8 + $0x540] sm:$0xff]  }
 0x1eb   : > { %v5032_v28 = vsel %vm633_vm9, %v1992_v5, %v1994_v32  ;;  %v2039_v14 = vpack.c.bf16 %v5011_v44, %v4873_v36  ;;  %v2041_v2 = vpack.c.bf16 %v5017_v46, %v4881_v34  ;;  %v2052_v52 = vpack.c.bf16 %v5023_v11, %v4909_v38  ;;  %v4103_v51 = vld [vmem:[#allocation8 + $0x5c0] sm:$0xff]   ;;  %v4104_v5 = vld [vmem:[#allocation8 + $0x588] sm:$0xff]   ;;  %v4109_v32 = vld [vmem:[#allocation8 + $0x610] sm:$0xff]  }
 0x1ec   : > { %3694 = vmatpush3.bf16.msra.mxu1 %v4086_v37  ;;  %v2049_v27 = vpack.c.bf16 %v5032_v28, %v5004_v30  ;;  %v2054_v18 = vpack.c.bf16 %v5029_v31, %v4915_v42  ;;  %v5048_v29 = vsel %vm538_vm0, %v1938_v33, %v4598_v10  ;;  %v5054_v36 = vsel %vm603_vm8, %v1961_v45, %v4784_v0  ;;  %v4094_v10 = vld [vmem:[#allocation8 + $0x470] sm:$0xff]   ;;  %v4096_v33 = vld [vmem:[#allocation8 + $0x4b8] sm:$0xff]   ;;  %v4105_v37 = vld [vmem:[#allocation8 + $0x608] sm:$0xff]  }
 0x1ed   : > { %3722 = vmatpush3.bf16.msra.mxu0 %v4087_v56  ;;  %3695 = vmatprep.subr.bf16.mxu1 %v4088_v22  ;;  %v2053_v1 = vpack.c.bf16 %v5048_v29, %v4925_v48  ;;  %v2042_v12 = vpack.c.bf16 %v5054_v36, %v4947_v21  ;;  %v4097_v0 = vld [vmem:[#allocation8 + $0x538] sm:$0xff]   ;;  %v4106_v56 = vld [vmem:[#allocation8 + $0x548] sm:$0xff]   ;;  %v4108_v30 = vld [vmem:[#allocation8 + $0x590] sm:$0xff]   ;;  %v2056_v59 = vstv %s3322_s25 }
 0x1ee   : > { %3723 = vmatprep.subr.bf16.mxu0 %v4089_v41  ;;  %v4098_v45 = vld [vmem:[#allocation8 + $0x478] sm:$0xff]   ;;  %v4107_v22 = vld [vmem:[#allocation8 + $0x5c8] sm:$0xff]   ;;  %v4116_v50 = vld [vmem:[#allocation8 + $0x5a0] sm:$0xff]  }
 0x1ef   : > { %v4119_v39 = vld [vmem:[#allocation8 + $0x5e0] sm:$0xff]   ;;  %v4121_v41 = vld [vmem:[#allocation8 + $0x628] sm:$0xff]   ;;  %v4124_v46 = vld [vmem:[#allocation8 + $0x5b0] sm:$0xff]  }
 0x1f0   : > { %3696 = vmatpush3.bf16.msra.mxu1 %v4090_v63  ;;  %v4122_v44 = vld [vmem:[#allocation8 + $0x568] sm:$0xff]   ;;  %v4125_v28 = vld [vmem:[#allocation8 + $0x630] sm:$0xff]   ;;  %v4128_v63 = vld [vmem:[#allocation8 + $0x5b8] sm:$0xff]  }
 0x1f1   : > { %3724 = vmatpush3.bf16.msra.mxu0 %v4091_v17  ;;  %3697 = vmatprep.subr.bf16.mxu1 %v4092_v54  ;;  %v4123_v34 = vld [vmem:[#allocation8 + $0x5e8] sm:$0xff]   ;;  %v4130_v17 = vld [vmem:[#allocation8 + $0x578] sm:$0xff]  }
 0x1f2   : > { %3725 = vmatprep.subr.bf16.mxu0 %v4093_v7  ;;  %v4131_v54 = vld [vmem:[#allocation8 + $0x5f8] sm:$0xff]   ;;  %v4132_v7 = vld [vmem:[#allocation8 + $0x640] sm:$0xff]  }
 0x1f4   : > { %3698 = vmatpush3.bf16.msra.mxu1 %v4094_v10  ;;  %v4133_v10 = vld [vmem:[#allocation8 + $0x648] sm:$0xff]  }
 0x1f5   : > { %3726 = vmatpush3.bf16.msra.mxu0 %v4095_v19  ;;  %3699 = vmatprep.subr.bf16.mxu1 %v4096_v33  ;;  %v4134_v19 = vld [vmem:[#allocation8 + $0x650] sm:$0xff]  }
 0x1f6   : > { %3727 = vmatprep.subr.bf16.mxu0 %v4097_v0 }
 0x1f8   : > { %3700 = vmatpush3.bf16.msra.mxu1 %v4098_v45 }
 0x1f9   : > { %3728 = vmatpush3.bf16.msra.mxu0 %v4099_v9  ;;  %3741 = vmatprep.subr.bf16.mxu1 %v4100_v43 }
 0x1fa   : > { %3769 = vmatprep.subr.bf16.mxu0 %v4101_v55 }
 0x1fb   : > { %2812 = vmatmul.mubr.bf16.vlgmr.msra.gmra.mrb[32].mxu1 %v2034_v58  ;;  %v4111_v58 = vld [vmem:[#allocation8 + $0x5d0] sm:$0xff]  }
 0x1fc   : > { %2861 = vmatmul.mubr.bf16.vlgmr.msra.gmra.mrb[36].mxu0 %v2036_v53  ;;  %2819 = vmatprep.mubr.bf16.mxu1 %v2048_v3  ;;  %v4114_v53 = vld [vmem:[#allocation8 + $0x558] sm:$0xff]   ;;  %v4117_v3 = vld [vmem:[#allocation8 + $0x620] sm:$0xff]  }
 0x1fd   : > { %2868 = vmatprep.mubr.bf16.mxu0 %v2050_v25  ;;  %3742 = vmatpush3.bf16.msra.mxu1 %v4102_v62  ;;  %v4118_v25 = vld [vmem:[#allocation8 + $0x560] sm:$0xff]  }
 0x1fe   : > { %3770 = vmatpush3.bf16.msra.mxu0 %v4103_v51  ;;  %3743 = vmatprep.subr.bf16.mxu1 %v4104_v5 }
 0x1ff   : > { %3771 = vmatprep.subr.bf16.mxu0 %v4105_v37 }
 0x201   : > { %3744 = vmatpush3.bf16.msra.mxu1 %v4106_v56 }
 0x202   : > { %3772 = vmatpush3.bf16.msra.mxu0 %v4107_v22  ;;  %3745 = vmatprep.subr.bf16.mxu1 %v4108_v30 }
 0x203   : > { %2820 = vmatmul.mubr.bf16.gmra.mrb[36].mxu1 %v2047_v24  ;;  %3773 = vmatprep.subr.bf16.mxu0 %v4109_v32  ;;  %v4120_v24 = vld [vmem:[#allocation8 + $0x5a8] sm:$0xff]  }
 0x204   : > { %2869 = vmatmul.mubr.bf16.gmra.mrb[40].mxu0 %v2049_v27  ;;  %2909 = vmatprep.mubr.bf16.mxu1 %v2039_v14  ;;  %v4126_v14 = vld [vmem:[#allocation8 + $0x570] sm:$0xff]   ;;  %v4129_v27 = vld [vmem:[#allocation8 + $0x638] sm:$0xff]  }
 0x205   : > { %3746 = vmatpush3.bf16.msra.mxu1 %v4110_v35  ;;  %2958 = vmatprep.mubr.bf16.mxu0 %v2041_v2  ;;  %v4127_v2 = vld [vmem:[#allocation8 + $0x5f0] sm:$0xff]  }
 0x206   : > { %3774 = vmatpush3.bf16.msra.mxu0 %v4111_v58  ;;  %3747 = vmatprep.subr.bf16.mxu1 %v4112_v8 }
 0x207   : > { %3775 = vmatprep.subr.bf16.mxu0 %v4113_v49 }
 0x209   : > { %3748 = vmatpush3.bf16.msra.mxu1 %v4114_v53 }
 0x20a   : > { %3776 = vmatpush3.bf16.msra.mxu0 %v4115_v23  ;;  %3749 = vmatprep.subr.bf16.mxu1 %v4116_v50 }
 0x20b   : > { %3777 = vmatprep.subr.bf16.mxu0 %v4117_v3 }
 0x20d   : > { %3750 = vmatpush3.bf16.msra.mxu1 %v4118_v25 }
 0x20e   : > { %3778 = vmatpush3.bf16.msra.mxu0 %v4119_v39  ;;  %3751 = vmatprep.subr.bf16.mxu1 %v4120_v24 }
 0x20f   : > { %3779 = vmatprep.subr.bf16.mxu0 %v4121_v41 }
 0x211   : > { %3752 = vmatpush3.bf16.msra.mxu1 %v4122_v44 }
 0x212   : > { %3780 = vmatpush3.bf16.msra.mxu0 %v4123_v34  ;;  %3753 = vmatprep.subr.bf16.mxu1 %v4124_v46 }
 0x213   : > { %3781 = vmatprep.subr.bf16.mxu0 %v4125_v28 }
 0x215   : > { %3754 = vmatpush3.bf16.msra.mxu1 %v4126_v14 }
 0x216   : > { %3782 = vmatpush3.bf16.msra.mxu0 %v4127_v2  ;;  %3755 = vmatprep.subr.bf16.mxu1 %v4128_v63 }
 0x217   : > { %3783 = vmatprep.subr.bf16.mxu0 %v4129_v27 }
 0x219   : > { %3756 = vmatpush3.bf16.msra.mxu1 %v4130_v17 }
 0x21a   : > { %3784 = vmatpush3.bf16.msra.mxu0 %v4131_v54  ;;  %3827 = vmatprep.subr.bf16.mxu1 %v4132_v7 }
 0x21c   : > { %3437 = vmatmul.mubr.msk.bf16.vlgmr.msra.gmra.mrb[40].mxu1 %vm4779_vm10, %v3436_v20  ;;  %v4137_v20 = vld [vmem:[#allocation8 + $0x668] sm:$0xff]  }
 0x21d   : > { %2959 = vmatmul.mubr.bf16.vlgmr.msra.gmra.mrb[44].mxu0 %v2040_v60  ;;  %2917 = vmatprep.mubr.bf16.mxu1 %v2052_v52 }
 0x21e   : > { %2966 = vmatprep.mubr.bf16.mxu0 %v2054_v18  ;;  %3828 = vmatpush3.bf16.msra.mxu1 %v4132_v7 }
 0x21f   : > { %3829 = vmatprep.subr.bf16.mxu1 %v4133_v10 }
 0x222   : > { %3830 = vmatpush3.bf16.msra.mxu1 %v4133_v10 }
 0x223   : > { %3831 = vmatprep.subr.bf16.mxu1 %v4134_v19 }
 0x224   : > { %3440 = vmatmul.mubr.msk.bf16.gmra.mrb[44].mxu1 %vm4779_vm10, %v3439_v13 }
 0x225   : > { %2967 = vmatmul.mubr.bf16.gmra.mrb[48].mxu0 %v2053_v1  ;;  %3843 = vmatprep.mubr.bf16.mxu1 %v2042_v12 }
 0x226   : > { %3832 = vmatpush3.bf16.msra.mxu1 %v4134_v19 }
 0x227   : > { %3833 = vmatprep.subr.bf16.mxu1 %v4135_v40 }
 0x22a   : > { %3834 = vmatpush3.bf16.msra.mxu1 %v4135_v40 }
 0x22b   : > { %3835 = vmatprep.subr.bf16.mxu1 %v4136_v16 }
 0x22e   : > { %3836 = vmatpush3.bf16.msra.mxu1 %v4136_v16 }
 0x22f   : > { %3837 = vmatprep.subr.bf16.mxu1 %v4137_v20 }
 0x232   : > { %3838 = vmatpush3.bf16.msra.mxu1 %v4137_v20 }
 0x233   : > { %3839 = vmatprep.subr.bf16.mxu1 %v4138_v57 }
 0x236   : > { %3840 = vmatpush3.bf16.msra.mxu1 %v4138_v57 }
 0x237   : > { %3841 = vmatprep.subr.bf16.mxu1 %v4139_v47 }
 0x23a   : > { %3842 = vmatpush3.bf16.msra.mxu1 %v4139_v47 }
 0x23d   : > { %3844 = vmatmul.mubr.bf16.vlgmr.msra.gmra.mrb[48].mxu1 %v2055_v26 }
 0x2ae   : > { %v3645_v6 = vpop.f32.mrb[24].mxu1 }
 0x2af   : > { %v3673_v13 = vpop.f32.mrb[28].mxu0  ;;  %v3646_v4 = vpop.f32.mrb[25].mxu1 }
 0x2b0   : > { %v3647_v60 = vadd.f32 %v3646_v4, %v3645_v6  ;;  %v3674_v38 = vpop.f32.mrb[29].mxu0  ;;  %v3648_v42 = vpop.f32.mrb[26].mxu1 }
 0x2b1   : > { %v3675_v48 = vadd.f32 %v3674_v38, %v3673_v13  ;;  %v3676_v21 = vpop.f32.mrb[30].mxu0  ;;  %v3649_v11 = vpop.f32.mrb[27].mxu1 }
 0x2b2   : > { %v2716_v31 = vadd.f32 %v3647_v60, %v2056_v59  ;;  %v3650_v52 = vadd.f32 %v3649_v11, %v3648_v42  ;;  %v3677_v18 = vpop.f32.mrb[31].mxu0 }
 0x2b3   : > { %v3678_v29 = vadd.f32 %v3677_v18, %v3676_v21 }
 0x2b4   : > { %v2765_v36 = vadd.f32 %v3675_v48, %v2716_v31  ;;  %v2719_v1 = vadd.f32 %v3650_v52, %v2056_v59 }
 0x2b6   : > { %v2768_v12 = vadd.f32 %v3678_v29, %v2719_v1  ;;  %v3651_v61 = vpop.f32.mrb[28].mxu1 }
 0x2b7   : > { %v3679_v15 = vpop.f32.mrb[32].mxu0  ;;  %v3652_v26 = vpop.f32.mrb[29].mxu1 }
 0x2b8   : > { %v3653_v33 = vadd.f32 %v3652_v26, %v3651_v61  ;;  %v3680_v0 = vpop.f32.mrb[33].mxu0  ;;  %v3654_v45 = vpop.f32.mrb[30].mxu1 }
 0x2b9   : > { %v3681_v9 = vadd.f32 %v3680_v0, %v3679_v15  ;;  %v3682_v43 = vpop.f32.mrb[34].mxu0  ;;  %v3655_v55 = vpop.f32.mrb[31].mxu1 }
 0x2ba   : > { %v2724_v62 = vadd.f32 %v3653_v33, %v2056_v59  ;;  %v3656_v51 = vadd.f32 %v3655_v55, %v3654_v45  ;;  %v3683_v5 = vpop.f32.mrb[35].mxu0 }
 0x2bb   : > { %v3684_v37 = vadd.f32 %v3683_v5, %v3682_v43 }
 0x2bc   : > { %v2773_v56 = vadd.f32 %v3681_v9, %v2724_v62  ;;  %v2727_v22 = vadd.f32 %v3656_v51, %v2056_v59 }
 0x2be   : > { %v2776_v30 = vadd.f32 %v3684_v37, %v2727_v22 }
 0x2ce   : > { %v3701_v32 = vpop.f32.mrb[32].mxu1 }
 0x2cf   : > { %v3729_v35 = vpop.f32.mrb[36].mxu0  ;;  %v3702_v58 = vpop.f32.mrb[33].mxu1 }
 0x2d0   : > { %v3703_v8 = vadd.f32 %v3702_v58, %v3701_v32  ;;  %v3730_v49 = vpop.f32.mrb[37].mxu0  ;;  %v3704_v53 = vpop.f32.mrb[34].mxu1 }
 0x2d1   : > { %v3731_v23 = vadd.f32 %v3730_v49, %v3729_v35  ;;  %v3732_v50 = vpop.f32.mrb[38].mxu0  ;;  %v3705_v3 = vpop.f32.mrb[35].mxu1 }
 0x2d2   : > { %v2814_v25 = vadd.f32 %v3703_v8, %v2765_v36  ;;  %v3706_v39 = vadd.f32 %v3705_v3, %v3704_v53  ;;  %v3733_v24 = vpop.f32.mrb[39].mxu0 }
 0x2d3   : > { %v3734_v41 = vadd.f32 %v3733_v24, %v3732_v50 }
 0x2d4   : > { %v2863_v44 = vadd.f32 %v3731_v23, %v2814_v25  ;;  %v2817_v34 = vadd.f32 %v3706_v39, %v2768_v12 }
 0x2d6   : > { %v2866_v46 = vadd.f32 %v3734_v41, %v2817_v34  ;;  %v3707_v28 = vpop.f32.mrb[36].mxu1 }
 0x2d7   : > { %v3735_v14 = vpop.f32.mrb[40].mxu0  ;;  %v3708_v2 = vpop.f32.mrb[37].mxu1 }
 0x2d8   : > { %v3709_v63 = vadd.f32 %v3708_v2, %v3707_v28  ;;  %v3736_v27 = vpop.f32.mrb[41].mxu0  ;;  %v3710_v17 = vpop.f32.mrb[38].mxu1 }
 0x2d9   : > { %v3737_v54 = vadd.f32 %v3736_v27, %v3735_v14  ;;  %v3738_v7 = vpop.f32.mrb[42].mxu0  ;;  %v3711_v10 = vpop.f32.mrb[39].mxu1 }
 0x2da   : > { %v2822_v19 = vadd.f32 %v3709_v63, %v2773_v56  ;;  %v3712_v40 = vadd.f32 %v3711_v10, %v3710_v17  ;;  %v3739_v16 = vpop.f32.mrb[43].mxu0 }
 0x2db   : > { %v3740_v20 = vadd.f32 %v3739_v16, %v3738_v7 }
 0x2dc   : > { %v2871_v57 = vadd.f32 %v3737_v54, %v2822_v19  ;;  %v2825_v47 = vadd.f32 %v3712_v40, %v2776_v30 }
 0x2de   : > { %v2874_v6 = vadd.f32 %v3740_v20, %v2825_v47 }
 0x2ef   : > { %v3757_v13 = vpop.f32.mrb[40].mxu1 }
 0x2f0   : > { %v3785_v59 = vpop.f32.mrb[44].mxu0  ;;  %v3758_v4 = vpop.f32.mrb[41].mxu1 }
 0x2f1   : > { %v3759_v60 = vadd.f32 %v3758_v4, %v3757_v13  ;;  %v3786_v38 = vpop.f32.mrb[45].mxu0  ;;  %v3760_v42 = vpop.f32.mrb[42].mxu1 }
 0x2f2   : > { %v3787_v48 = vadd.f32 %v3786_v38, %v3785_v59  ;;  %v3788_v21 = vpop.f32.mrb[46].mxu0  ;;  %v3761_v11 = vpop.f32.mrb[43].mxu1 }
 0x2f3   : > { %v2912_v31 = vadd.f32 %v3759_v60, %v2863_v44  ;;  %v3762_v52 = vadd.f32 %v3761_v11, %v3760_v42  ;;  %v3789_v18 = vpop.f32.mrb[47].mxu0 }
 0x2f4   : > { %v3790_v29 = vadd.f32 %v3789_v18, %v3788_v21 }
 0x2f5   : > { %v2915_v36 = vadd.f32 %v3762_v52, %v2866_v46  ;;  %v2961_v1 = vadd.f32 %v3787_v48, %v2912_v31 }
 0x2f7   : > { %v3763_v12 = vpop.f32.mrb[44].mxu1  ;;  %v2964_v61 = vadd.f32 %v3790_v29, %v2915_v36 }
 0x2f8   : > { %v3791_v15 = vpop.f32.mrb[48].mxu0  ;;  %v3764_v26 = vpop.f32.mrb[45].mxu1 }
 0x2f9   : > { %v3765_v33 = vadd.f32 %v3764_v26, %v3763_v12  ;;  %v3792_v0 = vpop.f32.mrb[49].mxu0  ;;  %v3766_v45 = vpop.f32.mrb[46].mxu1 }
 0x2fa   : > { %v3793_v9 = vadd.f32 %v3792_v0, %v3791_v15  ;;  %v3794_v43 = vpop.f32.mrb[50].mxu0  ;;  %v3767_v55 = vpop.f32.mrb[47].mxu1 }
 0x2fb   : > { %v2920_v62 = vadd.f32 %v3765_v33, %v2871_v57  ;;  %v3768_v51 = vadd.f32 %v3767_v55, %v3766_v45  ;;  %v3795_v5 = vpop.f32.mrb[51].mxu0 }
 0x2fc   : > { %v3796_v37 = vadd.f32 %v3795_v5, %v3794_v43 }
 0x2fd   : > { %v2923_v56 = vadd.f32 %v3768_v51, %v2874_v6  ;;  %v2969_v22 = vadd.f32 %v3793_v9, %v2920_v62 }
 0x2ff   : > { %v2972_v30 = vadd.f32 %v3796_v37, %v2923_v56 }
 0x310   : > { %v3845_v32 = vpop.f32.mrb[48].mxu1 }
 0x311   : > { %v3018_v35 = vadd.f32 %v3845_v32, %v2969_v22  ;;  %v3009_v58 = vpop.f32.mrb[49].mxu1 }
 0x312   : > { %v3010_v8 = vadd.f32 %v3009_v58, %v2961_v1  ;;  %v3846_v49 = vpop.f32.mrb[50].mxu1 }
 0x313   : > { %v3026_v53 = vsub.f32 0.0, %v3018_v35  ;;  %v3021_v23 = vadd.f32 %v3846_v49, %v2972_v30  ;;  %v3012_v50 = vpop.f32.mrb[51].mxu1 }
 0x314   : > { %v3024_v3 = vsub.f32 0.0, %v3010_v8  ;;  %v3013_v25 = vadd.f32 %v3012_v50, %v2964_v61 }
 0x315   : > { %v3032_v39 = vmul.f32 1.442695, %v3026_v53  ;;  %v3027_v24 = vsub.f32 0.0, %v3021_v23 }
 0x316   : > { %v3028_v41 = vmul.f32 1.442695, %v3024_v3  ;;  %v3025_v44 = vsub.f32 0.0, %v3013_v25 }
 0x317   : > { %4140 = vpow2.f32 %v3032_v39  ;;  %v3034_v34 = vmul.f32 1.442695, %v3027_v24 }
 0x318   : > { %4142 = vpow2.f32 %v3028_v41  ;;  %v3030_v46 = vmul.f32 1.442695, %v3025_v44 }
 0x319   : > { %4144 = vpow2.f32 %v3034_v34 }
 0x31a   : > { %4146 = vpow2.f32 %v3030_v46 }
 0x321   : > { %v4141_v28 = vpop.eup %4140 }
 0x322   : > { %v4143_v14 = vpop.eup %4142  ;;  %v3038_v2 = vadd.f32 1.0, %v4141_v28 }
 0x323   : > { %v4145_v63 = vpop.eup %4144  ;;  %v3036_v27 = vadd.f32 1.0, %v4143_v14 }
 0x324   : > { %v4147_v17 = vpop.eup %4146  ;;  %4148 = vrcp.f32 %v3038_v2  ;;  %v3039_v54 = vadd.f32 1.0, %v4145_v63 }
 0x325   : > { %4150 = vrcp.f32 %v3036_v27  ;;  %v3037_v7 = vadd.f32 1.0, %v4147_v17 }
 0x326   : > { %4152 = vrcp.f32 %v3039_v54 }
 0x327   : > { %4154 = vrcp.f32 %v3037_v7 }
 0x32e   : > { %v4149_v10 = vpop.eup %4148 }
 0x32f   : > { %v4151_v19 = vpop.eup %4150  ;;  %3046 = vst [vmem:[%s256_s28 + $0x10] sm:$0xff] %v4149_v10 }
 0x330   : > { %v4153_v40 = vpop.eup %4152  ;;  %3044 = vst [vmem:[%s256_s28] sm:$0xff] %v4151_v19 }
 0x331   : > { %v4155_v16 = vpop.eup %4154  ;;  %3047 = vst [vmem:[%s256_s28 + $0x18] sm:$0xff] %v4153_v40 }
 0x332   : > { %3045 = vst [vmem:[%s256_s28 + $0x8] sm:$0xff] %v4155_v16 }
 0x333   : > { %4255 = shalt.err (!%p4252_p0)
}
 0x334   : > { %s4256_s10 = scalar_lea.hbm %s5108_s5, 512  ;;  %s4260_s14 = scalar_lea.hbm %s5158_s4, 1024 }
 0x335   : > { %p4257_p5 = scmp.ne.s32.totalorder %s5108_s5, %s4256_s10  ;;  %p4261_p2 = scmp.lt.u32.totalorder %s5108_s5, %s5158_s4 }
 0x336   : > { %p4262_p11 = scmp.lt.u32.totalorder %s4260_s14, %s4256_s10  ;;  %p4264_p6 = scmp.lt.u32.totalorder %s4256_s10, %s5108_s5 }
 0x337   : > { %p4258_p4 = pnand %p4257_p5, %p5180_p9 }
 0x338   : > { %p4263_p8 = por %p4262_p11, %p4261_p2 }
 0x339   : > { %p4259_p10 = pneg %p4258_p4 }
 0x33a   : > { %p4265_p12 = por %p4264_p6, %p4263_p8 }
 0x33c   : > { %p4266_p3 = pnand %p4265_p12, %p4259_p10 }
 0x33e   : > { %4269 = shalt.err (!%p4266_p3)
}
 0x33f   : > { %s4333_s29 = smov 128   ;;  %s4334_s28 = smov 8  }
 0x340   : > { %3861 = dma.vmem_to_hbm [thread:$0]  (%p5180_p9), %s5110_s30, 512, %s5108_s5, %s3049_s19, %s4333_s29, %s4333_s29, %s4334_s28  }
 0x341 PF: > { %s3078_s6 = sand.u32 1, %s4308_s15   ;;  %p5181_p13 = scmp.ne.s32.totalorder %s5163_s22, 0 }
 0x342   : > { %p5182_p7 = scmp.ge.s32.totalorder %s4320_s18, 2  ;;  %s3079_s9 = scalar_lea.sflag [#allocation4], %s3078_s6 }
 0x344   : > { %p3878_p1 = pnand %p5182_p7, %p5181_p13 }
 0x346   : > { %4303 = dma.done.wait (!%p3878_p1), %s3079_s9, 512  }
 0x347   : > { %4305 = vsyncadd (!%p3878_p1), %s3079_s9, 4294966784  ;;  %p20_p0 = scmp.ge.s32.totalorder %s4468_s12, 4   ;;  %s5183_s15 = smov %s4312_s16 }
 0x348   : > { %s5184_s16 = smov %s4316_s17  ;;  %s5185_s17 = smov %s4478_s20 }
 0x349   : > { %s5186_s18 = smov %s4468_s12  ;;  %22 = sbr.rel (!%p20_p0) target bundleno = 8 (0x8), region = 100 }
 0x350   :  { %3084 = vsyncpa [#allocation3], 1 }
 0x351   :  { %3086 = vsyncpa [#allocation3 + $0x1], 1 }
 0x352   :  { %3087 = vsyncpa [#allocation10], 1 }
 0x353   :  { %3089 = vsyncpa [#allocation10 + $0x1], 1 }
 0x354   :  { %3090 = vsyncpa [#allocation4], 1 }
 0x355   :  { %3092 = vsyncpa [#allocation4 + $0x1], 1 }
 0x356   :  { %3093 = vsyncpa [#allocation5], 1 }
 0x357   :  { %3095 = vsyncpa [#allocation5 + $0x1], 1 }
 0x358   :  { %3096 = vsyncpa [#allocation6], 1 }
 0x359   :  { %3098 = vsyncpa [#allocation6 + $0x1], 1 }

</bundles_post_ra>
